<compile_context>
chip_gen: v6e
topology: v6e:2x2x1
jax: 0.10.0
libtpu: 0.0.40
codegen_flags: <defaults>
</compile_context>

<pallas_src>
import jax
import jax.numpy as jnp
import numpy as np
from jax import lax
from jax.experimental import pallas as pl
from jax.experimental.pallas import tpu as pltpu


def _make_word2vec_kernel(use_lane_gather: bool):
    """Builds the batch-tile kernel.

    use_lane_gather=True : pick the requested context scores with a lane gather
                           (jnp.take_along_axis) -- O(TB*Cpad) work.
    use_lane_gather=False: fallback one-hot select + lane reduce, chunked over the
                           context axis in 128-lane pieces (guaranteed Mosaic lowering).
    """

    def kernel(words_ref, cidx_ref, wtab_ref, ctab_ref, out_ref):
        TB, Cpad = out_ref.shape
        Vp, D = wtab_ref.shape
        tdt = wtab_ref.dtype  # tables' native dtype (f32 or bf16)

        # --- word-embedding rows via one-hot matmul on the MXU ---
        wids = words_ref[...]                                           # (TB, 1) int32
        iota_v = lax.broadcasted_iota(jnp.int32, (TB, Vp), 1)
        w_onehot = (wids == iota_v).astype(tdt)                         # (TB, Vp)
        w_emb = jnp.dot(w_onehot, wtab_ref[...],
                        preferred_element_type=jnp.float32)             # (TB, D) f32

        # --- all-vocab scores: (TB, D) @ (D, Vp) on the MXU, in the tables' dtype ---
        scores = lax.dot_general(w_emb.astype(tdt), ctab_ref[...],
                                 (((1,), (1,)), ((), ())),
                                 preferred_element_type=jnp.float32)    # (TB, Vp) f32

        cids = cidx_ref[...]                                            # (TB, Cpad) int32

        if use_lane_gather:
            # Lane gather: picked[b, j] = scores[b, cids[b, j]]
            picked = jnp.take_along_axis(scores, cids, axis=-1)         # (TB, Cpad)
            out_ref[...] = 1.0 / (1.0 + jnp.exp(-picked))               # exact sigmoid
        else:
            # Fallback: one-hot select + lane reduce, chunked in 128-lane pieces so the
            # 3D intermediate stays bounded and stores remain lane-aligned full vregs.
            for c0 in range(0, Cpad, 128):
                cs = cids[:, c0:c0 + 128]                               # (TB, 128)
                iota_sel = lax.broadcasted_iota(jnp.int32, (TB, 128, Vp), 2)
                sel = cs[:, :, None] == iota_sel                        # (TB, 128, Vp)
                picked = jnp.sum(jnp.where(sel, scores[:, None, :], 0.0), axis=-1)
                out_ref[:, c0:c0 + 128] = 1.0 / (1.0 + jnp.exp(-picked))

    return kernel


def word2vec_forward(words, positive_contexts, negative_contexts,
                     word_embeddings, context_embeddings):
    B = words.shape[0]
    P = positive_contexts.shape[1]
    N = negative_contexts.shape[1]
    C = P + N
    V, D = word_embeddings.shape

    # --- pad the vocab axis to a lane-dense multiple of 128 (zero rows appended) ---
    Vp = max(128, pl.cdiv(V, 128) * 128)
    wtab = jnp.pad(word_embeddings, ((0, Vp - V), (0, 0)))
    ctab = jnp.pad(context_embeddings, ((0, Vp - V), (0, 0)))

    # --- merge pos/neg indices into one slab, clamp, pad to a lane-dense width ---
    ctx = jnp.concatenate([positive_contexts, negative_contexts], axis=1)
    ctx = jnp.clip(ctx.astype(jnp.int32), 0, V - 1)      # VMEM reads have no bounds check
    Cpad = max(128, pl.cdiv(C, 128) * 128)
    ctx = jnp.pad(ctx, ((0, 0), (0, Cpad - C)))           # pad slots gather padding row 0

    # --- batch tiling on a "parallel" grid axis ---
    if B <= 128:
        TB = pl.cdiv(B, 8) * 8          # single small tile (demo path)
    elif B < 512:
        TB = 128                        # v5e sweet spot; still >=2 grid steps
    else:
        TB = 256                        # fills v6e/v7x 256-wide MXU; >=2 steps for 2 TCs
    Bp = pl.cdiv(B, TB) * TB
    wcol = jnp.clip(words.astype(jnp.int32), 0, V - 1).reshape(B, 1)
    wcol = jnp.pad(wcol, ((0, Bp - B), (0, 0)))
    ctx = jnp.pad(ctx, ((0, Bp - B), (0, 0)))

    def build(use_lane_gather):
        return pl.pallas_call(
            _make_word2vec_kernel(use_lane_gather),
            out_shape=jax.ShapeDtypeStruct((Bp, Cpad), jnp.float32),
            grid=(Bp // TB,),
            in_specs=[
                pl.BlockSpec((TB, 1), lambda i: (i, 0)),       # word ids (column)
                pl.BlockSpec((TB, Cpad), lambda i: (i, 0)),    # merged context ids
                # whole tables resident in VMEM, single-buffered (no per-step DMA)
                pl.BlockSpec(memory_space=pltpu.MemorySpace.VMEM),
                pl.BlockSpec(memory_space=pltpu.MemorySpace.VMEM),
            ],
            out_specs=pl.BlockSpec((TB, Cpad), lambda i: (i, 0)),
            compiler_params=pltpu.CompilerParams(
                dimension_semantics=("parallel",),             # megacore sharding on v7x
                vmem_limit_bytes=32 * 1024 * 1024,
            ),
        )

    try:
        out = build(True)(wcol, ctx, wtab, ctab)               # lane-gather path
        out = jax.block_until_ready(out)
    except Exception:
        # Mosaic build without take_along_axis lowering: chunked one-hot select fallback.
        out = build(False)(wcol, ctx, wtab, ctab)

    out = out[:B]
    return out[:, :P], out[:, P:C]


def word2vec_ref(words, pos, neg, wtab, ctab):
    """Pure-JAX reference mirroring the PyTorch forward."""
    w_p = wtab[words][:, None, :]          # (B, 1, D)
    c_p = ctab[pos]                        # (B, P, D)
    c_n = ctab[neg]                        # (B, N, D)
    wcp = jnp.sum(w_p * c_p, axis=2)       # (B, P)
    wcn = jnp.sum(w_p * c_n, axis=2)       # (B, N)
    return jax.nn.sigmoid(wcp), jax.nn.sigmoid(wcn)


if __name__ == "__main__":
    V, D = 64, 128          # vocabulary_size, embeddings_dimension
    B, P, N = 4, 8, 16      # batch, #positive contexts, #negative contexts
    # (B, P, N > 1 so torch's .squeeze() is the identity on the (B,P)/(B,N) outputs.)

    key = jax.random.PRNGKey(0)
    k1, k2, k3, k4, k5 = jax.random.split(key, 5)

    # Deterministic parameter init; padding_idx=0 -> row 0 is zeros in both tables.
    word_emb = (0.1 * jax.random.normal(k1, (V, D), jnp.float32)).at[0].set(0.0)
    ctx_emb = (0.1 * jax.random.normal(k2, (V, D), jnp.float32)).at[0].set(0.0)

    words = jax.random.randint(k3, (B,), 0, V, jnp.int32)
    pos_ctx = jax.random.randint(k4, (B, P), 0, V, jnp.int32)
    neg_ctx = jax.random.randint(k5, (B, N), 0, V, jnp.int32)

    out_p, out_n = word2vec_forward(words, pos_ctx, neg_ctx, word_emb, ctx_emb)
    jax.block_until_ready((out_p, out_n))

    ref_p, ref_n = word2vec_ref(words, pos_ctx, neg_ctx, word_emb, ctx_emb)
    np.testing.assert_allclose(np.asarray(out_p), np.asarray(ref_p), atol=1e-3, rtol=1e-3)
    np.testing.assert_allclose(np.asarray(out_n), np.asarray(ref_n), atol=1e-3, rtol=1e-3)

    print("KERNEL_OK")
</pallas_src>

<mosaic_0001>
module attributes {stable_mosaic.version = 11 : i64} {
  func.func @kernel(%arg0: i32, %arg1: memref<8x1xi32, #tpu.memory_space<vmem>>, %arg2: memref<8x128xi32, #tpu.memory_space<vmem>>, %arg3: memref<128x128xf32, #tpu.memory_space<vmem>>, %arg4: memref<128x128xf32, #tpu.memory_space<vmem>>, %arg5: memref<8x128xf32, #tpu.memory_space<vmem>>) attributes {dimension_semantics = [#tpu.dimension_semantics<parallel>], iteration_bounds = array<i64: 1>, scalar_prefetch = 0 : i64, scratch_operands = 0 : i64, tpu.core_type = #tpu.core_type<tc>, window_params = [{transform_indices = @transform_0, window_bounds = array<i64: 8, 1>}, {transform_indices = @transform_1, window_bounds = array<i64: 8, 128>}, {pipeline_mode = #tpu.pipeline_mode<synchronous>, transform_indices = @transform_2, window_bounds = array<i64: 128, 128>}, {pipeline_mode = #tpu.pipeline_mode<synchronous>, transform_indices = @transform_3, window_bounds = array<i64: 128, 128>}, {transform_indices = @transform_4, window_bounds = array<i64: 8, 128>}]} {
    %c0 = arith.constant 0 : index
    %c0_0 = arith.constant 0 : index
    %0 = vector.load %arg1[%c0, %c0_0] : memref<8x1xi32, #tpu.memory_space<vmem>>, vector<8x1xi32>
    %1 = tpu.iota {dimensions = array<i32: 1>} : vector<8x128xi32>
    %2 = vector.broadcast %0 : vector<8x1xi32> to vector<8x128xi32>
    %3 = arith.cmpi eq, %2, %1 : vector<8x128xi32>
    %4 = arith.extui %3 : vector<8x128xi1> to vector<8x128xi32>
    %5 = arith.sitofp %4 : vector<8x128xi32> to vector<8x128xf32>
    %c0_1 = arith.constant 0 : index
    %c0_2 = arith.constant 0 : index
    %6 = vector.load %arg3[%c0_1, %c0_2] : memref<128x128xf32, #tpu.memory_space<vmem>>, vector<128x128xf32>
    %cst = arith.constant dense<0.000000e+00> : vector<8x128xf32>
    %7 = tpu.matmul %5, %6, %cst {dimension_numbers = #tpu.dot_dimension_numbers<[1], [0], [0], [1], [0, 0, 1, 1], [], []>} : vector<8x128xf32>, vector<128x128xf32>, vector<8x128xf32> -> vector<8x128xf32>
    %c0_3 = arith.constant 0 : index
    %c0_4 = arith.constant 0 : index
    %8 = vector.load %arg4[%c0_3, %c0_4] : memref<128x128xf32, #tpu.memory_space<vmem>>, vector<128x128xf32>
    %cst_5 = arith.constant dense<0.000000e+00> : vector<8x128xf32>
    %9 = tpu.matmul %7, %8, %cst_5 {dimension_numbers = #tpu.dot_dimension_numbers<[1], [1], [0], [0], [0, 0, 1, 0], [], []>} : vector<8x128xf32>, vector<128x128xf32>, vector<8x128xf32> -> vector<8x128xf32>
    %c0_6 = arith.constant 0 : index
    %c0_7 = arith.constant 0 : index
    %10 = vector.load %arg2[%c0_6, %c0_7] : memref<8x128xi32, #tpu.memory_space<vmem>>, vector<8x128xi32>
    %c0_i32 = arith.constant 0 : i32
    %11 = vector.broadcast %c0_i32 : i32 to vector<8x128xi32>
    %12 = arith.cmpi slt, %10, %11 : vector<8x128xi32>
    %c128_i32 = arith.constant 128 : i32
    %13 = vector.broadcast %c128_i32 : i32 to vector<8x128xi32>
    %14 = arith.addi %10, %13 : vector<8x128xi32>
    %15 = arith.select %12, %14, %10 : vector<8x128xi1>, vector<8x128xi32>
    %16 = vector.shape_cast %15 : vector<8x128xi32> to vector<8x128x1xi32>
    %17 = vector.shape_cast %16 : vector<8x128x1xi32> to vector<8x128xi32>
    %18 = tpu.dynamic_gather %9[%17] in [1] : vector<8x128xf32>, vector<8x128xi32> -> vector<8x128xf32>
    %cst_8 = arith.constant 0.000000e+00 : f32
    %19 = vector.broadcast %cst_8 : f32 to vector<8x128xf32>
    %20 = arith.subf %19, %18 : vector<8x128xf32>
    %21 = math.exp %20 : vector<8x128xf32>
    %cst_9 = arith.constant 1.000000e+00 : f32
    %22 = vector.broadcast %cst_9 : f32 to vector<8x128xf32>
    %23 = arith.addf %22, %21 : vector<8x128xf32>
    %cst_10 = arith.constant 1.000000e+00 : f32
    %24 = vector.broadcast %cst_10 : f32 to vector<8x128xf32>
    %25 = arith.divf %24, %23 : vector<8x128xf32>
    %c0_11 = arith.constant 0 : index
    %c0_12 = arith.constant 0 : index
    %26 = vector.load %arg5[%c0_11, %c0_12] : memref<8x128xf32, #tpu.memory_space<vmem>>, vector<8x128xf32>
    tpu.vector_store %arg5[%c0_11, %c0_12], %25 {strides = array<i32>} : memref<8x128xf32, #tpu.memory_space<vmem>>, vector<8x128xf32>,
    return
  }
  func.func @transform_0(%arg0: i32) -> (i32, i32) {
    %c0_i32 = arith.constant 0 : i32
    %c0_i32_0 = arith.constant 0 : i32
    return %arg0, %c0_i32 : i32, i32
  }
  func.func @transform_1(%arg0: i32) -> (i32, i32) {
    %c0_i32 = arith.constant 0 : i32
    %c0_i32_0 = arith.constant 0 : i32
    return %arg0, %c0_i32 : i32, i32
  }
  func.func @transform_2(%arg0: i32) -> (i32, i32) {
    %c0_i32 = arith.constant 0 : i32
    %c0_i32_0 = arith.constant 0 : i32
    %c0_i32_1 = arith.constant 0 : i32
    return %c0_i32, %c0_i32_0 : i32, i32
  }
  func.func @transform_3(%arg0: i32) -> (i32, i32) {
    %c0_i32 = arith.constant 0 : i32
    %c0_i32_0 = arith.constant 0 : i32
    %c0_i32_1 = arith.constant 0 : i32
    return %c0_i32, %c0_i32_0 : i32, i32
  }
  func.func @transform_4(%arg0: i32) -> (i32, i32) {
    %c0_i32 = arith.constant 0 : i32
    %c0_i32_0 = arith.constant 0 : i32
    return %arg0, %c0_i32 : i32, i32
  }
}

module attributes {stable_mosaic.version = 11 : i64} {
  func.func @kernel(%arg0: i32, %arg1: memref<8x1xi32, #tpu.memory_space<vmem>>, %arg2: memref<8x128xi32, #tpu.memory_space<vmem>>, %arg3: memref<128x128xf32, #tpu.memory_space<vmem>>, %arg4: memref<128x128xf32, #tpu.memory_space<vmem>>, %arg5: memref<8x128xf32, #tpu.memory_space<vmem>>) attributes {dimension_semantics = [#tpu.dimension_semantics<parallel>], iteration_bounds = array<i64: 1>, scalar_prefetch = 0 : i64, scratch_operands = 0 : i64, tpu.core_type = #tpu.core_type<tc>, window_params = [{transform_indices = @transform_0, window_bounds = array<i64: 8, 1>}, {transform_indices = @transform_1, window_bounds = array<i64: 8, 128>}, {pipeline_mode = #tpu.pipeline_mode<synchronous>, transform_indices = @transform_2, window_bounds = array<i64: 128, 128>}, {pipeline_mode = #tpu.pipeline_mode<synchronous>, transform_indices = @transform_3, window_bounds = array<i64: 128, 128>}, {transform_indices = @transform_4, window_bounds = array<i64: 8, 128>}]} {
    %c0 = arith.constant 0 : index
    %c0_0 = arith.constant 0 : index
    %0 = vector.load %arg1[%c0, %c0_0] : memref<8x1xi32, #tpu.memory_space<vmem>>, vector<8x1xi32>
    %1 = tpu.iota {dimensions = array<i32: 1>} : vector<8x128xi32>
    %2 = vector.broadcast %0 : vector<8x1xi32> to vector<8x128xi32>
    %3 = arith.cmpi eq, %2, %1 : vector<8x128xi32>
    %4 = arith.extui %3 : vector<8x128xi1> to vector<8x128xi32>
    %5 = arith.sitofp %4 : vector<8x128xi32> to vector<8x128xf32>
    %c0_1 = arith.constant 0 : index
    %c0_2 = arith.constant 0 : index
    %6 = vector.load %arg3[%c0_1, %c0_2] : memref<128x128xf32, #tpu.memory_space<vmem>>, vector<128x128xf32>
    %cst = arith.constant dense<0.000000e+00> : vector<8x128xf32>
    %7 = tpu.matmul %5, %6, %cst {dimension_numbers = #tpu.dot_dimension_numbers<[1], [0], [0], [1], [0, 0, 1, 1], [], []>} : vector<8x128xf32>, vector<128x128xf32>, vector<8x128xf32> -> vector<8x128xf32>
    %c0_3 = arith.constant 0 : index
    %c0_4 = arith.constant 0 : index
    %8 = vector.load %arg4[%c0_3, %c0_4] : memref<128x128xf32, #tpu.memory_space<vmem>>, vector<128x128xf32>
    %cst_5 = arith.constant dense<0.000000e+00> : vector<8x128xf32>
    %9 = tpu.matmul %7, %8, %cst_5 {dimension_numbers = #tpu.dot_dimension_numbers<[1], [1], [0], [0], [0, 0, 1, 0], [], []>} : vector<8x128xf32>, vector<128x128xf32>, vector<8x128xf32> -> vector<8x128xf32>
    %c0_6 = arith.constant 0 : index
    %c0_7 = arith.constant 0 : index
    %10 = vector.load %arg2[%c0_6, %c0_7] : memref<8x128xi32, #tpu.memory_space<vmem>>, vector<8x128xi32>
    %11 = tpu.iota {dimensions = array<i32: 2>} : vector<8x128x128xi32>
    %12 = vector.shape_cast %10 : vector<8x128xi32> to vector<8x128x1xi32>
    %13 = vector.broadcast %12 : vector<8x128x1xi32> to vector<8x128x128xi32>
    %14 = arith.cmpi eq, %13, %11 : vector<8x128x128xi32>
    %15 = vector.shape_cast %9 : vector<8x128xf32> to vector<8x1x128xf32>
    %cst_8 = arith.constant 0.000000e+00 : f32
    %16 = vector.shape_cast %15 : vector<8x1x128xf32> to vector<8x1x128xf32>
    %17 = vector.broadcast %16 : vector<8x1x128xf32> to vector<8x128x128xf32>
    %18 = vector.broadcast %cst_8 : f32 to vector<8x128x128xf32>
    %19 = arith.select %14, %17, %18 : vector<8x128x128xi1>, vector<8x128x128xf32>
    %cst_9 = arith.constant dense<0.000000e+00> : vector<8x128xf32>
    %20 = vector.multi_reduction <add>, %19, %cst_9 [2] : vector<8x128x128xf32> to vector<8x128xf32>
    %cst_10 = arith.constant 0.000000e+00 : f32
    %21 = vector.broadcast %cst_10 : f32 to vector<8x128xf32>
    %22 = arith.subf %21, %20 : vector<8x128xf32>
    %23 = math.exp %22 : vector<8x128xf32>
    %cst_11 = arith.constant 1.000000e+00 : f32
    %24 = vector.broadcast %cst_11 : f32 to vector<8x128xf32>
    %25 = arith.addf %24, %23 : vector<8x128xf32>
    %cst_12 = arith.constant 1.000000e+00 : f32
    %26 = vector.broadcast %cst_12 : f32 to vector<8x128xf32>
    %27 = arith.divf %26, %25 : vector<8x128xf32>
    %c0_13 = arith.constant 0 : index
    %c0_14 = arith.constant 0 : index
    %28 = vector.load %arg5[%c0_13, %c0_14] : memref<8x128xf32, #tpu.memory_space<vmem>>, vector<8x128xf32>
    tpu.vector_store %arg5[%c0_13, %c0_14], %27 {strides = array<i32>} : memref<8x128xf32, #tpu.memory_space<vmem>>, vector<8x128xf32>,
    return
  }
  func.func @transform_0(%arg0: i32) -> (i32, i32) {
    %c0_i32 = arith.constant 0 : i32
    %c0_i32_0 = arith.constant 0 : i32
    return %arg0, %c0_i32 : i32, i32
  }
  func.func @transform_1(%arg0: i32) -> (i32, i32) {
    %c0_i32 = arith.constant 0 : i32
    %c0_i32_0 = arith.constant 0 : i32
    return %arg0, %c0_i32 : i32, i32
  }
  func.func @transform_2(%arg0: i32) -> (i32, i32) {
    %c0_i32 = arith.constant 0 : i32
    %c0_i32_0 = arith.constant 0 : i32
    %c0_i32_1 = arith.constant 0 : i32
    return %c0_i32, %c0_i32_0 : i32, i32
  }
  func.func @transform_3(%arg0: i32) -> (i32, i32) {
    %c0_i32 = arith.constant 0 : i32
    %c0_i32_0 = arith.constant 0 : i32
    %c0_i32_1 = arith.constant 0 : i32
    return %c0_i32, %c0_i32_0 : i32, i32
  }
  func.func @transform_4(%arg0: i32) -> (i32, i32) {
    %c0_i32 = arith.constant 0 : i32
    %c0_i32_0 = arith.constant 0 : i32
    return %arg0, %c0_i32 : i32, i32
  }
}

</mosaic_0001>

<bundles_post_ra>
// kernel: tpu_custom_call.1
= control target key start
LH: loop header
LB: loop body
LE: loop exit
PB: predicated region body
PF: predicated region fallthrough
CT: control target
= control target key end

     0   :  { %9 = vsyncpa [#allocation3], 0  ;;  %s527_s0 = inlined_call_operand.vmem [shape: s32[8,1], index: 0, kind: input, shape index: {}]   ;;  %s528_s1 = inlined_call_operand.vmem [shape: s32[8,128], index: 1, kind: input, shape index: {}]   ;;  %s529_s2 = inlined_call_operand.hbm [shape: f32[128,128], index: 2, kind: input, shape index: {}]   ;;  %s530_s3 = inlined_call_operand.hbm [shape: f32[128,128], index: 3, kind: input, shape index: {}]   ;;  %s531_s4 = inlined_call_operand.hbm [shape: f32[8,128], index: 4, kind: output, shape index: {}]  }
   0x1   :  { %10 = vsyncpa [#allocation6], 0 }
   0x2   :  { %11 = vsyncpa [#allocation4], 0  ;;  %s444_s15 = smov [#allocation2]  }
   0x3   :  { %s21_s16 = sshll.u32 %s444_s15, 4  ;;  %s22_s16 = int_to_ptr.vmem [resolvable:$true] %s21_s16 }
   0x4   :  { %s386_s17 = scalar_lea.vmem %s22_s16, 2048  ;;  %p391_p1 = scmp.lt.s32.totalorder %s22_s16, %s22_s16 }
   0x5   :  { %p387_p0 = scmp.ne.s32.totalorder %s22_s16, %s386_s17  ;;  %p392_p2 = scmp.lt.s32.totalorder %s386_s17, %s386_s17 }
   0x7   :  { %p393_p3 = por %p392_p2, %p391_p1 }
   0x9   :  { %p394_p4 = pnand %p393_p3, %p387_p0 }
   0xb   :  { %397 = shalt.err (!%p394_p4)
}
   0xc   :  { %s445_s18 = smov 128   ;;  %s446_s19 = smov 8  }
   0xd   :  { %27 = dma.hbm_to_vmem [thread:$0]  %s529_s2, 2048, %s22_s16, [#allocation3], %s445_s18, %s445_s18, %s446_s19  }
   0xe   :  { %s447_s22 = smov [#allocation5]  }
   0xf   :  { %s33_s23 = sshll.u32 %s447_s22, 4  ;;  %s34_s23 = int_to_ptr.vmem [resolvable:$true] %s33_s23 }
  0x10   :  { %s406_s24 = scalar_lea.vmem %s34_s23, 2048  ;;  %p411_p6 = scmp.lt.s32.totalorder %s34_s23, %s34_s23 }
  0x11   :  { %p407_p5 = scmp.ne.s32.totalorder %s34_s23, %s406_s24  ;;  %p412_p7 = scmp.lt.s32.totalorder %s406_s24, %s406_s24 }
  0x13   :  { %p413_p8 = por %p412_p7, %p411_p6 }
  0x15   :  { %p414_p9 = pnand %p413_p8, %p407_p5 }
  0x17   :  { %417 = shalt.err (!%p414_p9)
}
  0x18   :  { %39 = dma.hbm_to_vmem [thread:$0]  %s530_s3, 2048, %s34_s23, [#allocation6], %s445_s18, %s445_s18, %s446_s19  }
  0x19   :  { %438 = dma.done.wait [#allocation3], 2048  }
  0x1a   :  { %439 = vsyncadd [#allocation3], 4294965248 }
  0x1b   :  { %440 = dma.done.wait [#allocation6], 2048  }
  0x1c   :  { %441 = vsyncadd [#allocation6], 4294965248  ;;  %v448_v0 = vmov 0   ;;  %v449_v1 = vmov 0.0   ;;  %vm450_vm0 = vmmov 0   ;;  %v46_v2 = vld [vmem:[%s527_s0] sm:$0xff]  ;;  %v47_v35 = vlaneseq }
  0x1d   :  { %372 = vset.pattern.permute.xlu0 %v448_v0  ;;  %293 = vmatprep.subr.mxu0 %v449_v1  ;;  %v70_v3 = vld [vmem:[#allocation2 + $0x78] sm:$0xff]  ;;  %v69_v4 = vld [vmem:[#allocation2 + $0x70] sm:$0xff]  ;;  %v68_v5 = vld [vmem:[#allocation2 + $0x68] sm:$0xff]  ;;  %v451_v38 = vmov 1.0   ;;  %s452_s28 = smov [#allocation7]  }
  0x1e   :  { %328 = vmatprep.subr.mxu1 %v449_v1  ;;  %325 = vmatprep.mubr.msk.f32.mxu0 %vm450_vm0, %v449_v1  ;;  %v67_v6 = vld [vmem:[#allocation2 + $0x60] sm:$0xff]  ;;  %v156_v7 = vld [vmem:[#allocation5 + $0x78] sm:$0xff]  ;;  %v155_v9 = vld [vmem:[#allocation5 + $0x70] sm:$0xff]  ;;  %v48_v36 = vand.u32 127, %v47_v35  ;;  %s247_s29 = sshll.u32 %s452_s28, 4  ;;  %s248_s29 = int_to_ptr.vmem [resolvable:$true] %s247_s29 }
  0x1f   :  { %360 = vmatprep.mubr.msk.f32.mxu1 %vm450_vm0, %v449_v1  ;;  %50 = vperm.xlu0 %372, %v46_v2   ;;  %v66_v8 = vld [vmem:[#allocation2 + $0x58] sm:$0xff]  ;;  %v65_v10 = vld [vmem:[#allocation2 + $0x50] sm:$0xff]  ;;  %v64_v11 = vld [vmem:[#allocation2 + $0x48] sm:$0xff]  ;;  %p423_p11 = scmp.lt.s32.totalorder %s248_s29, %s248_s29 }
  0x20   :  { %294 = vmatpush3.msra.mxu0 %v70_v3  ;;  %329 = vmatpush3.xpose.msra.mxu1 %v156_v7  ;;  %v154_v12 = vld [vmem:[#allocation5 + $0x68] sm:$0xff]  ;;  %v63_v13 = vld [vmem:[#allocation2 + $0x40] sm:$0xff]  ;;  %v62_v14 = vld [vmem:[#allocation2 + $0x38] sm:$0xff] }
  0x21   :  { %295 = vmatprep.subr.mxu0 %v449_v1  ;;  %330 = vmatprep.subr.mxu1 %v449_v1  ;;  %v153_v15 = vld [vmem:[#allocation5 + $0x60] sm:$0xff]  ;;  %v61_v16 = vld [vmem:[#allocation2 + $0x30] sm:$0xff]  ;;  %v60_v17 = vld [vmem:[#allocation2 + $0x28] sm:$0xff] }
  0x22   :  { %296 = vmatpush3.msra.mxu0 %v69_v4  ;;  %v152_v18 = vld [vmem:[#allocation5 + $0x58] sm:$0xff]  ;;  %v59_v19 = vld [vmem:[#allocation2 + $0x20] sm:$0xff]  ;;  %v151_v21 = vld [vmem:[#allocation5 + $0x50] sm:$0xff] }
  0x23   :  { %297 = vmatprep.subr.mxu0 %v449_v1  ;;  %v58_v20 = vld [vmem:[#allocation2 + $0x18] sm:$0xff]  ;;  %v57_v22 = vld [vmem:[#allocation2 + $0x10] sm:$0xff]  ;;  %v56_v23 = vld [vmem:[#allocation2 + $0x8] sm:$0xff] }
  0x24   :  { %298 = vmatpush3.msra.mxu0 %v68_v5  ;;  %331 = vmatpush3.xpose.msra.mxu1 %v155_v9  ;;  %v150_v24 = vld [vmem:[#allocation5 + $0x48] sm:$0xff]  ;;  %v55_v25 = vld [vmem:[#allocation2] sm:$0xff]  ;;  %v148_v27 = vld [vmem:[#allocation5 + $0x38] sm:$0xff] }
  0x25   :  { %299 = vmatprep.subr.mxu0 %v449_v1  ;;  %332 = vmatprep.subr.mxu1 %v449_v1  ;;  %v149_v26 = vld [vmem:[#allocation5 + $0x40] sm:$0xff]  ;;  %v147_v28 = vld [vmem:[#allocation5 + $0x30] sm:$0xff]  ;;  %v146_v29 = vld [vmem:[#allocation5 + $0x28] sm:$0xff] }
  0x26   :  { %300 = vmatpush3.msra.mxu0 %v67_v6  ;;  %v145_v30 = vld [vmem:[#allocation5 + $0x20] sm:$0xff]  ;;  %v144_v31 = vld [vmem:[#allocation5 + $0x18] sm:$0xff]  ;;  %v143_v32 = vld [vmem:[#allocation5 + $0x10] sm:$0xff] }
  0x27   :  { %301 = vmatprep.subr.mxu0 %v449_v1  ;;  %v142_v33 = vld [vmem:[#allocation5 + $0x8] sm:$0xff]  ;;  %v141_v34 = vld [vmem:[#allocation5] sm:$0xff] }
  0x28   :  { %302 = vmatpush3.msra.mxu0 %v66_v8  ;;  %333 = vmatpush3.xpose.msra.mxu1 %v154_v12  ;;  %v227_v39 = vld [vmem:[%s528_s1] sm:$0xff]  ;;  %s418_s1 = scalar_lea.vmem %s248_s29, 128 }
  0x29   :  { %303 = vmatprep.subr.mxu0 %v449_v1  ;;  %334 = vmatprep.subr.mxu1 %v449_v1  ;;  %vm228_vm2 = vcmp.lt.s32.totalorder %v227_v39, 0  ;;  %v229_v40 = vadd.s32 128, %v227_v39  ;;  %p419_p10 = scmp.ne.s32.totalorder %s248_s29, %s418_s1  ;;  %p424_p12 = scmp.lt.s32.totalorder %s418_s1, %s418_s1 }
  0x2a   :  { %304 = vmatpush3.msra.mxu0 %v65_v10 }
  0x2b   :  { %305 = vmatprep.subr.mxu0 %v449_v1  ;;  %v230_v41 = vsel %vm228_vm2, %v229_v40, %v227_v39  ;;  %p425_p13 = por %p424_p12, %p423_p11 }
  0x2c   :  { %306 = vmatpush3.msra.mxu0 %v64_v11  ;;  %335 = vmatpush3.xpose.msra.mxu1 %v153_v15 }
  0x2d   :  { %307 = vmatprep.subr.mxu0 %v449_v1  ;;  %336 = vmatprep.subr.mxu1 %v449_v1  ;;  %p426_p0 = pnand %p425_p13, %p419_p10 }
  0x2e   :  { %308 = vmatpush3.msra.mxu0 %v63_v13  ;;  %373 = vset.pattern.permute.xlu0 %v230_v41 }
  0x2f   :  { %309 = vmatprep.subr.mxu0 %v449_v1 }
  0x30   :  { %310 = vmatpush3.msra.mxu0 %v62_v14  ;;  %337 = vmatpush3.xpose.msra.mxu1 %v152_v18 }
  0x31   :  { %311 = vmatprep.subr.mxu0 %v449_v1  ;;  %338 = vmatprep.subr.mxu1 %v449_v1 }
  0x32   :  { %312 = vmatpush3.msra.mxu0 %v61_v16 }
  0x33   :  { %313 = vmatprep.subr.mxu0 %v449_v1 }
  0x34   :  { %314 = vmatpush3.msra.mxu0 %v60_v17  ;;  %339 = vmatpush3.xpose.msra.mxu1 %v151_v21 }
  0x35   :  { %315 = vmatprep.subr.mxu0 %v449_v1  ;;  %340 = vmatprep.subr.mxu1 %v449_v1 }
  0x36   :  { %316 = vmatpush3.msra.mxu0 %v59_v19 }
  0x37   :  { %317 = vmatprep.subr.mxu0 %v449_v1 }
  0x38   :  { %318 = vmatpush3.msra.mxu0 %v58_v20  ;;  %341 = vmatpush3.xpose.msra.mxu1 %v150_v24 }
  0x39   :  { %319 = vmatprep.subr.mxu0 %v449_v1  ;;  %342 = vmatprep.subr.mxu1 %v449_v1 }
  0x3a   :  { %320 = vmatpush3.msra.mxu0 %v57_v22 }
  0x3b   :  { %321 = vmatprep.subr.mxu0 %v449_v1 }
  0x3c   :  { %322 = vmatpush3.msra.mxu0 %v56_v23  ;;  %343 = vmatpush3.xpose.msra.mxu1 %v149_v26 }
  0x3d   :  { %323 = vmatprep.subr.mxu0 %v449_v1  ;;  %344 = vmatprep.subr.mxu1 %v449_v1 }
  0x3e   :  { %324 = vmatpush3.msra.mxu0 %v55_v25 }
  0x40   :  { %345 = vmatpush3.xpose.msra.mxu1 %v148_v27 }
  0x41   :  { %346 = vmatprep.subr.mxu1 %v449_v1 }
  0x44   :  { %347 = vmatpush3.xpose.msra.mxu1 %v147_v28 }
  0x45   :  { %348 = vmatprep.subr.mxu1 %v449_v1 }
  0x48   :  { %349 = vmatpush3.xpose.msra.mxu1 %v146_v29 }
  0x49   :  { %350 = vmatprep.subr.mxu1 %v449_v1 }
  0x4c   :  { %351 = vmatpush3.xpose.msra.mxu1 %v145_v30 }
  0x4d   :  { %352 = vmatprep.subr.mxu1 %v449_v1 }
  0x50   :  { %353 = vmatpush3.xpose.msra.mxu1 %v144_v31 }
  0x51   :  { %354 = vmatprep.subr.mxu1 %v449_v1 }
  0x54   :  { %355 = vmatpush3.xpose.msra.mxu1 %v143_v32 }
  0x55   :  { %356 = vmatprep.subr.mxu1 %v449_v1 }
  0x58   :  { %357 = vmatpush3.xpose.msra.mxu1 %v142_v33 }
  0x59   :  { %358 = vmatprep.subr.mxu1 %v449_v1 }
  0x5c   :  { %359 = vmatpush3.xpose.msra.mxu1 %v141_v34 }
  0x9a   :  { %v51_v37 = vpop.permute.xlu0 %50 }
  0x9b   :  { %vm52_vm1 = vcmp.eq.s32.totalorder %v51_v37, %v48_v36 }
  0x9c   :  { %326 = vmatmul.mubr.msk.f32.vlgmr.msra.gmra.mxu0 %vm52_vm1, %v451_v38 }
 0x15c   :  { %v137_v42 = vpop.f32.mrf.mxu0 }
 0x15d   :  { %361 = vmatmul.mubr.f32.vlgmr.msra.gmra.mxu1 %v137_v42 }
 0x15e   :  { %v327_v43 = vpop.f32.mrf.mxu0 }
 0x21d   :  { %v223_v44 = vpop.f32.mrf.mxu1 }
 0x21e   :  { %232 = vperm.xlu0 %373, %v223_v44  }
 0x21f   :  { %v362_v45 = vpop.f32.mrf.mxu1 }
 0x299   :  { %v233_v46 = vpop.permute.xlu0 %232 }
 0x29a   :  { %v234_v47 = vsub.f32 0.0, %v233_v46 }
 0x29c   :  { %v235_v48 = vmul.f32 1.442695, %v234_v47 }
 0x29e   :  { %374 = vpow2.f32 %v235_v48 }
 0x2ab   :  { %v375_v49 = vpop.eup %374 }
 0x2ac   :  { %v237_v50 = vadd.f32 1.0, %v375_v49 }
 0x2ae   :  { %376 = vrcp.f32 %v237_v50 }
 0x2bb   :  { %v377_v51 = vpop.eup %376 }
 0x2bc   :  { %240 = vst [vmem:[#allocation7] sm:$0xff] %v377_v51 }
 0x2bd   :  { %429 = shalt.err (!%p426_p0)
}
 0x2be   :  { %250 = dma.vmem_to_hbm [thread:$0]  %s248_s29, 128, %s531_s4, [#allocation4]  }
 0x2bf   :  { %442 = dma.done.wait [#allocation4], 128  }
 0x2c0   :  { %443 = vsyncadd [#allocation4], 4294967168 }
 0x2c1   :  { %254 = vsyncpa [#allocation3], 1 }
 0x2c2   :  { %255 = vsyncpa [#allocation6], 1 }
 0x2c3   :  { %256 = vsyncpa [#allocation4], 1 }

// kernel: tpu_custom_call.1
= control target key start
LH: loop header
LB: loop body
LE: loop exit
PB: predicated region body
PF: predicated region fallthrough
CT: control target
= control target key end

     0   :  { %9 = vsyncpa [#allocation3], 0  ;;  %s5142_s0 = inlined_call_operand.vmem [shape: s32[8,1], index: 0, kind: input, shape index: {}]   ;;  %s5143_s1 = inlined_call_operand.vmem [shape: s32[8,128], index: 1, kind: input, shape index: {}]   ;;  %s5144_s2 = inlined_call_operand.hbm [shape: f32[128,128], index: 2, kind: input, shape index: {}]   ;;  %s5145_s3 = inlined_call_operand.hbm [shape: f32[128,128], index: 3, kind: input, shape index: {}]   ;;  %s5146_s4 = inlined_call_operand.hbm [shape: f32[8,128], index: 4, kind: output, shape index: {}]  }
   0x1   :  { %10 = vsyncpa [#allocation6], 0 }
   0x2   :  { %11 = vsyncpa [#allocation4], 0  ;;  %s3651_s15 = smov [#allocation2]  }
   0x3   :  { %s21_s16 = sshll.u32 %s3651_s15, 4  ;;  %s22_s16 = int_to_ptr.vmem [resolvable:$true] %s21_s16 }
   0x4   :  { %s3593_s17 = scalar_lea.vmem %s22_s16, 2048  ;;  %p3598_p1 = scmp.lt.s32.totalorder %s22_s16, %s22_s16 }
   0x5   :  { %p3594_p0 = scmp.ne.s32.totalorder %s22_s16, %s3593_s17  ;;  %p3599_p2 = scmp.lt.s32.totalorder %s3593_s17, %s3593_s17 }
   0x7   :  { %p3600_p3 = por %p3599_p2, %p3598_p1 }
   0x9   :  { %p3601_p4 = pnand %p3600_p3, %p3594_p0 }
   0xb   :  { %3604 = shalt.err (!%p3601_p4)
}
   0xc   :  { %s3652_s18 = smov 128   ;;  %s3653_s19 = smov 8  }
   0xd   :  { %27 = dma.hbm_to_vmem [thread:$0]  %s5144_s2, 2048, %s22_s16, [#allocation3], %s3652_s18, %s3652_s18, %s3653_s19  }
   0xe   :  { %s3654_s22 = smov [#allocation5]  }
   0xf   :  { %s33_s23 = sshll.u32 %s3654_s22, 4  ;;  %s34_s23 = int_to_ptr.vmem [resolvable:$true] %s33_s23 }
  0x10   :  { %s3613_s24 = scalar_lea.vmem %s34_s23, 2048  ;;  %p3618_p6 = scmp.lt.s32.totalorder %s34_s23, %s34_s23 }
  0x11   :  { %p3614_p5 = scmp.ne.s32.totalorder %s34_s23, %s3613_s24  ;;  %p3619_p7 = scmp.lt.s32.totalorder %s3613_s24, %s3613_s24 }
  0x13   :  { %p3620_p8 = por %p3619_p7, %p3618_p6 }
  0x15   :  { %p3621_p9 = pnand %p3620_p8, %p3614_p5 }
  0x17   :  { %3624 = shalt.err (!%p3621_p9)
}
  0x18   :  { %39 = dma.hbm_to_vmem [thread:$0]  %s5145_s3, 2048, %s34_s23, [#allocation6], %s3652_s18, %s3652_s18, %s3653_s19  }
  0x19   :  { %3645 = dma.done.wait [#allocation3], 2048  }
  0x1a   :  { %3646 = vsyncadd [#allocation3], 4294965248 }
  0x1b   :  { %3647 = dma.done.wait [#allocation6], 2048  }
  0x1c   :  { %3648 = vsyncadd [#allocation6], 4294965248  ;;  %v3655_v0 = vmov 0   ;;  %v3656_v1 = vmov 0.0   ;;  %v47_v2 = vlaneseq  ;;  %vm3657_vm0 = vmmov 0   ;;  %v46_v4 = vld [vmem:[%s5142_s0] sm:$0xff] }
  0x1d   :  { %3072 = vset.pattern.permute.xlu0 %v3655_v0  ;;  %2992 = vmatprep.subr.mxu0 %v3656_v1  ;;  %v70_v5 = vld [vmem:[#allocation2 + $0x78] sm:$0xff]  ;;  %v69_v6 = vld [vmem:[#allocation2 + $0x70] sm:$0xff]  ;;  %v68_v7 = vld [vmem:[#allocation2 + $0x68] sm:$0xff]  ;;  %v3658_v48 = vmov 1.0   ;;  %s3660_s0 = smov [#allocation7]  }
  0x1e   :  { %3027 = vmatprep.subr.mxu1 %v3656_v1  ;;  %3024 = vmatprep.mubr.msk.f32.mxu0 %vm3657_vm0, %v3656_v1  ;;  %v3697_v3 = vshrl.u32 %v47_v2, 7  ;;  %v67_v9 = vld [vmem:[#allocation2 + $0x60] sm:$0xff]  ;;  %v66_v11 = vld [vmem:[#allocation2 + $0x58] sm:$0xff]  ;;  %v65_v14 = vld [vmem:[#allocation2 + $0x50] sm:$0xff]  ;;  %v3767_v46 = vand.u32 127, %v47_v2 }
  0x1f   :  { %3059 = vmatprep.mubr.msk.f32.mxu1 %vm3657_vm0, %v3656_v1  ;;  %50 = vperm.xlu0 %3072, %v46_v4   ;;  %v3710_v10 = vld [vmem:[%s5143_s1] sm:$0xff]  ;;  %v156_v13 = vld [vmem:[#allocation5 + $0x78] sm:$0xff]  ;;  %v155_v15 = vld [vmem:[#allocation5 + $0x70] sm:$0xff]  ;;  %s2946_s1 = sshll.u32 %s3660_s0, 4  ;;  %s2947_s1 = int_to_ptr.vmem [resolvable:$true] %s2946_s1 }
  0x20   :  { %5181 = vst [vmem:[#allocation11_spill] sm:$0xff] %v3697_v3  ;;  %2993 = vmatpush3.msra.mxu0 %v70_v5  ;;  %v3704_v8 = vsub.s32 0, %v3697_v3  ;;  %3028 = vmatpush3.xpose.msra.mxu1 %v156_v13  ;;  %v64_v16 = vld [vmem:[#allocation2 + $0x48] sm:$0xff]  ;;  %v63_v17 = vld [vmem:[#allocation2 + $0x40] sm:$0xff]  ;;  %v62_v19 = vld [vmem:[#allocation2 + $0x38] sm:$0xff]  ;;  %v297_v31 = vsub.s32 1, %v3697_v3  ;;  %p3630_p11 = scmp.lt.s32.totalorder %s2947_s1, %s2947_s1 }
  0x21   :  { %2994 = vmatprep.subr.mxu0 %v3656_v1  ;;  %3029 = vmatprep.subr.mxu1 %v3656_v1  ;;  %v154_v18 = vld [vmem:[#allocation5 + $0x68] sm:$0xff]  ;;  %v61_v20 = vld [vmem:[#allocation2 + $0x30] sm:$0xff]  ;;  %v153_v21 = vld [vmem:[#allocation5 + $0x60] sm:$0xff]  ;;  %v364_v41 = vsub.s32 2, %v3697_v3  ;;  %v431_v44 = vsub.s32 3, %v3697_v3  ;;  %v498_v49 = vsub.s32 4, %v3697_v3 }
  0x22   :  { %2995 = vmatpush3.msra.mxu0 %v69_v6  ;;  %v3715_v12 = vrot.slane %v3710_v10, %v3704_v8  ;;  %v60_v22 = vld [vmem:[#allocation2 + $0x28] sm:$0xff]  ;;  %v59_v23 = vld [vmem:[#allocation2 + $0x20] sm:$0xff]  ;;  %v152_v24 = vld [vmem:[#allocation5 + $0x58] sm:$0xff]  ;;  %v298_v33 = vrot.slane %v3710_v10, %v297_v31  ;;  %v565_v51 = vsub.s32 5, %v3697_v3  ;;  %v632_v59 = vsub.s32 6, %v3697_v3  ;;  %s3625_s29 = scalar_lea.vmem %s2947_s1, 128 }
  0x23   :  { %2996 = vmatprep.subr.mxu0 %v3656_v1  ;;  %v58_v25 = vld [vmem:[#allocation2 + $0x18] sm:$0xff]  ;;  %v57_v26 = vld [vmem:[#allocation2 + $0x10] sm:$0xff]  ;;  %v56_v28 = vld [vmem:[#allocation2 + $0x8] sm:$0xff]  ;;  %v365_v43 = vrot.slane %v3710_v10, %v364_v41  ;;  %v432_v45 = vrot.slane %v3710_v10, %v431_v44  ;;  %v499_v50 = vrot.slane %v3710_v10, %v498_v49  ;;  %p3626_p10 = scmp.ne.s32.totalorder %s2947_s1, %s3625_s29  ;;  %p3631_p12 = scmp.lt.s32.totalorder %s3625_s29, %s3625_s29 }
  0x24   :  { %2997 = vmatpush3.msra.mxu0 %v68_v7  ;;  %237 = vbcast.lane.b32.xlu1 %v3715_v12, 264  ;;  %v151_v27 = vld [vmem:[#allocation5 + $0x50] sm:$0xff]  ;;  %v55_v29 = vld [vmem:[#allocation2] sm:$0xff]  ;;  %v150_v30 = vld [vmem:[#allocation5 + $0x48] sm:$0xff]  ;;  %v566_v52 = vrot.slane %v3710_v10, %v565_v51  ;;  %v633_v62 = vrot.slane %v3710_v10, %v632_v59 }
  0x25   :  { %2998 = vmatprep.subr.mxu0 %v3656_v1  ;;  %233 = vbcast.lane.b32.xlu0 %v3715_v12, 256  ;;  %v149_v32 = vld [vmem:[#allocation5 + $0x40] sm:$0xff]  ;;  %v148_v34 = vld [vmem:[#allocation5 + $0x38] sm:$0xff]  ;;  %v147_v35 = vld [vmem:[#allocation5 + $0x30] sm:$0xff]  ;;  %p3632_p13 = por %p3631_p12, %p3630_p11 }
  0x26   :  { %2999 = vmatpush3.msra.mxu0 %v67_v9  ;;  %3030 = vmatpush3.xpose.msra.mxu1 %v155_v15  ;;  %v146_v36 = vld [vmem:[#allocation5 + $0x28] sm:$0xff]  ;;  %v145_v37 = vld [vmem:[#allocation5 + $0x20] sm:$0xff]  ;;  %v144_v38 = vld [vmem:[#allocation5 + $0x18] sm:$0xff] }
  0x27   :  { %3000 = vmatprep.subr.mxu0 %v3656_v1  ;;  %3031 = vmatprep.subr.mxu1 %v3656_v1  ;;  %v143_v39 = vld [vmem:[#allocation5 + $0x10] sm:$0xff]  ;;  %v142_v40 = vld [vmem:[#allocation5 + $0x8] sm:$0xff]  ;;  %v141_v42 = vld [vmem:[#allocation5] sm:$0xff]  ;;  %p3633_p0 = pnand %p3632_p13, %p3626_p10 }
  0x28   :  { %3001 = vmatpush3.msra.mxu0 %v66_v11  ;;  %241 = vbcast.lane.b32.xlu1 %v3715_v12, 272  ;;  %v699_v11 = vsub.s32 7, %v3697_v3 }
  0x29   :  { %3002 = vmatprep.subr.mxu0 %v3656_v1  ;;  %245 = vbcast.lane.b32.xlu0 %v3715_v12, 280 }
  0x2a   :  { %3003 = vmatpush3.msra.mxu0 %v65_v14  ;;  %3032 = vmatpush3.xpose.msra.mxu1 %v154_v18  ;;  %v700_v13 = vrot.slane %v3710_v10, %v699_v11 }
  0x2b   :  { %3004 = vmatprep.subr.mxu0 %v3656_v1  ;;  %3033 = vmatprep.subr.mxu1 %v3656_v1 }
  0x2c   :  { %3005 = vmatpush3.msra.mxu0 %v64_v16  ;;  %249 = vbcast.lane.b32.xlu1 %v3715_v12, 288 }
  0x2d   :  { %3006 = vmatprep.subr.mxu0 %v3656_v1  ;;  %253 = vbcast.lane.b32.xlu0 %v3715_v12, 296 }
  0x2e   :  { %3007 = vmatpush3.msra.mxu0 %v63_v17  ;;  %3034 = vmatpush3.xpose.msra.mxu1 %v153_v21 }
  0x2f   :  { %3008 = vmatprep.subr.mxu0 %v3656_v1  ;;  %3035 = vmatprep.subr.mxu1 %v3656_v1 }
  0x30   :  { %3009 = vmatpush3.msra.mxu0 %v62_v19  ;;  %257 = vbcast.lane.b32.xlu1 %v3715_v12, 304 }
  0x31   :  { %3010 = vmatprep.subr.mxu0 %v3656_v1  ;;  %261 = vbcast.lane.b32.xlu0 %v3715_v12, 312 }
  0x32   :  { %3011 = vmatpush3.msra.mxu0 %v61_v20  ;;  %3036 = vmatpush3.xpose.msra.mxu1 %v152_v24 }
  0x33   :  { %3012 = vmatprep.subr.mxu0 %v3656_v1  ;;  %3037 = vmatprep.subr.mxu1 %v3656_v1 }
  0x34   :  { %3013 = vmatpush3.msra.mxu0 %v60_v22  ;;  %265 = vbcast.lane.b32.xlu1 %v3715_v12, 320 }
  0x35   :  { %3014 = vmatprep.subr.mxu0 %v3656_v1  ;;  %269 = vbcast.lane.b32.xlu0 %v3715_v12, 328 }
  0x36   :  { %3015 = vmatpush3.msra.mxu0 %v59_v23  ;;  %3038 = vmatpush3.xpose.msra.mxu1 %v151_v27 }
  0x37   :  { %3016 = vmatprep.subr.mxu0 %v3656_v1  ;;  %3039 = vmatprep.subr.mxu1 %v3656_v1 }
  0x38   :  { %3017 = vmatpush3.msra.mxu0 %v58_v25  ;;  %273 = vbcast.lane.b32.xlu1 %v3715_v12, 336 }
  0x39   :  { %3018 = vmatprep.subr.mxu0 %v3656_v1  ;;  %277 = vbcast.lane.b32.xlu0 %v3715_v12, 344 }
  0x3a   :  { %3019 = vmatpush3.msra.mxu0 %v57_v26  ;;  %3040 = vmatpush3.xpose.msra.mxu1 %v150_v30 }
  0x3b   :  { %3020 = vmatprep.subr.mxu0 %v3656_v1  ;;  %3041 = vmatprep.subr.mxu1 %v3656_v1 }
  0x3c   :  { %3021 = vmatpush3.msra.mxu0 %v56_v28  ;;  %281 = vbcast.lane.b32.xlu1 %v3715_v12, 352 }
  0x3d   :  { %3022 = vmatprep.subr.mxu0 %v3656_v1  ;;  %285 = vbcast.lane.b32.xlu0 %v3715_v12, 360 }
  0x3e   :  { %3023 = vmatpush3.msra.mxu0 %v55_v29  ;;  %3042 = vmatpush3.xpose.msra.mxu1 %v149_v32 }
  0x3f   :  { %3043 = vmatprep.subr.mxu1 %v3656_v1 }
  0x40   :  { %289 = vbcast.lane.b32.xlu1 %v3715_v12, 368 }
  0x41   :  { %293 = vbcast.lane.b32.xlu0 %v3715_v12, 376 }
  0x42   :  { %3044 = vmatpush3.xpose.msra.mxu1 %v148_v34 }
  0x43   :  { %3045 = vmatprep.subr.mxu1 %v3656_v1 }
  0x44   :  { %300 = vbcast.lane.b32.xlu1 %v298_v33, 256 }
  0x45   :  { %304 = vbcast.lane.b32.xlu0 %v298_v33, 264 }
  0x46   :  { %3046 = vmatpush3.xpose.msra.mxu1 %v147_v35 }
  0x47   :  { %3047 = vmatprep.subr.mxu1 %v3656_v1 }
  0x48   :  { %308 = vbcast.lane.b32.xlu1 %v298_v33, 272 }
  0x49   :  { %312 = vbcast.lane.b32.xlu0 %v298_v33, 280 }
  0x4a   :  { %3048 = vmatpush3.xpose.msra.mxu1 %v146_v36 }
  0x4b   :  { %3049 = vmatprep.subr.mxu1 %v3656_v1 }
  0x4c   :  { %316 = vbcast.lane.b32.xlu1 %v298_v33, 288 }
  0x4d   :  { %320 = vbcast.lane.b32.xlu0 %v298_v33, 296 }
  0x4e   :  { %3050 = vmatpush3.xpose.msra.mxu1 %v145_v37 }
  0x4f   :  { %3051 = vmatprep.subr.mxu1 %v3656_v1 }
  0x50   :  { %324 = vbcast.lane.b32.xlu1 %v298_v33, 304 }
  0x51   :  { %328 = vbcast.lane.b32.xlu0 %v298_v33, 312 }
  0x52   :  { %3052 = vmatpush3.xpose.msra.mxu1 %v144_v38 }
  0x53   :  { %3053 = vmatprep.subr.mxu1 %v3656_v1 }
  0x54   :  { %332 = vbcast.lane.b32.xlu1 %v298_v33, 320 }
  0x55   :  { %336 = vbcast.lane.b32.xlu0 %v298_v33, 328 }
  0x56   :  { %3054 = vmatpush3.xpose.msra.mxu1 %v143_v39 }
  0x57   :  { %3055 = vmatprep.subr.mxu1 %v3656_v1 }
  0x58   :  { %340 = vbcast.lane.b32.xlu1 %v298_v33, 336 }
  0x59   :  { %344 = vbcast.lane.b32.xlu0 %v298_v33, 344 }
  0x5a   :  { %3056 = vmatpush3.xpose.msra.mxu1 %v142_v40 }
  0x5b   :  { %3057 = vmatprep.subr.mxu1 %v3656_v1 }
  0x5c   :  { %348 = vbcast.lane.b32.xlu1 %v298_v33, 352 }
  0x5d   :  { %352 = vbcast.lane.b32.xlu0 %v298_v33, 360 }
  0x5e   :  { %3058 = vmatpush3.xpose.msra.mxu1 %v141_v42 }
  0x60   :  { %356 = vbcast.lane.b32.xlu1 %v298_v33, 368 }
  0x61   :  { %360 = vbcast.lane.b32.xlu0 %v298_v33, 376 }
  0x64   :  { %367 = vbcast.lane.b32.xlu1 %v365_v43, 256 }
  0x65   :  { %371 = vbcast.lane.b32.xlu0 %v365_v43, 264 }
  0x68   :  { %375 = vbcast.lane.b32.xlu1 %v365_v43, 272 }
  0x69   :  { %379 = vbcast.lane.b32.xlu0 %v365_v43, 280 }
  0x6c   :  { %383 = vbcast.lane.b32.xlu1 %v365_v43, 288 }
  0x6d   :  { %387 = vbcast.lane.b32.xlu0 %v365_v43, 296 }
  0x70   :  { %391 = vbcast.lane.b32.xlu1 %v365_v43, 304 }
  0x71   :  { %395 = vbcast.lane.b32.xlu0 %v365_v43, 312 }
  0x74   :  { %399 = vbcast.lane.b32.xlu1 %v365_v43, 320 }
  0x75   :  { %403 = vbcast.lane.b32.xlu0 %v365_v43, 328 }
  0x78   :  { %407 = vbcast.lane.b32.xlu1 %v365_v43, 336 }
  0x79   :  { %411 = vbcast.lane.b32.xlu0 %v365_v43, 344 }
  0x7c   :  { %415 = vbcast.lane.b32.xlu1 %v365_v43, 352 }
  0x7d   :  { %419 = vbcast.lane.b32.xlu0 %v365_v43, 360 }
  0x80   :  { %423 = vbcast.lane.b32.xlu1 %v365_v43, 368 }
  0x81   :  { %427 = vbcast.lane.b32.xlu0 %v365_v43, 376 }
  0x84   :  { %434 = vbcast.lane.b32.xlu1 %v432_v45, 256 }
  0x85   :  { %438 = vbcast.lane.b32.xlu0 %v432_v45, 264 }
  0x88   :  { %442 = vbcast.lane.b32.xlu1 %v432_v45, 272 }
  0x89   :  { %446 = vbcast.lane.b32.xlu0 %v432_v45, 280 }
  0x8c   :  { %450 = vbcast.lane.b32.xlu1 %v432_v45, 288 }
  0x8d   :  { %454 = vbcast.lane.b32.xlu0 %v432_v45, 296 }
  0x90   :  { %458 = vbcast.lane.b32.xlu1 %v432_v45, 304 }
  0x91   :  { %462 = vbcast.lane.b32.xlu0 %v432_v45, 312 }
  0x94   :  { %466 = vbcast.lane.b32.xlu1 %v432_v45, 320 }
  0x95   :  { %470 = vbcast.lane.b32.xlu0 %v432_v45, 328 }
  0x96   :  { %v3774_v53 = vpop.permute.xlu1 %237 }
  0x97   :  { %vm765_vm2 = vcmp.eq.s32.totalorder %v3774_v53, %v3767_v46 }
  0x98   :  { %474 = vbcast.lane.b32.xlu1 %v432_v45, 336 }
  0x99   :  { %478 = vbcast.lane.b32.xlu0 %v432_v45, 344 }
  0x9a   :  { %v51_v47 = vpop.permute.xlu0 %50  ;;  %v3778_v55 = vpop.permute.xlu1 %241 }
  0x9b   :  { %vm52_vm1 = vcmp.eq.s32.totalorder %v51_v47, %v3767_v46  ;;  %vm766_vm5 = vcmp.eq.s32.totalorder %v3778_v55, %v3767_v46 }
  0x9c   :  { %3025 = vmatmul.mubr.msk.f32.vlgmr.msra.gmra.mxu0 %vm52_vm1, %v3658_v48  ;;  %482 = vbcast.lane.b32.xlu1 %v432_v45, 352 }
  0x9d   :  { %486 = vbcast.lane.b32.xlu0 %v432_v45, 360 }
  0x9e   :  { %v3776_v54 = vpop.permute.xlu0 %233  ;;  %v3782_v57 = vpop.permute.xlu1 %249 }
  0x9f   :  { %vm764_vm3 = vcmp.eq.s32.totalorder %v3776_v54, %v3767_v46  ;;  %vm768_vm7 = vcmp.eq.s32.totalorder %v3782_v57, %v3767_v46 }
  0xa0   :  { %490 = vbcast.lane.b32.xlu1 %v432_v45, 368 }
  0xa1   :  { %494 = vbcast.lane.b32.xlu0 %v432_v45, 376 }
  0xa2   :  { %v3780_v56 = vpop.permute.xlu0 %245  ;;  %v3787_v60 = vpop.permute.xlu1 %257 }
  0xa3   :  { %vm767_vm4 = vcmp.eq.s32.totalorder %v3780_v56, %v3767_v46  ;;  %vm770_vm9 = vcmp.eq.s32.totalorder %v3787_v60, %v3767_v46 }
  0xa4   :  { %501 = vbcast.lane.b32.xlu1 %v499_v50, 256 }
  0xa5   :  { %505 = vbcast.lane.b32.xlu0 %v499_v50, 264 }
  0xa6   :  { %v3784_v58 = vpop.permute.xlu0 %253  ;;  %v3792_v63 = vpop.permute.xlu1 %265 }
  0xa7   :  { %vm769_vm6 = vcmp.eq.s32.totalorder %v3784_v58, %v3767_v46  ;;  %vm772_vm11 = vcmp.eq.s32.totalorder %v3792_v63, %v3767_v46 }
  0xa8   :  { %509 = vbcast.lane.b32.xlu1 %v499_v50, 272 }
  0xa9   :  { %513 = vbcast.lane.b32.xlu0 %v499_v50, 280 }
  0xaa   :  { %v3789_v61 = vpop.permute.xlu0 %261  ;;  %v3796_v1 = vpop.permute.xlu1 %273 }
  0xab   :  { %vm771_vm8 = vcmp.eq.s32.totalorder %v3789_v61, %v3767_v46  ;;  %vm774_vm14 = vcmp.eq.s32.totalorder %v3796_v1, %v3767_v46 }
  0xac   :  { %517 = vbcast.lane.b32.xlu1 %v499_v50, 288 }
  0xad   :  { %521 = vbcast.lane.b32.xlu0 %v499_v50, 296 }
  0xae   :  { %v3794_v0 = vpop.permute.xlu0 %269  ;;  %v3800_v4 = vpop.permute.xlu1 %281 }
  0xaf   :  { %vm773_vm10 = vcmp.eq.s32.totalorder %v3794_v0, %v3767_v46  ;;  %vm776_vm1 = vcmp.eq.s32.totalorder %v3800_v4, %v3767_v46 }
  0xb0   :  { %525 = vbcast.lane.b32.xlu1 %v499_v50, 304 }
  0xb1   :  { %529 = vbcast.lane.b32.xlu0 %v499_v50, 312 }
  0xb2   :  { %v3798_v2 = vpop.permute.xlu0 %277  ;;  %v3804_v6 = vpop.permute.xlu1 %289 }
  0xb3   :  { %vm775_vm15 = vcmp.eq.s32.totalorder %v3798_v2, %v3767_v46 }
  0xb4   :  { %533 = vbcast.lane.b32.xlu1 %v499_v50, 320 }
  0xb5   :  { %537 = vbcast.lane.b32.xlu0 %v499_v50, 328 }
  0xb6   :  { %v3802_v5 = vpop.permute.xlu0 %285  ;;  %v3808_v9 = vpop.permute.xlu1 %300 }
  0xb7   :  { %vm777_vm0 = vcmp.eq.s32.totalorder %v3802_v5, %v3767_v46 }
  0xb8   :  { %541 = vbcast.lane.b32.xlu1 %v499_v50, 336 }
  0xb9   :  { %545 = vbcast.lane.b32.xlu0 %v499_v50, 344 }
  0xba   :  { %v3806_v7 = vpop.permute.xlu0 %293  ;;  %v3814_v14 = vpop.permute.xlu1 %308 }
  0xbc   :  { %549 = vbcast.lane.b32.xlu1 %v499_v50, 352 }
  0xbd   :  { %553 = vbcast.lane.b32.xlu0 %v499_v50, 360 }
  0xbe   :  { %v3811_v12 = vpop.permute.xlu0 %304  ;;  %v3818_v16 = vpop.permute.xlu1 %316 }
  0xc0   :  { %557 = vbcast.lane.b32.xlu1 %v499_v50, 368 }
  0xc1   :  { %561 = vbcast.lane.b32.xlu0 %v499_v50, 376 }
  0xc2   :  { %v3816_v15 = vpop.permute.xlu0 %312  ;;  %v3822_v18 = vpop.permute.xlu1 %324 }
  0xc4   :  { %568 = vbcast.lane.b32.xlu1 %v566_v52, 256 }
  0xc5   :  { %572 = vbcast.lane.b32.xlu0 %v566_v52, 264 }
  0xc6   :  { %v3820_v17 = vpop.permute.xlu0 %320  ;;  %v3826_v10 = vpop.permute.xlu1 %332 }
  0xc8   :  { %576 = vbcast.lane.b32.xlu1 %v566_v52, 272 }
  0xc9   :  { %580 = vbcast.lane.b32.xlu0 %v566_v52, 280 }
  0xca   :  { %v3824_v19 = vpop.permute.xlu0 %328  ;;  %v3830_v21 = vpop.permute.xlu1 %340 }
  0xcc   :  { %584 = vbcast.lane.b32.xlu1 %v566_v52, 288 }
  0xcd   :  { %588 = vbcast.lane.b32.xlu0 %v566_v52, 296 }
  0xce   :  { %v3828_v20 = vpop.permute.xlu0 %336  ;;  %v3834_v23 = vpop.permute.xlu1 %348 }
  0xd0   :  { %592 = vbcast.lane.b32.xlu1 %v566_v52, 304 }
  0xd1   :  { %596 = vbcast.lane.b32.xlu0 %v566_v52, 312 }
  0xd2   :  { %v3832_v22 = vpop.permute.xlu0 %344  ;;  %v3838_v27 = vpop.permute.xlu1 %356 }
  0xd4   :  { %600 = vbcast.lane.b32.xlu1 %v566_v52, 320 }
  0xd5   :  { %604 = vbcast.lane.b32.xlu0 %v566_v52, 328 }
  0xd6   :  { %v3836_v24 = vpop.permute.xlu0 %352  ;;  %v3840_v28 = vpop.permute.xlu1 %367 }
  0xd8   :  { %608 = vbcast.lane.b32.xlu1 %v566_v52, 336 }
  0xd9   :  { %612 = vbcast.lane.b32.xlu0 %v566_v52, 344 }
  0xda   :  { %v3842_v29 = vpop.permute.xlu1 %375  ;;  %v3850_v33 = vpop.permute.xlu0 %360 }
  0xdc   :  { %616 = vbcast.lane.b32.xlu1 %v566_v52, 352 }
  0xdd   :  { %620 = vbcast.lane.b32.xlu0 %v566_v52, 360 }
  0xde   :  { %v3844_v30 = vpop.permute.xlu1 %383  ;;  %v3854_v35 = vpop.permute.xlu0 %371 }
  0xe0   :  { %624 = vbcast.lane.b32.xlu1 %v566_v52, 368 }
  0xe1   :  { %628 = vbcast.lane.b32.xlu0 %v566_v52, 376 }
  0xe2   :  { %v3846_v31 = vpop.permute.xlu1 %391  ;;  %v3858_v37 = vpop.permute.xlu0 %379 }
  0xe4   :  { %635 = vbcast.lane.b32.xlu1 %v633_v62, 256 }
  0xe5   :  { %639 = vbcast.lane.b32.xlu0 %v633_v62, 264 }
  0xe6   :  { %v3848_v32 = vpop.permute.xlu1 %399  ;;  %v3862_v39 = vpop.permute.xlu0 %387 }
  0xe8   :  { %643 = vbcast.lane.b32.xlu1 %v633_v62, 272 }
  0xe9   :  { %647 = vbcast.lane.b32.xlu0 %v633_v62, 280 }
  0xea   :  { %v3852_v34 = vpop.permute.xlu1 %407  ;;  %v3866_v41 = vpop.permute.xlu0 %395 }
  0xec   :  { %651 = vbcast.lane.b32.xlu1 %v633_v62, 288 }
  0xed   :  { %655 = vbcast.lane.b32.xlu0 %v633_v62, 296 }
  0xee   :  { %v3856_v36 = vpop.permute.xlu1 %415  ;;  %v3870_v43 = vpop.permute.xlu0 %403 }
  0xf0   :  { %659 = vbcast.lane.b32.xlu1 %v633_v62, 304 }
  0xf1   :  { %663 = vbcast.lane.b32.xlu0 %v633_v62, 312 }
  0xf2   :  { %v3860_v38 = vpop.permute.xlu1 %423  ;;  %v3874_v45 = vpop.permute.xlu0 %411 }
  0xf4   :  { %667 = vbcast.lane.b32.xlu1 %v633_v62, 320 }
  0xf5   :  { %671 = vbcast.lane.b32.xlu0 %v633_v62, 328 }
  0xf6   :  { %v3864_v40 = vpop.permute.xlu1 %434  ;;  %v3878_v48 = vpop.permute.xlu0 %419 }
  0xf7   :  { %5182 = vst [vmem:[#allocation12_spill] sm:$0xff] %v3864_v40 }
  0xf8   :  { %675 = vbcast.lane.b32.xlu1 %v633_v62, 336 }
  0xf9   :  { %679 = vbcast.lane.b32.xlu0 %v633_v62, 344 }
  0xfa   :  { %v3868_v42 = vpop.permute.xlu1 %442  ;;  %v3882_v50 = vpop.permute.xlu0 %427 }
  0xfb   :  { %5183 = vst [vmem:[#allocation13_spill] sm:$0xff] %v3868_v42 }
  0xfc   :  { %683 = vbcast.lane.b32.xlu1 %v633_v62, 352 }
  0xfd   :  { %687 = vbcast.lane.b32.xlu0 %v633_v62, 360 }
  0xfe   :  { %v3872_v44 = vpop.permute.xlu1 %450  ;;  %v3886_v52 = vpop.permute.xlu0 %438 }
  0xff   :  { %5184 = vst [vmem:[#allocation14_spill] sm:$0xff] %v3872_v44  ;;  %5188 = vst [vmem:[#allocation18_spill] sm:$0xff] %v3886_v52 }
 0x100   :  { %691 = vbcast.lane.b32.xlu1 %v633_v62, 368 }
 0x101   :  { %695 = vbcast.lane.b32.xlu0 %v633_v62, 376 }
 0x102   :  { %v3876_v47 = vpop.permute.xlu1 %458  ;;  %v3890_v62 = vpop.permute.xlu0 %446 }
 0x103   :  { %5185 = vst [vmem:[#allocation15_spill] sm:$0xff] %v3876_v47  ;;  %5190 = vst [vmem:[#allocation20_spill] sm:$0xff] %v3890_v62 }
 0x104   :  { %702 = vbcast.lane.b32.xlu1 %v700_v13, 256 }
 0x105   :  { %706 = vbcast.lane.b32.xlu0 %v700_v13, 264 }
 0x106   :  { %v3880_v49 = vpop.permute.xlu1 %466 }
 0x107   :  { %5186 = vst [vmem:[#allocation16_spill] sm:$0xff] %v3880_v49 }
 0x108   :  { %710 = vbcast.lane.b32.xlu1 %v700_v13, 272 }
 0x109   :  { %714 = vbcast.lane.b32.xlu0 %v700_v13, 280 }
 0x10a   :  { %v3884_v51 = vpop.permute.xlu1 %474 }
 0x10b   :  { %5187 = vst [vmem:[#allocation17_spill] sm:$0xff] %v3884_v51 }
 0x10c   :  { %718 = vbcast.lane.b32.xlu1 %v700_v13, 288 }
 0x10d   :  { %722 = vbcast.lane.b32.xlu0 %v700_v13, 296 }
 0x10e   :  { %v3888_v59 = vpop.permute.xlu1 %482 }
 0x10f   :  { %5189 = vst [vmem:[#allocation19_spill] sm:$0xff] %v3888_v59 }
 0x110   :  { %726 = vbcast.lane.b32.xlu1 %v700_v13, 304 }
 0x111   :  { %730 = vbcast.lane.b32.xlu0 %v700_v13, 312 }
 0x112   :  { %v3892_v11 = vpop.permute.xlu1 %490 }
 0x113   :  { %5191 = vst [vmem:[#allocation21_spill] sm:$0xff] %v3892_v11 }
 0x114   :  { %734 = vbcast.lane.b32.xlu1 %v700_v13, 320 }
 0x115   :  { %738 = vbcast.lane.b32.xlu0 %v700_v13, 328 }
 0x118   :  { %742 = vbcast.lane.b32.xlu1 %v700_v13, 336 }
 0x119   :  { %746 = vbcast.lane.b32.xlu0 %v700_v13, 344 }
 0x11c   :  { %750 = vbcast.lane.b32.xlu1 %v700_v13, 352 }
 0x11d   :  { %754 = vbcast.lane.b32.xlu0 %v700_v13, 360 }
 0x120   :  { %758 = vbcast.lane.b32.xlu1 %v700_v13, 368 }
 0x121   :  { %762 = vbcast.lane.b32.xlu0 %v700_v13, 376  ;;  %v3894_v13 = vpop.permute.xlu0 %454 }
 0x122   :  { %5192 = vst [vmem:[#allocation22_spill] sm:$0xff] %v3894_v13 }
 0x15c   :  { %v137_v25 = vpop.f32.mrf.mxu0 }
 0x15d   :  { %3060 = vmatmul.mubr.f32.vlgmr.msra.gmra.mxu1 %v137_v25  ;;  %v3896_v25 = vpop.permute.xlu1 %501 }
 0x15e   :  { %v3026_v26 = vpop.f32.mrf.mxu0  ;;  %5193 = vst [vmem:[#allocation23_spill] sm:$0xff] %v3896_v25 }
 0x15f   :  { %v3898_v26 = vpop.permute.xlu0 %462 }
 0x160   :  { %5194 = vst [vmem:[#allocation24_spill] sm:$0xff] %v3898_v26 }
 0x161   :  { %v3900_v47 = vpop.permute.xlu1 %509 }
 0x162   :  { %5195 = vst [vmem:[#allocation25_spill] sm:$0xff] %v3900_v47 }
 0x163   :  { %v3902_v49 = vpop.permute.xlu0 %470 }
 0x164   :  { %5196 = vst [vmem:[#allocation26_spill] sm:$0xff] %v3902_v49 }
 0x165   :  { %v3904_v44 = vpop.permute.xlu1 %517 }
 0x166   :  { %5197 = vst [vmem:[#allocation27_spill] sm:$0xff] %v3904_v44 }
 0x167   :  { %v3906_v51 = vpop.permute.xlu0 %478 }
 0x168   :  { %5198 = vst [vmem:[#allocation28_spill] sm:$0xff] %v3906_v51 }
 0x169   :  { %v3908_v42 = vpop.permute.xlu1 %525 }
 0x16a   :  { %5199 = vst [vmem:[#allocation29_spill] sm:$0xff] %v3908_v42 }
 0x16b   :  { %v3910_v59 = vpop.permute.xlu0 %486 }
 0x16c   :  { %5200 = vst [vmem:[#allocation30_spill] sm:$0xff] %v3910_v59 }
 0x16d   :  { %v3912_v40 = vpop.permute.xlu1 %533 }
 0x16e   :  { %5201 = vst [vmem:[#allocation31_spill] sm:$0xff] %v3912_v40 }
 0x16f   :  { %v3914_v11 = vpop.permute.xlu0 %494 }
 0x170   :  { %5202 = vst [vmem:[#allocation32_spill] sm:$0xff] %v3914_v11 }
 0x171   :  { %v3916_v13 = vpop.permute.xlu1 %541 }
 0x172   :  { %5203 = vst [vmem:[#allocation33_spill] sm:$0xff] %v3916_v13 }
 0x173   :  { %v3918_v62 = vpop.permute.xlu0 %505 }
 0x175   :  { %v3920_v26 = vpop.permute.xlu1 %549 }
 0x176   :  { %5204 = vst [vmem:[#allocation34_spill] sm:$0xff] %v3920_v26  ;;  %v3659_v26 = vmov 1966171168  }
 0x177   :  { %v3922_v52 = vpop.permute.xlu0 %513 }
 0x178   :  { %5205 = vst [vmem:[#allocation35_spill] sm:$0xff] %v3922_v52  ;;  %v895_v52 = vunpack.c.l.s4 %v3659_v26 }
 0x179   :  { %v3924_v49 = vpop.permute.xlu1 %557 }
 0x17a   :  { %5206 = vst [vmem:[#allocation36_spill] sm:$0xff] %v3924_v49  ;;  %v896_v49 = vunpack.c.0.s8 %v895_v52 }
 0x17b   :  { %v3926_v44 = vpop.permute.xlu0 %521 }
 0x17c   :  { %5207 = vst [vmem:[#allocation37_spill] sm:$0xff] %v3926_v44 }
 0x17d   :  { %v3928_v51 = vpop.permute.xlu1 %568 }
 0x17e   :  { %5208 = vst [vmem:[#allocation38_spill] sm:$0xff] %v3928_v51  ;;  %v3947_v51 = vsub.s32 %v896_v49, %v3697_v3 }
 0x17f   :  { %v3930_v42 = vpop.permute.xlu0 %529 }
 0x180   :  { %5209 = vst [vmem:[#allocation39_spill] sm:$0xff] %v3930_v42 }
 0x181   :  { %v3932_v59 = vpop.permute.xlu1 %576 }
 0x182   :  { %5210 = vst [vmem:[#allocation40_spill] sm:$0xff] %v3932_v59 }
 0x183   :  { %v3934_v40 = vpop.permute.xlu0 %537 }
 0x184   :  { %5211 = vst [vmem:[#allocation41_spill] sm:$0xff] %v3934_v40 }
 0x185   :  { %v3936_v11 = vpop.permute.xlu1 %584 }
 0x186   :  { %5212 = vst [vmem:[#allocation42_spill] sm:$0xff] %v3936_v11 }
 0x187   :  { %v3938_v13 = vpop.permute.xlu0 %545 }
 0x188   :  { %5213 = vst [vmem:[#allocation43_spill] sm:$0xff] %v3938_v13 }
 0x189   :  { %v3940_v47 = vpop.permute.xlu1 %592 }
 0x18a   :  { %5214 = vst [vmem:[#allocation44_spill] sm:$0xff] %v3940_v47 }
 0x18b   :  { %v3942_v25 = vpop.permute.xlu0 %553 }
 0x18d   :  { %v3944_v44 = vpop.permute.xlu1 %600 }
 0x18e   :  { %5215 = vst [vmem:[#allocation45_spill] sm:$0xff] %v3944_v44 }
 0x18f   :  { %v3949_v42 = vpop.permute.xlu0 %561 }
 0x190   :  { %5216 = vst [vmem:[#allocation46_spill] sm:$0xff] %v3949_v42 }
 0x191   :  { %v3951_v59 = vpop.permute.xlu1 %608 }
 0x192   :  { %5217 = vst [vmem:[#allocation47_spill] sm:$0xff] %v3951_v59 }
 0x193   :  { %v3961_v44 = vpop.permute.xlu0 %572 }
 0x195   :  { %v3966_v42 = vpop.permute.xlu1 %616 }
 0x199   :  { %v3987_v53 = vpop.permute.xlu1 %624 }
 0x21d   :  { %v223_v40 = vpop.f32.mrf.mxu1 }
 0x21e   :  { %v893_v11 = vcombine.high %v223_v40, %v223_v40  ;;  %v3954_v13 = vrot.slane %v223_v40, %v3947_v51 }
 0x21f   :  { %v3061_v47 = vpop.f32.mrf.mxu1 }
 0x220   :  { %v907_v26 = vrot.slane %v893_v11, %v3947_v51  ;;  %v3959_v52 = vrot.slane %v3954_v13, %v3947_v51  ;;  %v908_v63 = vcombine.high %v3954_v13, %v3954_v13 }
 0x222   :  { %v909_v49 = vcombine.high %v907_v26, %v907_v26  ;;  %v3964_v3 = vrot.slane %v907_v26, %v3947_v51  ;;  %v3970_v59 = vrot.slane %v3959_v52, %v3704_v8  ;;  %v3983_v26 = vpop.permute.xlu0 %580  ;;  %v4041_v1 = vrot.slane %v908_v63, %v3947_v51 }
 0x224   :  { %v3977_v40 = vrot.slane %v909_v49, %v3947_v51  ;;  %v982_v47 = vsel %vm764_vm3, %v3970_v59, 0.0  ;;  %v983_v11 = vsel %vm765_vm2, %v3970_v59, 0.0  ;;  %v985_v54 = vsel %vm767_vm4, %v3970_v59, 0.0 }
 0x225   :  { %1110 = vadd.xlane.f32.xlu1 %v982_v47  ;;  %1112 = vadd.xlane.f32.xlu0 %v983_v11  ;;  %v984_v49 = vsel %vm766_vm5, %v3970_v59, 0.0  ;;  %v987_v56 = vsel %vm769_vm6, %v3970_v59, 0.0  ;;  %v986_v55 = vsel %vm768_vm7, %v3970_v59, 0.0  ;;  %v636_v11 = vpop.permute.xlu1 %635  ;;  %v939_v58 = vcombine.high %v3964_v3, %v3964_v3 }
 0x226   :  { %v3996_v47 = vpop.permute.xlu0 %588  ;;  %v989_v57 = vsel %vm771_vm8, %v3970_v59, 0.0  ;;  %vm860_vm12 = vcmp.eq.s32.totalorder %v636_v11, %v3767_v46  ;;  %v993_v0 = vsel %vm775_vm15, %v3970_v59, 0.0  ;;  %v995_v2 = vsel %vm777_vm0, %v3970_v59, 0.0 }
 0x227   :  { %v4014_v60 = vrot.slane %v939_v58, %v3704_v8  ;;  %v994_v13 = vsel %vm776_vm1, %v3970_v59, 0.0  ;;  %vm779_vm2 = vcmp.eq.s32.totalorder %v3806_v7, %v3767_v46  ;;  %vm778_vm3 = vcmp.eq.s32.totalorder %v3804_v6, %v3767_v46 }
 0x228   :  { %v949_v4 = vrot.slane %v4041_v1, %v3704_v8  ;;  %v997_v5 = vsel %vm779_vm2, %v3970_v59, 0.0  ;;  %v996_v51 = vsel %vm778_vm3, %v3970_v59, 0.0  ;;  %vm781_vm4 = vcmp.eq.s32.totalorder %v3811_v12, %v3767_v46 }
 0x229   :  { %1116 = vadd.xlane.f32.xlu1 %v985_v54  ;;  %1114 = vadd.xlane.f32.xlu0 %v984_v49  ;;  %v988_v54 = vsel %vm770_vm9, %v3970_v59, 0.0  ;;  %v644_v61 = vpop.permute.xlu1 %643  ;;  %v4028_v58 = vsel %vm860_vm12, %v4014_v60, 0.0  ;;  %vm780_vm5 = vcmp.eq.s32.totalorder %v3808_v9, %v3767_v46  ;;  %vm783_vm6 = vcmp.eq.s32.totalorder %v3816_v15, %v3767_v46 }
 0x22a   :  { %v4009_v49 = vpop.permute.xlu0 %596  ;;  %vm862_vm13 = vcmp.eq.s32.totalorder %v644_v61, %v3767_v46  ;;  %v999_v7 = vsel %vm781_vm4, %v949_v4, 0.0  ;;  %v998_v6 = vsel %vm780_vm5, %v949_v4, 0.0  ;;  %vm782_vm7 = vcmp.eq.s32.totalorder %v3814_v14, %v3767_v46 }
 0x22b   :  { %v4031_v11 = vsel %vm862_vm13, %v4014_v60, 0.0  ;;  %vm785_vm8 = vcmp.eq.s32.totalorder %v3820_v17, %v3767_v46  ;;  %vm784_vm9 = vcmp.eq.s32.totalorder %v3818_v16, %v3767_v46  ;;  %vm789_vm12 = vcmp.eq.s32.totalorder %v3828_v20, %v3767_v46 }
 0x22c   :  { %v1003_v12 = vsel %vm785_vm8, %v949_v4, 0.0  ;;  %v1002_v63 = vsel %vm784_vm9, %v949_v4, 0.0  ;;  %vm788_vm13 = vcmp.eq.s32.totalorder %v3826_v10, %v3767_v46  ;;  %v1007_v16 = vsel %vm789_vm12, %v949_v4, 0.0 }
 0x22d   :  { %1120 = vadd.xlane.f32.xlu1 %v987_v56  ;;  %1118 = vadd.xlane.f32.xlu0 %v986_v55  ;;  %v991_v56 = vsel %vm773_vm10, %v3970_v59, 0.0  ;;  %v990_v55 = vsel %vm772_vm11, %v3970_v59, 0.0  ;;  %vm787_vm10 = vcmp.eq.s32.totalorder %v3824_v19, %v3767_v46  ;;  %vm786_vm11 = vcmp.eq.s32.totalorder %v3822_v18, %v3767_v46  ;;  %v4091_v10 = vpop.permute.xlu1 %651 }
 0x22e   :  { %v1005_v14 = vsel %vm787_vm10, %v949_v4, 0.0  ;;  %v1004_v17 = vsel %vm786_vm11, %v949_v4, 0.0  ;;  %vm790_vm15 = vcmp.eq.s32.totalorder %v3830_v21, %v3767_v46  ;;  %vm793_vm0 = vcmp.eq.s32.totalorder %v3836_v24, %v3767_v46 }
 0x22f   :  { %vm792_vm1 = vcmp.eq.s32.totalorder %v3834_v23, %v3767_v46  ;;  %v938_v20 = vcombine.high %v3959_v52, %v3959_v52  ;;  %vm795_vm2 = vcmp.eq.s32.totalorder %v3850_v33, %v3767_v46  ;;  %vm794_vm3 = vcmp.eq.s32.totalorder %v3838_v27, %v3767_v46 }
 0x230   :  { %v1010_v21 = vsel %vm792_vm1, %v949_v4, 0.0  ;;  %v1013_v23 = vsel %vm795_vm2, %v949_v4, 0.0  ;;  %vm797_vm4 = vcmp.eq.s32.totalorder %v3854_v35, %v3767_v46  ;;  %vm796_vm5 = vcmp.eq.s32.totalorder %v3840_v28, %v3767_v46 }
 0x231   :  { %1124 = vadd.xlane.f32.xlu1 %v989_v57  ;;  %1122 = vadd.xlane.f32.xlu0 %v988_v54  ;;  %v4033_v57 = vpop.permute.xlu0 %604  ;;  %v992_v54 = vsel %vm774_vm14, %v3970_v59, 0.0  ;;  %v1001_v59 = vsel %vm783_vm6, %v949_v4, 0.0  ;;  %vm791_vm14 = vcmp.eq.s32.totalorder %v3832_v22, %v3767_v46  ;;  %v1011_v22 = vsel %vm793_vm0, %v949_v4, 0.0 }
 0x232   :  { %v1009_v19 = vsel %vm791_vm14, %v949_v4, 0.0  ;;  %v4102_v24 = vrot.slane %v938_v20, %v3704_v8  ;;  %vm799_vm6 = vcmp.eq.s32.totalorder %v3858_v37, %v3767_v46  ;;  %vm801_vm8 = vcmp.eq.s32.totalorder %v3862_v39, %v3767_v46  ;;  %v5224_v20 = vld [vmem:[#allocation25_spill] sm:$0xff] }
 0x233   :  { %vm800_vm9 = vcmp.eq.s32.totalorder %v3844_v30, %v3767_v46  ;;  %vm803_vm10 = vcmp.eq.s32.totalorder %v3866_v41, %v3767_v46  ;;  %vm802_vm11 = vcmp.eq.s32.totalorder %v3846_v31, %v3767_v46  ;;  %vm805_vm12 = vcmp.eq.s32.totalorder %v3870_v43, %v3767_v46 }
 0x234   :  { %v1015_v33 = vsel %vm797_vm4, %v4102_v24, 0.0  ;;  %v1014_v27 = vsel %vm796_vm5, %v4102_v24, 0.0  ;;  %v1017_v35 = vsel %vm799_vm6, %v4102_v24, 0.0  ;;  %v1019_v37 = vsel %vm801_vm8, %v4102_v24, 0.0 }
 0x235   :  { %1128 = vadd.xlane.f32.xlu1 %v991_v56  ;;  %1126 = vadd.xlane.f32.xlu0 %v990_v55  ;;  %v4047_v61 = vpop.permute.xlu0 %612  ;;  %v1000_v55 = vsel %vm782_vm7, %v949_v4, 0.0  ;;  %vm798_vm7 = vcmp.eq.s32.totalorder %v3842_v29, %v3767_v46  ;;  %v1018_v29 = vsel %vm800_vm9, %v4102_v24, 0.0  ;;  %v1021_v39 = vsel %vm803_vm10, %v4102_v24, 0.0 }
 0x236   :  { %v1016_v28 = vsel %vm798_vm7, %v4102_v24, 0.0  ;;  %v1020_v30 = vsel %vm802_vm11, %v4102_v24, 0.0  ;;  %v1023_v41 = vsel %vm805_vm12, %v4102_v24, 0.0  ;;  %vm807_vm14 = vcmp.eq.s32.totalorder %v3874_v45, %v3767_v46 }
 0x237   :  { %v1025_v43 = vsel %vm807_vm14, %v4102_v24, 0.0  ;;  %vm809_vm0 = vcmp.eq.s32.totalorder %v3878_v48, %v3767_v46  ;;  %vm808_vm1 = vcmp.eq.s32.totalorder %v3856_v36, %v3767_v46  ;;  %vm811_vm2 = vcmp.eq.s32.totalorder %v3882_v50, %v3767_v46  ;;  %v5222_v50 = vld [vmem:[#allocation23_spill] sm:$0xff] }
 0x238   :  { %v1027_v45 = vsel %vm809_vm0, %v4102_v24, 0.0  ;;  %v4174_v48 = vrot.slane %v3964_v3, %v3704_v8  ;;  %v1029_v36 = vsel %vm811_vm2, %v4102_v24, 0.0  ;;  %vm829_vm4 = vcmp.eq.s32.totalorder %v3918_v62, %v3767_v46 }
 0x239   :  { %1132 = vadd.xlane.f32.xlu1 %v993_v0  ;;  %1130 = vadd.xlane.f32.xlu0 %v992_v54  ;;  %v4059_v56 = vpop.permute.xlu0 %620  ;;  %v1006_v0 = vsel %vm788_vm13, %v949_v4, 0.0  ;;  %v1008_v54 = vsel %vm790_vm15, %v949_v4, 0.0  ;;  %vm804_vm13 = vcmp.eq.s32.totalorder %v3848_v32, %v3767_v46  ;;  %vm806_vm15 = vcmp.eq.s32.totalorder %v3852_v34, %v3767_v46 }
 0x23a   :  { %v1022_v31 = vsel %vm804_vm13, %v4102_v24, 0.0  ;;  %v1024_v32 = vsel %vm806_vm15, %v4102_v24, 0.0  ;;  %v1026_v34 = vsel %vm808_vm1, %v4102_v24, 0.0  ;;  %vm828_vm5 = vcmp.eq.s32.totalorder %v5222_v50, %v3767_v46 }
 0x23b   :  { %v1046_v3 = vsel %vm828_vm5, %v4174_v48, 0.0  ;;  %vm830_vm7 = vcmp.eq.s32.totalorder %v5224_v20, %v3767_v46  ;;  %v940_v62 = vcombine.high %v4041_v1, %v4041_v1  ;;  %v5234_v20 = vld [vmem:[#allocation41_spill] sm:$0xff] }
 0x23c   :  { %vm837_vm1 = vcmp.eq.s32.totalorder %v5234_v20, %v3767_v46 }
 0x23d   :  { %1136 = vadd.xlane.f32.xlu1 %v995_v2  ;;  %1134 = vadd.xlane.f32.xlu0 %v994_v13  ;;  %v4067_v9 = vpop.permute.xlu0 %628  ;;  %v1012_v13 = vsel %vm794_vm3, %v949_v4, 0.0  ;;  %vm810_vm3 = vcmp.eq.s32.totalorder %v3860_v38, %v3767_v46  ;;  %v1047_v38 = vsel %vm829_vm4, %v4174_v48, 0.0 }
 0x23e   :  { %5218 = vst [vmem:[#allocation48_spill] sm:$0xff] %v4067_v9 }
 0x241   :  { %1140 = vadd.xlane.f32.xlu1 %v997_v5  ;;  %1138 = vadd.xlane.f32.xlu0 %v996_v51  ;;  %v4075_v15 = vpop.permute.xlu0 %639  ;;  %v4104_v5 = vpop.permute.xlu1 %659 }
 0x245   :  { %1144 = vadd.xlane.f32.xlu1 %v999_v7  ;;  %1142 = vadd.xlane.f32.xlu0 %v998_v6  ;;  %v4083_v18 = vpop.permute.xlu0 %647  ;;  %v4118_v4 = vpop.permute.xlu1 %667 }
 0x249   :  { %1148 = vadd.xlane.f32.xlu1 %v1001_v59  ;;  %1146 = vadd.xlane.f32.xlu0 %v1000_v55  ;;  %v4095_v2 = vpop.permute.xlu0 %655  ;;  %v4130_v7 = vpop.permute.xlu1 %675 }
 0x24d   :  { %1152 = vadd.xlane.f32.xlu1 %v1003_v12  ;;  %1150 = vadd.xlane.f32.xlu0 %v1002_v63  ;;  %v4108_v52 = vpop.permute.xlu0 %663  ;;  %v4144_v59 = vpop.permute.xlu1 %683 }
 0x251   :  { %1156 = vadd.xlane.f32.xlu1 %v1005_v14  ;;  %1154 = vadd.xlane.f32.xlu0 %v1004_v17  ;;  %v4121_v51 = vpop.permute.xlu0 %671  ;;  %v4156_v12 = vpop.permute.xlu1 %691 }
 0x255   :  { %1160 = vadd.xlane.f32.xlu1 %v1007_v16  ;;  %1158 = vadd.xlane.f32.xlu0 %v1006_v0  ;;  %v4134_v6 = vpop.permute.xlu0 %679  ;;  %v4170_v14 = vpop.permute.xlu1 %702  ;;  %v1028_v16 = vsel %vm810_vm3, %v4102_v24, 0.0  ;;  %v5225_v24 = vld [vmem:[#allocation27_spill] sm:$0xff] }
 0x256   :  { %5221 = vst [vmem:[#allocation51_spill] sm:$0xff] %v4170_v14  ;;  %vm832_vm8 = vcmp.eq.s32.totalorder %v5225_v24, %v3767_v46  ;;  %v5236_v24 = vld [vmem:[#allocation26_spill] sm:$0xff] }
 0x257   :  { %vm821_vm2 = vcmp.eq.s32.totalorder %v5236_v24, %v3767_v46 }
 0x259   :  { %1164 = vadd.xlane.f32.xlu1 %v1009_v19  ;;  %1162 = vadd.xlane.f32.xlu0 %v1008_v54  ;;  %v4147_v55 = vpop.permute.xlu0 %687  ;;  %v4186_v0 = vpop.permute.xlu1 %710  ;;  %v5223_v19 = vld [vmem:[#allocation35_spill] sm:$0xff] }
 0x25a   :  { %5219 = vst [vmem:[#allocation49_spill] sm:$0xff] %v4147_v55  ;;  %vm831_vm6 = vcmp.eq.s32.totalorder %v5223_v19, %v3767_v46  ;;  %v5233_v19 = vld [vmem:[#allocation24_spill] sm:$0xff] }
 0x25b   :  { %vm819_vm0 = vcmp.eq.s32.totalorder %v5233_v19, %v3767_v46  ;;  %v5246_v19 = vld [vmem:[#allocation32_spill] sm:$0xff] }
 0x25d   :  { %1168 = vadd.xlane.f32.xlu1 %v1011_v22  ;;  %1166 = vadd.xlane.f32.xlu0 %v1010_v21  ;;  %v4160_v63 = vpop.permute.xlu0 %695  ;;  %v1049_v22 = vsel %vm831_vm6, %v4174_v48, 0.0  ;;  %v1048_v21 = vsel %vm830_vm7, %v4174_v48, 0.0 }
 0x25e   :  { %5220 = vst [vmem:[#allocation50_spill] sm:$0xff] %v4160_v63  ;;  %v5262_v63 = vld [vmem:[#allocation21_spill] sm:$0xff] }
 0x261   :  { %1172 = vadd.xlane.f32.xlu1 %v1013_v23  ;;  %1170 = vadd.xlane.f32.xlu0 %v1012_v13  ;;  %v4177_v17 = vpop.permute.xlu0 %706  ;;  %v5226_v23 = vld [vmem:[#allocation37_spill] sm:$0xff]  ;;  %v4202_v13 = vpop.permute.xlu1 %718 }
 0x262   :  { %vm833_vm9 = vcmp.eq.s32.totalorder %v5226_v23, %v3767_v46 }
 0x265   :  { %1176 = vadd.xlane.f32.xlu1 %v1015_v33  ;;  %1174 = vadd.xlane.f32.xlu0 %v1014_v27  ;;  %v4190_v54 = vpop.permute.xlu0 %714  ;;  %v4205_v33 = vrot.slane %v940_v62, %v3704_v8  ;;  %v1050_v27 = vsel %vm832_vm8, %v4174_v48, 0.0  ;;  %vm827_vm8 = vcmp.eq.s32.totalorder %v5246_v19, %v3767_v46 }
 0x267   :  { %v1037_v62 = vsel %vm819_vm0, %v4205_v33, 0.0 }
 0x269   :  { %1180 = vadd.xlane.f32.xlu1 %v1017_v35  ;;  %1178 = vadd.xlane.f32.xlu0 %v1016_v28  ;;  %v4208_v1 = vpop.permute.xlu0 %722  ;;  %v1051_v35 = vsel %vm833_vm9, %v4174_v48, 0.0  ;;  %v5227_v28 = vld [vmem:[#allocation18_spill] sm:$0xff]  ;;  %vm841_vm9 = vcmp.eq.s32.totalorder %v3942_v25, %v3767_v46  ;;  %v5251_v25 = vld [vmem:[#allocation13_spill] sm:$0xff] }
 0x26a   :  { %vm813_vm10 = vcmp.eq.s32.totalorder %v5227_v28, %v3767_v46  ;;  %v1059_v24 = vsel %vm841_vm9, %v4174_v48, 0.0 }
 0x26d   :  { %1184 = vadd.xlane.f32.xlu1 %v1019_v37  ;;  %1182 = vadd.xlane.f32.xlu0 %v1018_v29  ;;  %v5228_v37 = vld [vmem:[#allocation29_spill] sm:$0xff]  ;;  %v1031_v29 = vsel %vm813_vm10, %v4205_v33, 0.0 }
 0x26e   :  { %vm834_vm11 = vcmp.eq.s32.totalorder %v5228_v37, %v3767_v46  ;;  %v5239_v37 = vld [vmem:[#allocation28_spill] sm:$0xff] }
 0x26f   :  { %vm823_vm4 = vcmp.eq.s32.totalorder %v5239_v37, %v3767_v46 }
 0x271   :  { %1188 = vadd.xlane.f32.xlu1 %v1021_v39  ;;  %1186 = vadd.xlane.f32.xlu0 %v1020_v30  ;;  %v1052_v39 = vsel %vm834_vm11, %v4174_v48, 0.0  ;;  %v4217_v30 = vpop.permute.xlu1 %726 }
 0x275   :  { %1192 = vadd.xlane.f32.xlu1 %v1023_v41  ;;  %1190 = vadd.xlane.f32.xlu0 %v1022_v31  ;;  %v5229_v41 = vld [vmem:[#allocation20_spill] sm:$0xff]  ;;  %v4221_v31 = vpop.permute.xlu0 %730 }
 0x276   :  { %vm815_vm12 = vcmp.eq.s32.totalorder %v5229_v41, %v3767_v46  ;;  %v1041_v41 = vsel %vm823_vm4, %v4205_v33, 0.0 }
 0x279   :  { %1196 = vadd.xlane.f32.xlu1 %v1025_v43  ;;  %1194 = vadd.xlane.f32.xlu0 %v1024_v32  ;;  %v5230_v43 = vld [vmem:[#allocation39_spill] sm:$0xff]  ;;  %v1033_v32 = vsel %vm815_vm12, %v4205_v33, 0.0  ;;  %vm814_vm12 = vcmp.eq.s32.totalorder %v5251_v25, %v3767_v46 }
 0x27a   :  { %vm835_vm13 = vcmp.eq.s32.totalorder %v5230_v43, %v3767_v46 }
 0x27d   :  { %1200 = vadd.xlane.f32.xlu1 %v1027_v45  ;;  %1198 = vadd.xlane.f32.xlu0 %v1026_v34  ;;  %v1053_v45 = vsel %vm835_vm13, %v4174_v48, 0.0  ;;  %v5231_v34 = vld [vmem:[#allocation22_spill] sm:$0xff] }
 0x27e   :  { %vm817_vm14 = vcmp.eq.s32.totalorder %v5231_v34, %v3767_v46  ;;  %v5244_v34 = vld [vmem:[#allocation34_spill] sm:$0xff] }
 0x27f   :  { %v1035_v50 = vsel %vm817_vm14, %v4205_v33, 0.0  ;;  %vm840_vm7 = vcmp.eq.s32.totalorder %v5244_v34, %v3767_v46  ;;  %v5253_v34 = vld [vmem:[#allocation14_spill] sm:$0xff] }
 0x280   :  { %vm816_vm14 = vcmp.eq.s32.totalorder %v5253_v34, %v3767_v46 }
 0x281   :  { %1204 = vadd.xlane.f32.xlu1 %v1029_v36  ;;  %1202 = vadd.xlane.f32.xlu0 %v1028_v16  ;;  %v5232_v36 = vld [vmem:[#allocation31_spill] sm:$0xff]  ;;  %v4231_v16 = vpop.permute.xlu1 %734 }
 0x282   :  { %vm836_vm15 = vcmp.eq.s32.totalorder %v5232_v36, %v3767_v46 }
 0x285   :  { %1240 = vadd.xlane.f32.xlu1 %v1047_v38  ;;  %1238 = vadd.xlane.f32.xlu0 %v1046_v3  ;;  %v4234_v38 = vpop.permute.xlu0 %738  ;;  %v1054_v3 = vsel %vm836_vm15, %v4174_v48, 0.0 }
 0x289   :  { %1244 = vadd.xlane.f32.xlu1 %v1049_v22  ;;  %1242 = vadd.xlane.f32.xlu0 %v1048_v21  ;;  %v1055_v22 = vsel %vm837_vm1, %v4174_v48, 0.0  ;;  %v4243_v21 = vpop.permute.xlu1 %742  ;;  %v4247_v23 = vpop.permute.xlu0 %746 }
 0x28a   :  { %5235 = vst [vmem:[#allocation23_spill] sm:$0xff] %v4243_v21  ;;  %5237 = vst [vmem:[#allocation35_spill] sm:$0xff] %v4247_v23 }
 0x28d   :  { %1246 = vadd.xlane.f32.xlu1 %v1050_v27  ;;  %1248 = vadd.xlane.f32.xlu0 %v1051_v35  ;;  %v5238_v27 = vld [vmem:[#allocation33_spill] sm:$0xff]  ;;  %v1039_v35 = vsel %vm821_vm2, %v4205_v33, 0.0  ;;  %v4260_v43 = vpop.permute.xlu0 %754  ;;  %vm849_vm2 = vcmp.eq.s32.totalorder %v3996_v47, %v3767_v46 }
 0x28e   :  { %vm838_vm3 = vcmp.eq.s32.totalorder %v5238_v27, %v3767_v46  ;;  %5242 = vst [vmem:[#allocation27_spill] sm:$0xff] %v4260_v43  ;;  %v5261_v43 = vld [vmem:[#allocation19_spill] sm:$0xff] }
 0x28f   :  { %v1056_v28 = vsel %vm838_vm3, %v4174_v48, 0.0 }
 0x291   :  { %1208 = vadd.xlane.f32.xlu1 %v1031_v29  ;;  %1250 = vadd.xlane.f32.xlu0 %v1052_v39  ;;  %v5240_v29 = vld [vmem:[#allocation43_spill] sm:$0xff]  ;;  %v4257_v39 = vpop.permute.xlu1 %750  ;;  %v4273_v20 = vpop.permute.xlu0 %762 }
 0x292   :  { %vm839_vm5 = vcmp.eq.s32.totalorder %v5240_v29, %v3767_v46  ;;  %5241 = vst [vmem:[#allocation25_spill] sm:$0xff] %v4257_v39  ;;  %5247 = vst [vmem:[#allocation18_spill] sm:$0xff] %v4273_v20  ;;  %v5250_v29 = vld [vmem:[#allocation12_spill] sm:$0xff]  ;;  %v5260_v20 = vld [vmem:[#allocation17_spill] sm:$0xff] }
 0x293   :  { %vm812_vm11 = vcmp.eq.s32.totalorder %v5250_v29, %v3767_v46  ;;  %v1034_v29 = vsel %vm816_vm14, %v4205_v33, 0.0  ;;  %vm879_vm14 = vcmp.eq.s32.totalorder %v4190_v54, %v3767_v46  ;;  %v2294_v54 = vadd.s32 4294967256, %v3767_v46 }
 0x295   :  { %1212 = vadd.xlane.f32.xlu1 %v1033_v32  ;;  %1252 = vadd.xlane.f32.xlu0 %v1053_v45  ;;  %v1057_v32 = vsel %vm839_vm5, %v4174_v48, 0.0  ;;  %v5243_v45 = vld [vmem:[#allocation30_spill] sm:$0xff]  ;;  %vm851_vm5 = vcmp.eq.s32.totalorder %v4009_v49, %v3767_v46 }
 0x296   :  { %vm825_vm6 = vcmp.eq.s32.totalorder %v5243_v45, %v3767_v46 }
 0x297   :  { %v1043_v36 = vsel %vm825_vm6, %v4205_v33, 0.0 }
 0x299   :  { %1216 = vadd.xlane.f32.xlu1 %v1035_v50  ;;  %1254 = vadd.xlane.f32.xlu0 %v1054_v3  ;;  %v1058_v50 = vsel %vm840_vm7, %v4174_v48, 0.0  ;;  %v4269_v3 = vpop.permute.xlu1 %758  ;;  %vm877_vm7 = vcmp.eq.s32.totalorder %v4177_v17, %v3767_v46 }
 0x29a   :  { %5245 = vst [vmem:[#allocation37_spill] sm:$0xff] %v4269_v3 }
 0x29d   :  { %1220 = vadd.xlane.f32.xlu1 %v1037_v62  ;;  %1256 = vadd.xlane.f32.xlu0 %v1055_v22  ;;  %v4279_v62 = vrot.slane %v3977_v40, %v3704_v8  ;;  %v1045_v22 = vsel %vm827_vm8, %v4205_v33, 0.0  ;;  %vm847_vm8 = vcmp.eq.s32.totalorder %v3983_v26, %v3767_v46 }
 0x29f   :  { %5248 = vst [vmem:[#allocation29_spill] sm:$0xff] %v4279_v62  ;;  %v4394_v34 = vsel %vm851_vm5, %v4279_v62, 0.0  ;;  %vm5271_vm5 = vcmp.eq.s32.totalorder %v4047_v61, %v3767_v46 }
 0x2a1   :  { %1224 = vadd.xlane.f32.xlu1 %v1039_v35  ;;  %1258 = vadd.xlane.f32.xlu0 %v1056_v28  ;;  %v5249_v35 = vld [vmem:[#allocation38_spill] sm:$0xff] }
 0x2a2   :  { %vm844_vm10 = vcmp.eq.s32.totalorder %v5249_v35, %v3767_v46 }
 0x2a3   :  { %v1062_v45 = vsel %vm844_vm10, %v4279_v62, 0.0  ;;  %vm856_vm10 = vcmp.eq.s32.totalorder %v3966_v42, %v3767_v46 }
 0x2a5   :  { %1228 = vadd.xlane.f32.xlu1 %v1041_v41  ;;  %1260 = vadd.xlane.f32.xlu0 %v1057_v32  ;;  %v5252_v41 = vld [vmem:[#allocation36_spill] sm:$0xff] }
 0x2a6   :  { %vm842_vm13 = vcmp.eq.s32.totalorder %v5252_v41, %v3767_v46  ;;  %v5259_v41 = vld [vmem:[#allocation45_spill] sm:$0xff] }
 0x2a7   :  { %v1060_v19 = vsel %vm842_vm13, %v4174_v48, 0.0  ;;  %vm852_vm6 = vcmp.eq.s32.totalorder %v5259_v41, %v3767_v46  ;;  %vm863_vm13 = vcmp.eq.s32.totalorder %v4083_v18, %v3767_v46 }
 0x2a8   :  { %v4410_v49 = vsel %vm852_vm6, %v4279_v62, 0.0  ;;  %vm5272_vm6 = vcmp.eq.s32.totalorder %v3961_v44, %v3767_v46 }
 0x2a9   :  { %1232 = vadd.xlane.f32.xlu1 %v1043_v36  ;;  %1262 = vadd.xlane.f32.xlu0 %v1058_v50  ;;  %v5254_v36 = vld [vmem:[#allocation46_spill] sm:$0xff] }
 0x2aa   :  { %vm843_vm15 = vcmp.eq.s32.totalorder %v5254_v36, %v3767_v46 }
 0x2ab   :  { %v1061_v9 = vsel %vm843_vm15, %v4174_v48, 0.0  ;;  %vm864_vm15 = vcmp.eq.s32.totalorder %v4091_v10, %v3767_v46 }
 0x2ad   :  { %1236 = vadd.xlane.f32.xlu1 %v1045_v22  ;;  %1264 = vadd.xlane.f32.xlu0 %v1059_v24  ;;  %v5255_v22 = vld [vmem:[#allocation15_spill] sm:$0xff]  ;;  %v5256_v24 = vld [vmem:[#allocation42_spill] sm:$0xff] }
 0x2ae   :  { %v1111_v27 = vpop.xlane.xlu1 %1110  ;;  %v1113_v37 = vpop.xlane.xlu0 %1112  ;;  %vm818_vm0 = vcmp.eq.s32.totalorder %v5255_v22, %v3767_v46  ;;  %vm848_vm1 = vcmp.eq.s32.totalorder %v5256_v24, %v3767_v46 }
 0x2af   :  { %v1366_v28 = vsub.f32 0.0, %v1111_v27  ;;  %v1367_v32 = vsub.f32 0.0, %v1113_v37  ;;  %v5257_v27 = vld [vmem:[#allocation44_spill] sm:$0xff]  ;;  %v1036_v47 = vsel %vm818_vm0, %v4205_v33, 0.0  ;;  %vm5266_vm0 = vcmp.eq.s32.totalorder %v5260_v20, %v3767_v46 }
 0x2b0   :  { %vm850_vm3 = vcmp.eq.s32.totalorder %v5257_v27, %v3767_v46 }
 0x2b1   :  { %v1494_v50 = vmul.f32 1.442695, %v1366_v28  ;;  %1270 = vadd.xlane.f32.xlu1 %v1062_v45  ;;  %v1496_v35 = vmul.f32 1.442695, %v1367_v32  ;;  %1266 = vadd.xlane.f32.xlu0 %v1060_v19  ;;  %v5258_v28 = vld [vmem:[#allocation16_spill] sm:$0xff]  ;;  %v941_v32 = vcombine.high %v3977_v40, %v3977_v40  ;;  %v1068_v24 = vsel %vm850_vm3, %v4279_v62, 0.0 }
 0x2b2   :  { %v1117_v37 = vpop.xlane.xlu1 %1116  ;;  %vm820_vm4 = vcmp.eq.s32.totalorder %v5258_v28, %v3767_v46  ;;  %v1115_v3 = vpop.xlane.xlu0 %1114 }
 0x2b3   :  { %3073 = vpow2.f32 %v1494_v50  ;;  %v1369_v45 = vsub.f32 0.0, %v1117_v37  ;;  %v1368_v19 = vsub.f32 0.0, %v1115_v3  ;;  %v5263_v50 = vld [vmem:[#allocation47_spill] sm:$0xff]  ;;  %v5264_v3 = vld [vmem:[#allocation40_spill] sm:$0xff]  ;;  %v4404_v22 = vsel %vm820_vm4, %v4205_v33, 0.0 }
 0x2b4   :  { %3075 = vpow2.f32 %v1496_v35  ;;  %vm846_vm9 = vcmp.eq.s32.totalorder %v5264_v3, %v3767_v46  ;;  %v5265_v35 = vld [vmem:[#allocation11_spill] sm:$0xff]  ;;  %vm5269_vm3 = vcmp.eq.s32.totalorder %v5263_v50, %v3767_v46  ;;  %vm5270_vm4 = vcmp.eq.s32.totalorder %v5262_v63, %v3767_v46 }
 0x2b5   :  { %v1500_v37 = vmul.f32 1.442695, %v1369_v45  ;;  %1302 = vadd.xlane.f32.xlu1 %v4028_v58  ;;  %v1498_v40 = vmul.f32 1.442695, %v1368_v19  ;;  %1268 = vadd.xlane.f32.xlu0 %v1061_v9  ;;  %v4349_v9 = vrot.slane %v941_v32, %v3704_v8  ;;  %v4353_v45 = vsub.s32 %v3767_v46, %v5265_v35 }
 0x2b6   :  { %v1121_v58 = vpop.xlane.xlu1 %1120  ;;  %v1119_v36 = vpop.xlane.xlu0 %1118  ;;  %v1030_v8 = vsel %vm812_vm11, %v4205_v33, 0.0  ;;  %v1066_v32 = vsel %vm848_vm1, %v4279_v62, 0.0  ;;  %vm878_vm11 = vcmp.eq.s32.totalorder %v4186_v0, %v3767_v46  ;;  %vm5267_vm1 = vcmp.eq.s32.totalorder %v4033_v57, %v3767_v46 }
 0x2b7   :  { %3077 = vpow2.f32 %v1500_v37  ;;  %v1371_v48 = vsub.f32 0.0, %v1121_v58  ;;  %v1370_v19 = vsub.f32 0.0, %v1119_v36  ;;  %v4422_v28 = vsel %vm5267_vm1, %v4279_v62, 0.0 }
 0x2b8   :  { %3079 = vpow2.f32 %v1498_v40  ;;  %v1032_v40 = vsel %vm814_vm12, %v4205_v33, 0.0  ;;  %vm865_vm12 = vcmp.eq.s32.totalorder %v4095_v2, %v3767_v46  ;;  %v4434_v20 = vsel %vm5269_vm3, %v4279_v62, 0.0 }
 0x2b9   :  { %v1504_v37 = vmul.f32 1.442695, %v1371_v48  ;;  %1306 = vadd.xlane.f32.xlu1 %v4031_v11  ;;  %v1502_v58 = vmul.f32 1.442695, %v1370_v19  ;;  %1206 = vadd.xlane.f32.xlu0 %v1030_v8  ;;  %v1067_v11 = vsel %vm849_vm2, %v4279_v62, 0.0  ;;  %vm5268_vm2 = vcmp.eq.s32.totalorder %v5261_v43, %v3767_v46 }
 0x2ba   :  { %v1125_v48 = vpop.xlane.xlu1 %1124  ;;  %v1123_v36 = vpop.xlane.xlu0 %1122  ;;  %v4428_v41 = vsel %vm5268_vm2, %v4205_v33, 0.0  ;;  %v4440_v57 = vsel %vm5270_vm4, %v4205_v33, 0.0  ;;  %v4446_v43 = vsel %vm5271_vm5, %v4279_v62, 0.0  ;;  %v4452_v50 = vsel %vm5272_vm6, %v4279_v62, 0.0 }
 0x2bb   :  { %3081 = vpow2.f32 %v1504_v37  ;;  %v1373_v25 = vsub.f32 0.0, %v1125_v48  ;;  %v1372_v27 = vsub.f32 0.0, %v1123_v36  ;;  %v4416_v37 = vsel %vm5266_vm0, %v4205_v33, 0.0 }
 0x2bc   :  { %3083 = vpow2.f32 %v1502_v58  ;;  %v4458_v63 = vsel %vm856_vm10, %v4279_v62, 0.0  ;;  %v4464_v48 = vsel %vm846_vm9, %v4279_v62, 0.0  ;;  %vm5273_vm0 = vcmp.eq.s32.totalorder %v4059_v56, %v3767_v46 }
 0x2bd   :  { %v1508_v19 = vmul.f32 1.442695, %v1373_v25  ;;  %1278 = vadd.xlane.f32.xlu1 %v1066_v32  ;;  %v1506_v8 = vmul.f32 1.442695, %v1372_v27  ;;  %1210 = vadd.xlane.f32.xlu0 %v1032_v40  ;;  %v4470_v44 = vsel %vm5273_vm0, %v4279_v62, 0.0  ;;  %vm5274_vm10 = vcmp.eq.s32.totalorder %v4075_v15, %v3767_v46 }
 0x2be   :  { %v1129_v32 = vpop.xlane.xlu1 %1128  ;;  %v1127_v58 = vpop.xlane.xlu0 %1126  ;;  %v4476_v27 = vsel %vm5274_vm10, %v4014_v60, 0.0  ;;  %vm5275_vm9 = vcmp.eq.s32.totalorder %v3987_v53, %v3767_v46  ;;  %vm5276_vm1 = vcmp.eq.s32.totalorder %v4156_v12, %v3767_v46  ;;  %v4506_v26 = vsel %vm877_vm7, %v4349_v9, 0.0 }
 0x2bf   :  { %3085 = vpow2.f32 %v1508_v19  ;;  %v1375_v40 = vsub.f32 0.0, %v1129_v32  ;;  %v1374_v61 = vsub.f32 0.0, %v1127_v58  ;;  %v4482_v3 = vsel %vm5275_vm9, %v4279_v62, 0.0 }
 0x2c0   :  { %v3074_v33 = vpop.eup %3073  ;;  %3087 = vpow2.f32 %v1506_v8  ;;  %v4494_v15 = vsel %vm5276_vm1, %v4014_v60, 0.0  ;;  %v2266_v12 = vadd.s32 4294967288, %v3767_v46  ;;  %vm5180_vm7 = vcmask 130112  }
 0x2c1   :  { %v3076_v25 = vpop.eup %3075  ;;  %v1750_v36 = vadd.f32 1.0, %v3074_v33  ;;  %v1512_v42 = vmul.f32 1.442695, %v1375_v40  ;;  %1280 = vadd.xlane.f32.xlu1 %v1067_v11  ;;  %v1510_v56 = vmul.f32 1.442695, %v1374_v61  ;;  %1214 = vadd.xlane.f32.xlu0 %v1034_v29  ;;  %v4488_v11 = vsel %vm847_vm8, %v4279_v62, 0.0 }
 0x2c2   :  { %v1751_v19 = vadd.f32 1.0, %v3076_v25  ;;  %v1133_v8 = vpop.xlane.xlu1 %1132  ;;  %v1131_v32 = vpop.xlane.xlu0 %1130  ;;  %v4500_v29 = vsel %vm863_vm13, %v4014_v60, 0.0  ;;  %v4513_v33 = vsel %vm864_vm15, %v4014_v60, 0.0  ;;  %v2280_v61 = vadd.s32 4294967272, %v3767_v46 }
 0x2c3   :  { %3089 = vrcp.f32 %v1750_v36  ;;  %v1377_v53 = vsub.f32 0.0, %v1133_v8  ;;  %v1376_v58 = vsub.f32 0.0, %v1131_v32  ;;  %v4535_v0 = vsub.s32 %v2266_v12, %v5265_v35 }
 0x2c4   :  { %v3078_v40 = vpop.eup %3077  ;;  %3091 = vrcp.f32 %v1751_v19  ;;  %v4520_v19 = vsel %vm878_vm11, %v4349_v9, 0.0  ;;  %v4539_v2 = vsub.s32 %v2280_v61, %v5265_v35  ;;  %vm2278_vm8 = vcmask 195712  }
 0x2c5   :  { %v3080_v18 = vpop.eup %3079  ;;  %v1753_v25 = vadd.f32 1.0, %v3078_v40  ;;  %3093 = vpow2.f32 %v1512_v42  ;;  %v1516_v36 = vmul.f32 1.442695, %v1377_v53  ;;  %1282 = vadd.xlane.f32.xlu1 %v1068_v24  ;;  %v1514_v8 = vmul.f32 1.442695, %v1376_v58  ;;  %1218 = vadd.xlane.f32.xlu0 %v1036_v47 }
 0x2c6   :  { %v1752_v17 = vadd.f32 1.0, %v3080_v18  ;;  %3095 = vpow2.f32 %v1510_v56  ;;  %v1137_v62 = vpop.xlane.xlu1 %1136  ;;  %v1135_v32 = vpop.xlane.xlu0 %1134  ;;  %v4526_v42 = vsel %vm865_vm12, %v4014_v60, 0.0  ;;  %v4532_v24 = vsel %vm879_vm14, %v4349_v9, 0.0 }
 0x2c7   :  { %3097 = vrcp.f32 %v1753_v25  ;;  %v1379_v10 = vsub.f32 0.0, %v1137_v62  ;;  %v2273_v56 = vadd.s32 4294967280, %v3767_v46  ;;  %v1378_v62 = vsub.f32 0.0, %v1135_v32 }
 0x2c8   :  { %v3082_v47 = vpop.eup %3081  ;;  %3099 = vrcp.f32 %v1752_v17  ;;  %v2287_v17 = vadd.s32 4294967264, %v3767_v46  ;;  %v2308_v32 = vadd.s32 4294967240, %v3767_v46  ;;  %vm2285_vm13 = vcmask 261312  }
 0x2c9   :  { %v3084_v53 = vpop.eup %3083  ;;  %v1755_v40 = vadd.f32 1.0, %v3082_v47  ;;  %3101 = vpow2.f32 %v1516_v36  ;;  %v1520_v58 = vmul.f32 1.442695, %v1379_v10  ;;  %1284 = vadd.xlane.f32.xlu1 %v4394_v34  ;;  %v1518_v12 = vmul.f32 1.442695, %v1378_v62  ;;  %1222 = vadd.xlane.f32.xlu0 %v4404_v22 }
 0x2ca   :  { %v1754_v18 = vadd.f32 1.0, %v3084_v53  ;;  %3103 = vpow2.f32 %v1514_v8  ;;  %v1141_v25 = vpop.xlane.xlu1 %1140  ;;  %v1139_v39 = vpop.xlane.xlu0 %1138  ;;  %v2301_v36 = vadd.s32 4294967248, %v3767_v46  ;;  %v2322_v34 = vadd.s32 4294967224, %v3767_v46 }
 0x2cb   :  { %3105 = vrcp.f32 %v1755_v40  ;;  %v1381_v61 = vsub.f32 0.0, %v1141_v25  ;;  %v1380_v10 = vsub.f32 0.0, %v1139_v39  ;;  %v4549_v8 = vsub.s32 %v2273_v56, %v5265_v35 }
 0x2cc   :  { %v3086_v47 = vpop.eup %3085  ;;  %3107 = vrcp.f32 %v1754_v18  ;;  %v4553_v40 = vsub.s32 %v2294_v54, %v5265_v35  ;;  %v4557_v55 = vsub.s32 %v2287_v17, %v5265_v35  ;;  %v4560_v56 = vsub.s32 %v2308_v32, %v5265_v35 }
 0x2cd   :  { %v3088_v53 = vpop.eup %3087  ;;  %v1757_v22 = vadd.f32 1.0, %v3086_v47  ;;  %3109 = vpow2.f32 %v1520_v58  ;;  %v1524_v62 = vmul.f32 1.442695, %v1381_v61  ;;  %1286 = vadd.xlane.f32.xlu1 %v4410_v49  ;;  %v1522_v25 = vmul.f32 1.442695, %v1380_v10  ;;  %1226 = vadd.xlane.f32.xlu0 %v4416_v37 }
 0x2ce   :  { %v1756_v18 = vadd.f32 1.0, %v3088_v53  ;;  %3111 = vpow2.f32 %v1518_v12  ;;  %v1145_v39 = vpop.xlane.xlu1 %1144  ;;  %v1143_v61 = vpop.xlane.xlu0 %1142  ;;  %v4563_v54 = vsub.s32 %v2301_v36, %v5265_v35  ;;  %v4566_v12 = vsub.s32 %v2322_v34, %v5265_v35 }
 0x2cf   :  { %3113 = vrcp.f32 %v1757_v22  ;;  %v1383_v58 = vsub.f32 0.0, %v1145_v39  ;;  %v1382_v47 = vsub.f32 0.0, %v1143_v61  ;;  %vm2292_vm15 = vcmask 326912  }
 0x2d0   :  { %v3090_v49 = vpop.eup %3089  ;;  %3115 = vrcp.f32 %v1756_v18  ;;  %v2315_v17 = vadd.s32 4294967232, %v3767_v46  ;;  %vm2299_vm11 = vcmask 392512   ;;  %v2336_v36 = vadd.s32 4294967208, %v3767_v46 }
 0x2d1   :  { %v3092_v37 = vpop.eup %3091  ;;  %v2265_v10 = vrot.slane %v3090_v49, %v4353_v45  ;;  %3117 = vpow2.f32 %v1524_v62  ;;  %v1528_v32 = vmul.f32 1.442695, %v1383_v58  ;;  %1288 = vadd.xlane.f32.xlu1 %v4422_v28  ;;  %v1526_v34 = vmul.f32 1.442695, %v1382_v47  ;;  %1230 = vadd.xlane.f32.xlu0 %v4428_v41 }
 0x2d2   :  { %v3094_v53 = vpop.eup %3093  ;;  %v2270_v22 = vrot.slane %v3092_v37, %v4535_v0  ;;  %3119 = vpow2.f32 %v1522_v25  ;;  %v1149_v18 = vpop.xlane.xlu1 %1148  ;;  %v2329_v49 = vadd.s32 4294967216, %v3767_v46  ;;  %vm2306_vm12 = vcmask 458112  }
 0x2d3   :  { %v3096_v39 = vpop.eup %3095  ;;  %v1759_v61 = vadd.f32 1.0, %v3094_v53  ;;  %3121 = vpow2.f32 %v1528_v32  ;;  %v1385_v62 = vsub.f32 0.0, %v1149_v18  ;;  %v1147_v58 = vpop.xlane.xlu0 %1146  ;;  %v4578_v41 = vsub.s32 %v2315_v17, %v5265_v35 }
 0x2d4   :  { %v3098_v23 = vpop.eup %3097  ;;  %v2272_v28 = vsel %vm5180_vm7, %v2270_v22, %v2265_v10  ;;  %v1758_v14 = vadd.f32 1.0, %v3096_v39  ;;  %3123 = vpow2.f32 %v1526_v34  ;;  %v1384_v37 = vsub.f32 0.0, %v1147_v58 }
 0x2d5   :  { %v3100_v21 = vpop.eup %3099  ;;  %v2284_v25 = vrot.slane %v3098_v23, %v4539_v2  ;;  %3125 = vrcp.f32 %v1759_v61  ;;  %v1532_v47 = vmul.f32 1.442695, %v1385_v62  ;;  %1290 = vadd.xlane.f32.xlu1 %v4434_v20  ;;  %vm2313_vm14 = vcmask 523712   ;;  %1234 = vadd.xlane.f32.xlu0 %v4440_v57 }
 0x2d6   :  { %v3102_v32 = vpop.eup %3101  ;;  %v2277_v53 = vrot.slane %v3100_v21, %v4549_v8  ;;  %3127 = vrcp.f32 %v1758_v14  ;;  %v4583_v10 = vsub.s32 %v2336_v36, %v5265_v35  ;;  %v1530_v22 = vmul.f32 1.442695, %v1384_v37  ;;  %v1153_v23 = vpop.xlane.xlu1 %1152 }
 0x2d7   :  { %v3104_v34 = vpop.eup %3103  ;;  %v1761_v18 = vadd.f32 1.0, %v3102_v32  ;;  %v4587_v17 = vsub.s32 %v2329_v49, %v5265_v35  ;;  %3129 = vpow2.f32 %v1532_v47  ;;  %v1387_v39 = vsub.f32 0.0, %v1153_v23  ;;  %v1151_v20 = vpop.xlane.xlu0 %1150 }
 0x2d8   :  { %v3106_v61 = vpop.eup %3105  ;;  %v2279_v21 = vsel %vm2278_vm8, %v2277_v53, %v2272_v28  ;;  %v1760_v62 = vadd.f32 1.0, %v3104_v34  ;;  %3131 = vpow2.f32 %v1530_v22  ;;  %v1386_v14 = vsub.f32 0.0, %v1151_v20 }
 0x2d9   :  { %v3108_v36 = vpop.eup %3107  ;;  %v2298_v58 = vrot.slane %v3106_v61, %v4553_v40  ;;  %v2286_v57 = vsel %vm2285_vm13, %v2284_v25, %v2279_v21  ;;  %3133 = vrcp.f32 %v1761_v18  ;;  %v1536_v37 = vmul.f32 1.442695, %v1387_v39  ;;  %1292 = vadd.xlane.f32.xlu1 %v4446_v43  ;;  %1272 = vadd.xlane.f32.xlu0 %v4452_v50 }
 0x2da   :  { %v3110_v49 = vpop.eup %3109  ;;  %v2291_v47 = vrot.slane %v3108_v36, %v4557_v55  ;;  %3135 = vrcp.f32 %v1760_v62  ;;  %v2350_v32 = vadd.s32 4294967192, %v3767_v46  ;;  %v1534_v23 = vmul.f32 1.442695, %v1386_v14  ;;  %v1157_v28 = vpop.xlane.xlu1 %1156 }
 0x2db   :  { %v3112_v53 = vpop.eup %3111  ;;  %vm5177_vm2 = vcmask 589312   ;;  %v1763_v22 = vadd.f32 1.0, %v3110_v49  ;;  %v2343_v34 = vadd.s32 4294967200, %v3767_v46  ;;  %3137 = vpow2.f32 %v1536_v37  ;;  %v1155_v18 = vpop.xlane.xlu0 %1154 }
 0x2dc   :  { %v1389_v25 = vsub.f32 0.0, %v1157_v28  ;;  %v3114_v39 = vpop.eup %3113  ;;  %v2293_v43 = vsel %vm2292_vm15, %v2291_v47, %v2286_v57  ;;  %vm5175_vm3 = vcmask 654912   ;;  %v1762_v20 = vadd.f32 1.0, %v3112_v53 }
 0x2dd   :  { %3139 = vpow2.f32 %v1534_v23  ;;  %v1388_v61 = vsub.f32 0.0, %v1155_v18  ;;  %v3116_v21 = vpop.eup %3115  ;;  %v2312_v62 = vrot.slane %v3114_v39, %v4560_v56  ;;  %v2300_v50 = vsel %vm2299_vm11, %v2298_v58, %v2293_v43  ;;  %1294 = vadd.xlane.f32.xlu1 %v4458_v63  ;;  %1274 = vadd.xlane.f32.xlu0 %v4464_v48 }
 0x2de   :  { %3141 = vrcp.f32 %v1763_v22  ;;  %v1540_v14 = vmul.f32 1.442695, %v1389_v25  ;;  %v3118_v36 = vpop.eup %3117  ;;  %v2305_v37 = vrot.slane %v3116_v21, %v4563_v54  ;;  %v2364_v49 = vadd.s32 4294967176, %v3767_v46  ;;  %v1161_v47 = vpop.xlane.xlu1 %1160 }
 0x2df   :  { %3143 = vrcp.f32 %v1762_v20  ;;  %v1538_v57 = vmul.f32 1.442695, %v1388_v61  ;;  %v3120_v23 = vpop.eup %3119  ;;  %vm5174_vm4 = vcmask 720512   ;;  %v1765_v28 = vadd.f32 1.0, %v3118_v36  ;;  %v1159_v22 = vpop.xlane.xlu0 %1158 }
 0x2e0   :  { %v2357_v53 = vadd.s32 4294967184, %v3767_v46  ;;  %3145 = vpow2.f32 %v1540_v14  ;;  %v1391_v58 = vsub.f32 0.0, %v1161_v47  ;;  %v3122_v25 = vpop.eup %3121  ;;  %v2307_v63 = vsel %vm2306_vm12, %v2305_v37, %v2300_v50 }
 0x2e1   :  { %v1764_v18 = vadd.f32 1.0, %v3120_v23  ;;  %3147 = vpow2.f32 %v1538_v57  ;;  %v1390_v39 = vsub.f32 0.0, %v1159_v22  ;;  %v3124_v43 = vpop.eup %3123  ;;  %v2314_v20 = vsel %vm2313_vm14, %v2312_v62, %v2307_v63  ;;  %1296 = vadd.xlane.f32.xlu1 %v4470_v44  ;;  %1304 = vadd.xlane.f32.xlu0 %v4476_v27 }
 0x2e2   :  { %3149 = vrcp.f32 %v1765_v28  ;;  %v1767_v48 = vadd.f32 1.0, %v3122_v25  ;;  %v1544_v61 = vmul.f32 1.442695, %v1391_v58  ;;  %v3126_v21 = vpop.eup %3125  ;;  %v4609_v36 = vsub.s32 %v2350_v32, %v5265_v35  ;;  %v1165_v50 = vpop.xlane.xlu1 %1164 }
 0x2e3   :  { %3151 = vrcp.f32 %v1764_v18  ;;  %v1766_v14 = vadd.f32 1.0, %v3124_v43  ;;  %v1542_v47 = vmul.f32 1.442695, %v1390_v39  ;;  %v3128_v37 = vpop.eup %3127  ;;  %v2326_v57 = vrot.slane %v3126_v21, %v4566_v12  ;;  %v1163_v28 = vpop.xlane.xlu0 %1162 }
 0x2e4   :  { %v4614_v62 = vsub.s32 %v2343_v34, %v5265_v35  ;;  %3153 = vrcp.f32 %v1767_v48  ;;  %v1393_v23 = vsub.f32 0.0, %v1165_v50  ;;  %v3130_v44 = vpop.eup %3129  ;;  %v2319_v58 = vrot.slane %v3128_v37, %v4578_v41 }
 0x2e5   :  { %v4618_v32 = vsub.s32 %v2364_v49, %v5265_v35  ;;  %3155 = vrcp.f32 %v1766_v14  ;;  %v1392_v22 = vsub.f32 0.0, %v1163_v28  ;;  %v3132_v25 = vpop.eup %3131  ;;  %v4621_v27 = vsub.s32 %v2357_v53, %v5265_v35  ;;  %1298 = vadd.xlane.f32.xlu1 %v4482_v3  ;;  %1276 = vadd.xlane.f32.xlu0 %v4488_v11 }
 0x2e6   :  { %v1769_v63 = vadd.f32 1.0, %v3130_v44  ;;  %3157 = vpow2.f32 %v1544_v61  ;;  %v1548_v18 = vmul.f32 1.442695, %v1393_v23  ;;  %v3134_v34 = vpop.eup %3133  ;;  %vm866_vm5 = vcmp.eq.s32.totalorder %v4104_v5, %v3767_v46  ;;  %v1169_v48 = vpop.xlane.xlu1 %1168 }
 0x2e7   :  { %v2321_v39 = vsel %vm5177_vm2, %v2319_v58, %v2314_v20  ;;  %v1768_v43 = vadd.f32 1.0, %v3132_v25  ;;  %3159 = vpow2.f32 %v1542_v47  ;;  %v1546_v49 = vmul.f32 1.442695, %v1392_v22  ;;  %v3136_v21 = vpop.eup %3135  ;;  %v1167_v3 = vpop.xlane.xlu0 %1166 }
 0x2e8   :  { %v2340_v35 = vrot.slane %v3134_v34, %v4583_v10  ;;  %v2328_v53 = vsel %vm5175_vm3, %v2326_v57, %v2321_v39  ;;  %3161 = vrcp.f32 %v1769_v63  ;;  %v1395_v61 = vsub.f32 0.0, %v1169_v48  ;;  %v3138_v14 = vpop.eup %3137 }
 0x2e9   :  { %v2333_v50 = vrot.slane %v3136_v21, %v4587_v17  ;;  %3163 = vrcp.f32 %v1768_v43  ;;  %v1394_v37 = vsub.f32 0.0, %v1167_v3  ;;  %vm5176_vm6 = vcmask 786112   ;;  %1330 = vadd.xlane.f32.xlu1 %v4494_v15  ;;  %1308 = vadd.xlane.f32.xlu0 %v4500_v29 }
 0x2ea   :  { %v3140_v20 = vpop.eup %3139  ;;  %v1771_v47 = vadd.f32 1.0, %v3138_v14  ;;  %3165 = vpow2.f32 %v1548_v18  ;;  %v1552_v23 = vmul.f32 1.442695, %v1395_v61  ;;  %vm5178_vm0 = vcmask 851712   ;;  %v1173_v58 = vpop.xlane.xlu1 %1172 }
 0x2eb   :  { %v3142_v11 = vpop.eup %3141  ;;  %vm880_vm10 = vcmp.eq.s32.totalorder %v4202_v13, %v3767_v46  ;;  %v2335_v57 = vsel %vm5174_vm4, %v2333_v50, %v2328_v53  ;;  %v1770_v28 = vadd.f32 1.0, %v3140_v20  ;;  %3167 = vpow2.f32 %v1546_v49  ;;  %v1171_v63 = vpop.xlane.xlu0 %1170 }
 0x2ec   :  { %v1550_v44 = vmul.f32 1.442695, %v1394_v37  ;;  %v3144_v22 = vpop.eup %3143  ;;  %vm867_vm9 = vcmp.eq.s32.totalorder %v4108_v52, %v3767_v46  ;;  %v2354_v25 = vrot.slane %v3142_v11, %v4609_v36  ;;  %3169 = vrcp.f32 %v1771_v47 }
 0x2ed   :  { %v1397_v15 = vsub.f32 0.0, %v1173_v58  ;;  %v2342_v18 = vsel %vm5176_vm6, %v2340_v35, %v2335_v57  ;;  %v3146_v34 = vpop.eup %3145  ;;  %vm881_vm1 = vcmp.eq.s32.totalorder %v4208_v1, %v3767_v46  ;;  %v2347_v39 = vrot.slane %v3144_v22, %v4614_v62  ;;  %1336 = vadd.xlane.f32.xlu1 %v4506_v26  ;;  %1310 = vadd.xlane.f32.xlu0 %v4513_v33 }
 0x2ee   :  { %3171 = vrcp.f32 %v1770_v28  ;;  %v1396_v29 = vsub.f32 0.0, %v1171_v63  ;;  %vm5179_vm4 = vcmask 917312   ;;  %v3148_v43 = vpop.eup %3147  ;;  %v1773_v49 = vadd.f32 1.0, %v3146_v34  ;;  %v1177_v61 = vpop.xlane.xlu1 %1176 }
 0x2ef   :  { %3173 = vpow2.f32 %v1552_v23  ;;  %v1556_v48 = vmul.f32 1.442695, %v1397_v15  ;;  %vm2362_vm3 = vcmask 982912   ;;  %v3150_v21 = vpop.eup %3149  ;;  %v1772_v53 = vadd.f32 1.0, %v3148_v43  ;;  %v1175_v20 = vpop.xlane.xlu0 %1174 }
 0x2f0   :  { %3175 = vpow2.f32 %v1550_v44  ;;  %v1554_v35 = vmul.f32 1.442695, %v1396_v29  ;;  %v2349_v3 = vsel %vm5178_vm0, %v2347_v39, %v2342_v18  ;;  %v3152_v14 = vpop.eup %3151  ;;  %vm868_vm6 = vcmp.eq.s32.totalorder %v4118_v4, %v3767_v46 }
 0x2f1   :  { %v2368_v50 = vrot.slane %v3150_v21, %v4618_v32  ;;  %3177 = vrcp.f32 %v1773_v49  ;;  %v1399_v37 = vsub.f32 0.0, %v1177_v61  ;;  %v2356_v26 = vsel %vm5179_vm4, %v2354_v25, %v2349_v3  ;;  %v3154_v47 = vpop.eup %3153  ;;  %1338 = vadd.xlane.f32.xlu1 %v4520_v19  ;;  %1312 = vadd.xlane.f32.xlu0 %v4526_v42 }
 0x2f2   :  { %vm882_vm2 = vcmp.eq.s32.totalorder %v4217_v30, %v3767_v46  ;;  %v2361_v33 = vrot.slane %v3152_v14, %v4621_v27  ;;  %3179 = vrcp.f32 %v1772_v53  ;;  %v1398_v23 = vsub.f32 0.0, %v1175_v20  ;;  %v3156_v11 = vpop.eup %3155  ;;  %v1181_v15 = vpop.xlane.xlu1 %1180  ;;  %v5277_v30 = vld [vmem:[#allocation23_spill] sm:$0xff] }
 0x2f3   :  { %vm2369_vm0 = vcmask 1048512   ;;  %v2378_v57 = vrot.slane %v3154_v47, %v4535_v0  ;;  %3181 = vpow2.f32 %v1556_v48  ;;  %v1560_v28 = vmul.f32 1.442695, %v1399_v37  ;;  %v3158_v58 = vpop.eup %3157  ;;  %v1179_v39 = vpop.xlane.xlu0 %1178 }
 0x2f4   :  { %v1084_v44 = vsel %vm866_vm5, %v4014_v60, 0.0  ;;  %v2374_v22 = vrot.slane %v3156_v11, %v4353_v45  ;;  %3183 = vpow2.f32 %v1554_v35  ;;  %v1558_v25 = vmul.f32 1.442695, %v1398_v23  ;;  %v3160_v18 = vpop.eup %3159 }
 0x2f5   :  { %v2363_v63 = vsel %vm2362_vm3, %v2361_v33, %v2356_v26  ;;  %vm869_vm4 = vcmp.eq.s32.totalorder %v4121_v51, %v3767_v46  ;;  %v1775_v19 = vadd.f32 1.0, %v3158_v58  ;;  %3185 = vpow2.f32 %v1560_v28  ;;  %v3162_v29 = vpop.eup %3161  ;;  %1340 = vadd.xlane.f32.xlu1 %v4532_v24  ;;  %1314 = vadd.xlane.f32.xlu0 %v1084_v44  ;;  %v5278_v51 = vld [vmem:[#allocation51_spill] sm:$0xff] }
 0x2f6   :  { %v1401_v34 = vsub.f32 0.0, %v1181_v15  ;;  %v4665_v5 = vsel %vm2369_vm0, %v2368_v50, %v2363_v63  ;;  %vm883_vm5 = vcmp.eq.s32.totalorder %v4221_v31, %v3767_v46  ;;  %v2379_v42 = vsel %vm5180_vm7, %v2378_v57, %v2374_v22  ;;  %v3164_v48 = vpop.eup %3163  ;;  %v1185_v50 = vpop.xlane.xlu1 %1184  ;;  %v5279_v31 = vld [vmem:[#allocation35_spill] sm:$0xff] }
 0x2f7   :  { %v1774_v43 = vadd.f32 1.0, %v3160_v18  ;;  %3187 = vpow2.f32 %v1558_v25  ;;  %v1400_v49 = vsub.f32 0.0, %v1179_v39  ;;  %v2388_v21 = vrot.slane %v3162_v29, %v4539_v2  ;;  %v3166_v61 = vpop.eup %3165  ;;  %v1183_v26 = vpop.xlane.xlu0 %1182 }
 0x2f8   :  { %3189 = vrcp.f32 %v1775_v19  ;;  %v1564_v53 = vmul.f32 1.442695, %v1401_v34  ;;  %v1098_v35 = vsel %vm880_vm10, %v4349_v9, 0.0  ;;  %v2383_v3 = vrot.slane %v3164_v48, %v4549_v8  ;;  %v3168_v20 = vpop.eup %3167 }
 0x2f9   :  { %3191 = vrcp.f32 %v1774_v43  ;;  %v1562_v14 = vmul.f32 1.442695, %v1400_v49  ;;  %v1085_v37 = vsel %vm867_vm9, %v4014_v60, 0.0  ;;  %vm870_vm7 = vcmp.eq.s32.totalorder %v4130_v7, %v3767_v46  ;;  %v3170_v33 = vpop.eup %3169  ;;  %1342 = vadd.xlane.f32.xlu1 %v1098_v35 }
 0x2fa   :  { %v1777_v24 = vadd.f32 1.0, %v3166_v61  ;;  %3193 = vpow2.f32 %v1564_v53  ;;  %v1403_v13 = vsub.f32 0.0, %v1185_v50  ;;  %v1099_v47 = vsel %vm881_vm1, %v4349_v9, 0.0  ;;  %1316 = vadd.xlane.f32.xlu0 %v1085_v37  ;;  %v1189_v15 = vpop.xlane.xlu1 %1188 }
 0x2fb   :  { %vm884_vm10 = vcmp.eq.s32.totalorder %v4231_v16, %v3767_v46  ;;  %v2384_v52 = vsel %vm2278_vm8, %v2383_v3, %v2379_v42  ;;  %v1776_v23 = vadd.f32 1.0, %v3168_v20  ;;  %3195 = vpow2.f32 %v1562_v14  ;;  %v3172_v57 = vpop.eup %3171  ;;  %v1187_v39 = vpop.xlane.xlu0 %1186 }
 0x2fc   :  { %v1402_v11 = vsub.f32 0.0, %v1183_v26  ;;  %vm871_vm9 = vcmp.eq.s32.totalorder %v4134_v6, %v3767_v46  ;;  %v2398_v28 = vrot.slane %v3170_v33, %v4553_v40  ;;  %v2389_v44 = vsel %vm2285_vm13, %v2388_v21, %v2384_v52  ;;  %v3174_v58 = vpop.eup %3173 }
 0x2fd   :  { %3197 = vrcp.f32 %v1777_v24  ;;  %v1568_v1 = vmul.f32 1.442695, %v1403_v13  ;;  %vm885_vm1 = vcmp.eq.s32.totalorder %v4234_v38, %v3767_v46  ;;  %v2393_v22 = vrot.slane %v3172_v57, %v4557_v55  ;;  %v3176_v18 = vpop.eup %3175  ;;  %1344 = vadd.xlane.f32.xlu1 %v1099_v47 }
 0x2fe   :  { %3199 = vrcp.f32 %v1776_v23  ;;  %v1566_v25 = vmul.f32 1.442695, %v1402_v11  ;;  %v1086_v63 = vsel %vm868_vm6, %v4014_v60, 0.0  ;;  %v1779_v19 = vadd.f32 1.0, %v3174_v58  ;;  %v3178_v42 = vpop.eup %3177  ;;  %v1193_v50 = vpop.xlane.xlu1 %1192 }
 0x2ff   :  { %3201 = vpow2.f32 %v1568_v1  ;;  %v1405_v34 = vsub.f32 0.0, %v1189_v15  ;;  %v1100_v29 = vsel %vm882_vm2, %v4349_v9, 0.0  ;;  %v2394_v43 = vsel %vm2292_vm15, %v2393_v22, %v2389_v44  ;;  %v3180_v21 = vpop.eup %3179  ;;  %1318 = vadd.xlane.f32.xlu0 %v1086_v63  ;;  %v1191_v26 = vpop.xlane.xlu0 %1190 }
 0x300   :  { %v1778_v49 = vadd.f32 1.0, %v3176_v18  ;;  %3203 = vpow2.f32 %v1566_v25  ;;  %v1404_v48 = vsub.f32 0.0, %v1187_v39  ;;  %vm872_vm6 = vcmp.eq.s32.totalorder %v4144_v59, %v3767_v46  ;;  %v3182_v61 = vpop.eup %3181 }
 0x301   :  { %v2408_v4 = vrot.slane %v3178_v42, %v4560_v56  ;;  %v2399_v53 = vsel %vm2299_vm11, %v2398_v28, %v2394_v43  ;;  %3205 = vrcp.f32 %v1779_v19  ;;  %v1572_v35 = vmul.f32 1.442695, %v1405_v34  ;;  %v3184_v20 = vpop.eup %3183  ;;  %1346 = vadd.xlane.f32.xlu1 %v1100_v29 }
 0x302   :  { %vm886_vm2 = vcmp.eq.s32.totalorder %v5277_v30, %v3767_v46  ;;  %v2403_v3 = vrot.slane %v3180_v21, %v4563_v54  ;;  %3207 = vrcp.f32 %v1778_v49  ;;  %v1570_v14 = vmul.f32 1.442695, %v1404_v48  ;;  %v3186_v33 = vpop.eup %3185  ;;  %v1197_v15 = vpop.xlane.xlu1 %1196  ;;  %v5280_v21 = vld [vmem:[#allocation49_spill] sm:$0xff] }
 0x303   :  { %v1087_v37 = vsel %vm869_vm4, %v4014_v60, 0.0  ;;  %v1781_v24 = vadd.f32 1.0, %v3182_v61  ;;  %3209 = vpow2.f32 %v1572_v35  ;;  %v1407_v13 = vsub.f32 0.0, %v1193_v50  ;;  %v1195_v39 = vpop.xlane.xlu0 %1194 }
 0x304   :  { %v1101_v47 = vsel %vm883_vm5, %v4349_v9, 0.0  ;;  %v2404_v52 = vsel %vm2306_vm12, %v2403_v3, %v2399_v53  ;;  %v1780_v23 = vadd.f32 1.0, %v3184_v20  ;;  %3211 = vpow2.f32 %v1570_v14  ;;  %v3188_v57 = vpop.eup %3187  ;;  %1320 = vadd.xlane.f32.xlu0 %v1087_v37 }
 0x305   :  { %v1406_v11 = vsub.f32 0.0, %v1191_v26  ;;  %vm876_vm4 = vcmp.eq.s32.totalorder %v5278_v51, %v3767_v46  ;;  %v2409_v28 = vsel %vm2313_vm14, %v2408_v4, %v2404_v52  ;;  %3213 = vrcp.f32 %v1781_v24  ;;  %v3190_v58 = vpop.eup %3189  ;;  %1348 = vadd.xlane.f32.xlu1 %v1101_v47 }
 0x306   :  { %v1783_v44 = vadd.f32 1.0, %v3186_v33  ;;  %v1576_v1 = vmul.f32 1.442695, %v1407_v13  ;;  %vm887_vm5 = vcmp.eq.s32.totalorder %v5279_v31, %v3767_v46  ;;  %3215 = vrcp.f32 %v1780_v23  ;;  %v3192_v18 = vpop.eup %3191  ;;  %v1201_v14 = vpop.xlane.xlu1 %1200 }
 0x307   :  { %v1782_v22 = vadd.f32 1.0, %v3188_v57  ;;  %v1574_v25 = vmul.f32 1.442695, %v1406_v11  ;;  %v1088_v63 = vsel %vm870_vm7, %v4014_v60, 0.0  ;;  %v2418_v19 = vrot.slane %v3190_v58, %v4566_v12  ;;  %v3194_v42 = vpop.eup %3193  ;;  %v1199_v13 = vpop.xlane.xlu0 %1198 }
 0x308   :  { %3217 = vrcp.f32 %v1783_v44  ;;  %v1409_v34 = vsub.f32 0.0, %v1197_v15  ;;  %v1102_v29 = vsel %vm884_vm10, %v4349_v9, 0.0  ;;  %v2413_v43 = vrot.slane %v3192_v18, %v4578_v41  ;;  %v3196_v48 = vpop.eup %3195  ;;  %1322 = vadd.xlane.f32.xlu0 %v1088_v63 }
 0x309   :  { %3219 = vrcp.f32 %v1782_v22  ;;  %v1408_v49 = vsub.f32 0.0, %v1195_v39  ;;  %v1089_v7 = vsel %vm871_vm9, %v4014_v60, 0.0  ;;  %vm873_vm7 = vcmp.eq.s32.totalorder %v5280_v21, %v3767_v46  ;;  %1350 = vadd.xlane.f32.xlu1 %v1102_v29  ;;  %v5291_v21 = vld [vmem:[#allocation18_spill] sm:$0xff] }
 0x30a   :  { %v1785_v4 = vadd.f32 1.0, %v3194_v42  ;;  %3221 = vpow2.f32 %v1576_v1  ;;  %v1580_v53 = vmul.f32 1.442695, %v1409_v34  ;;  %v1103_v16 = vsel %vm885_vm1, %v4349_v9, 0.0  ;;  %v3198_v35 = vpop.eup %3197  ;;  %v1205_v22 = vpop.xlane.xlu1 %1204  ;;  %v5286_v34 = vld [vmem:[#allocation48_spill] sm:$0xff] }
 0x30b   :  { %vm5281_vm10 = vcmask 589312   ;;  %v1784_v3 = vadd.f32 1.0, %v3196_v48  ;;  %3223 = vpow2.f32 %v1574_v25  ;;  %v1578_v6 = vmul.f32 1.442695, %v1408_v49  ;;  %v3200_v50 = vpop.eup %3199  ;;  %v5284_v25 = vld [vmem:[#allocation25_spill] sm:$0xff]  ;;  %v1203_v18 = vpop.xlane.xlu0 %1202 }
 0x30c   :  { %v2414_v61 = vsel %vm5281_vm10, %v2413_v43, %v2409_v28  ;;  %v2428_v37 = vrot.slane %v3198_v35, %v4583_v10  ;;  %vm5282_vm9 = vcmask 654912   ;;  %3225 = vrcp.f32 %v1785_v4  ;;  %v3202_v26 = vpop.eup %3201  ;;  %1324 = vadd.xlane.f32.xlu0 %v1089_v7 }
 0x30d   :  { %v2419_v20 = vsel %vm5282_vm9, %v2418_v19, %v2414_v61  ;;  %v1411_v24 = vsub.f32 0.0, %v1201_v14  ;;  %v2423_v38 = vrot.slane %v3200_v50, %v4587_v17  ;;  %3227 = vrcp.f32 %v1784_v3  ;;  %v3204_v52 = vpop.eup %3203  ;;  %1352 = vadd.xlane.f32.xlu1 %v1103_v16 }
 0x30e   :  { %v1410_v47 = vsub.f32 0.0, %v1199_v13  ;;  %v1090_v33 = vsel %vm872_vm6, %v4014_v60, 0.0  ;;  %v1787_v23 = vadd.f32 1.0, %v3202_v26  ;;  %3229 = vpow2.f32 %v1580_v53  ;;  %v3206_v28 = vpop.eup %3205  ;;  %v1241_v61 = vpop.xlane.xlu1 %1240 }
 0x30f   :  { %v1584_v11 = vmul.f32 1.442695, %v1411_v24  ;;  %v1104_v57 = vsel %vm886_vm2, %v4349_v9, 0.0  ;;  %vm5283_vm1 = vcmask 720512   ;;  %v1786_v1 = vadd.f32 1.0, %v3204_v52  ;;  %v3208_v59 = vpop.eup %3207  ;;  %v1239_v50 = vpop.xlane.xlu0 %1238 }
 0x310   :  { %v2424_v44 = vsel %vm5283_vm1, %v2423_v38, %v2419_v20  ;;  %3231 = vpow2.f32 %v1578_v6  ;;  %v1582_v58 = vmul.f32 1.442695, %v1410_v47  ;;  %vm888_vm6 = vcmp.eq.s32.totalorder %v5284_v25, %v3767_v46  ;;  %v3210_v19 = vpop.eup %3209  ;;  %1326 = vadd.xlane.f32.xlu0 %v1090_v33  ;;  %v5288_v6 = vld [vmem:[#allocation50_spill] sm:$0xff]  ;;  %v5290_v20 = vld [vmem:[#allocation27_spill] sm:$0xff] }
 0x311   :  { %v2438_v15 = vrot.slane %v3206_v28, %v4609_v36  ;;  %3233 = vrcp.f32 %v1787_v23  ;;  %v1413_v63 = vsub.f32 0.0, %v1205_v22  ;;  %vm5285_vm10 = vcmask 786112   ;;  %v3212_v43 = vpop.eup %3211  ;;  %1354 = vadd.xlane.f32.xlu1 %v1104_v57 }
 0x312   :  { %v2429_v30 = vsel %vm5285_vm10, %v2428_v37, %v2424_v44  ;;  %vm859_vm2 = vcmp.eq.s32.totalorder %v5286_v34, %v3767_v46  ;;  %v2433_v39 = vrot.slane %v3208_v59, %v4614_v62  ;;  %3235 = vrcp.f32 %v1786_v1  ;;  %v3214_v4 = vpop.eup %3213  ;;  %v1245_v28 = vpop.xlane.xlu1 %1244 }
 0x313   :  { %v1412_v29 = vsub.f32 0.0, %v1203_v18  ;;  %v1094_v42 = vsel %vm876_vm4, %v4349_v9, 0.0  ;;  %v1789_v49 = vadd.f32 1.0, %v3210_v19  ;;  %3237 = vpow2.f32 %v1584_v11  ;;  %v3216_v51 = vpop.eup %3215  ;;  %v1243_v59 = vpop.xlane.xlu0 %1242 }
 0x314   :  { %v1588_v7 = vmul.f32 1.442695, %v1413_v63  ;;  %v1105_v48 = vsel %vm887_vm5, %v4349_v9, 0.0  ;;  %v1788_v53 = vadd.f32 1.0, %v3212_v43  ;;  %3239 = vpow2.f32 %v1582_v58  ;;  %1334 = vadd.xlane.f32.xlu0 %v1094_v42  ;;  %v5292_v63 = vld [vmem:[#allocation37_spill] sm:$0xff] }
 0x315   :  { %v1586_v35 = vmul.f32 1.442695, %v1412_v29  ;;  %vm5287_vm9 = vcmask 851712   ;;  %vm875_vm4 = vcmp.eq.s32.totalorder %v5288_v6, %v3767_v46  ;;  %v2448_v14 = vrot.slane %v3214_v4, %v4618_v32  ;;  %v3218_v37 = vpop.eup %3217  ;;  %1356 = vadd.xlane.f32.xlu1 %v1105_v48 }
 0x316   :  { %v2434_v3 = vsel %vm5287_vm9, %v2433_v39, %v2429_v30  ;;  %3241 = vrcp.f32 %v1789_v49  ;;  %v1431_v16 = vsub.f32 0.0, %v1241_v61  ;;  %vm5289_vm1 = vcmask 917312   ;;  %v3220_v38 = vpop.eup %3219 }
 0x317   :  { %v2439_v31 = vsel %vm5289_vm1, %v2438_v15, %v2434_v3  ;;  %vm889_vm5 = vcmp.eq.s32.totalorder %v5290_v20, %v3767_v46  ;;  %v2443_v24 = vrot.slane %v3216_v51, %v4621_v27  ;;  %3243 = vrcp.f32 %v1788_v53  ;;  %v3222_v52 = vpop.eup %3221  ;;  %v1247_v53 = vpop.xlane.xlu1 %1246 }
 0x318   :  { %v1430_v13 = vsub.f32 0.0, %v1239_v50  ;;  %v1091_v26 = vsel %vm873_vm7, %v4014_v60, 0.0  ;;  %v2457_v47 = vrot.slane %v3218_v37, %v4535_v0  ;;  %3245 = vpow2.f32 %v1588_v7  ;;  %v3224_v1 = vpop.eup %3223  ;;  %v1249_v51 = vpop.xlane.xlu0 %1248 }
 0x319   :  { %v1624_v33 = vmul.f32 1.442695, %v1431_v16  ;;  %vm2924_vm10 = vcmask 1041409   ;;  %v2453_v23 = vrot.slane %v3220_v38, %v4353_v45  ;;  %3247 = vpow2.f32 %v1586_v35  ;;  %v3226_v15 = vpop.eup %3225  ;;  %1328 = vadd.xlane.f32.xlu0 %v1091_v26 }
 0x31a   :  { %v1622_v11 = vmul.f32 1.442695, %v1430_v13  ;;  %v2444_v44 = vsel %vm2362_vm3, %v2443_v24, %v2439_v31  ;;  %vm891_vm7 = vcmp.eq.s32.totalorder %v5291_v21, %v3767_v46  ;;  %v1791_v58 = vadd.f32 1.0, %v3222_v52  ;;  %v3228_v39 = vpop.eup %3227 }
 0x31b   :  { %3249 = vpow2.f32 %v1624_v33  ;;  %v1433_v22 = vsub.f32 0.0, %v1245_v28  ;;  %v2449_v57 = vsel %vm2369_vm0, %v2448_v14, %v2444_v44  ;;  %vm890_vm9 = vcmp.eq.s32.totalorder %v5292_v63, %v3767_v46  ;;  %v3230_v49 = vpop.eup %3229  ;;  %v5294_v14 = vld [vmem:[#allocation29_spill] sm:$0xff]  ;;  %v1209_v33 = vpop.xlane.xlu1 %1208 }
 0x31c   :  { %vm5293_vm1 = vcmask 130112   ;;  %v1790_v30 = vadd.f32 1.0, %v3224_v1  ;;  %3251 = vpow2.f32 %v1622_v11  ;;  %v1432_v19 = vsub.f32 0.0, %v1243_v59  ;;  %v1251_v44 = vpop.xlane.xlu0 %1250 }
 0x31d   :  { %v2458_v18 = vsel %vm5293_vm1, %v2457_v47, %v2453_v23  ;;  %v2467_v29 = vrot.slane %v3226_v15, %v4539_v2  ;;  %3253 = vrcp.f32 %v1791_v58  ;;  %v1628_v42 = vmul.f32 1.442695, %v1433_v22  ;;  %v3232_v61 = vpop.eup %3231 }
 0x31e   :  { %v4799_v43 = vsel %vm2924_vm10, %v2449_v57, %v4665_v5  ;;  %v2462_v7 = vrot.slane %v3228_v39, %v4549_v8  ;;  %3255 = vrcp.f32 %v1790_v30  ;;  %v1626_v4 = vmul.f32 1.442695, %v1432_v19  ;;  %v3234_v16 = vpop.eup %3233 }
 0x31f   :  { %v1106_v35 = vsel %vm888_vm6, %v4349_v9, 0.0  ;;  %v1793_v3 = vadd.f32 1.0, %v3230_v49  ;;  %3257 = vpow2.f32 %v1628_v42  ;;  %v1434_v48 = vsub.f32 0.0, %v1247_v53  ;;  %v3236_v24 = vpop.eup %3235  ;;  %v1213_v39 = vpop.xlane.xlu1 %1212 }
 0x320   :  { %v1077_v5 = vsel %vm859_vm2, %v5294_v14, 0.0  ;;  %v2463_v50 = vsel %vm2278_vm8, %v2462_v7, %v2458_v18  ;;  %v1792_v31 = vadd.f32 1.0, %v3232_v61  ;;  %3259 = vpow2.f32 %v1626_v4  ;;  %1358 = vadd.xlane.f32.xlu1 %v1106_v35  ;;  %v3238_v38 = vpop.eup %3237  ;;  %v1253_v4 = vpop.xlane.xlu0 %1252 }
 0x321   :  { %v1435_v37 = vsub.f32 0.0, %v1249_v51  ;;  %v2477_v25 = vrot.slane %v3234_v16, %v4553_v40  ;;  %v2468_v13 = vsel %vm2285_vm13, %v2467_v29, %v2463_v50  ;;  %3261 = vrcp.f32 %v1793_v3  ;;  %1300 = vadd.xlane.f32.xlu0 %v1077_v5  ;;  %v3240_v23 = vpop.eup %3239 }
 0x322   :  { %v1630_v26 = vmul.f32 1.442695, %v1434_v48  ;;  %v2472_v47 = vrot.slane %v3236_v24, %v4557_v55  ;;  %3263 = vrcp.f32 %v1792_v31  ;;  %v1093_v52 = vsel %vm875_vm4, %v4014_v60, 0.0 }
 0x323   :  { %v1632_v34 = vmul.f32 1.442695, %v1435_v37  ;;  %v1795_v11 = vadd.f32 1.0, %v3238_v38  ;;  %v1415_v28 = vsub.f32 0.0, %v1209_v33  ;;  %v1107_v1 = vsel %vm889_vm5, %v4349_v9, 0.0  ;;  %v3242_v58 = vpop.eup %3241  ;;  %v1217_v46 = vpop.xlane.xlu1 %1216 }
 0x324   :  { %3265 = vpow2.f32 %v1630_v26  ;;  %v2473_v22 = vsel %vm2292_vm15, %v2472_v47, %v2468_v13  ;;  %v1794_v59 = vadd.f32 1.0, %v3240_v23  ;;  %v1436_v57 = vsub.f32 0.0, %v1251_v44  ;;  %v3244_v15 = vpop.eup %3243  ;;  %1332 = vadd.xlane.f32.xlu1 %v1093_v52  ;;  %v1255_v24 = vpop.xlane.xlu0 %1254 }
 0x325   :  { %3267 = vpow2.f32 %v1632_v34  ;;  %v2487_v6 = vrot.slane %v3242_v58, %v4560_v56  ;;  %v2478_v60 = vsel %vm2299_vm11, %v2477_v25, %v2473_v22  ;;  %v1592_v18 = vmul.f32 1.442695, %v1415_v28  ;;  %v3246_v30 = vpop.eup %3245  ;;  %1360 = vadd.xlane.f32.xlu0 %v1107_v1 }
 0x326   :  { %3269 = vrcp.f32 %v1795_v11  ;;  %v2482_v19 = vrot.slane %v3244_v15, %v4563_v54  ;;  %v1634_v20 = vmul.f32 1.442695, %v1436_v57  ;;  %v1109_v29 = vsel %vm891_vm7, %v4349_v9, 0.0  ;;  %v3248_v42 = vpop.eup %3247 }
 0x327   :  { %3271 = vrcp.f32 %v1794_v59  ;;  %v1797_v49 = vadd.f32 1.0, %v3246_v30  ;;  %v1417_v7 = vsub.f32 0.0, %v1213_v39  ;;  %v1108_v53 = vsel %vm890_vm9, %v4349_v9, 0.0  ;;  %v1221_v28 = vpop.xlane.xlu1 %1220 }
 0x328   :  { %3273 = vpow2.f32 %v1592_v18  ;;  %v3250_v35 = vpop.eup %3249  ;;  %v2483_v61 = vsel %vm2306_vm12, %v2482_v19, %v2478_v60  ;;  %v1796_v3 = vadd.f32 1.0, %v3248_v42  ;;  %v1437_v48 = vsub.f32 0.0, %v1253_v4  ;;  %1364 = vadd.xlane.f32.xlu1 %v1109_v29  ;;  %v1257_v59 = vpop.xlane.xlu0 %1256 }
 0x329   :  { %3275 = vpow2.f32 %v1634_v20  ;;  %v3252_v51 = vpop.eup %3251  ;;  %v2488_v21 = vsel %vm2313_vm14, %v2487_v6, %v2483_v61  ;;  %v1815_v14 = vadd.f32 1.0, %v3250_v35  ;;  %v1596_v5 = vmul.f32 1.442695, %v1417_v7  ;;  %1362 = vadd.xlane.f32.xlu0 %v1108_v53 }
 0x32a   :  { %3277 = vrcp.f32 %v1797_v49  ;;  %v3254_v16 = vpop.eup %3253  ;;  %v1814_v50 = vadd.f32 1.0, %v3252_v51  ;;  %v1636_v31 = vmul.f32 1.442695, %v1437_v48  ;;  %v1419_v37 = vsub.f32 0.0, %v1217_v46 }
 0x32b   :  { %3279 = vrcp.f32 %v1796_v3  ;;  %v3256_v9 = vpop.eup %3255  ;;  %v2497_v63 = vrot.slane %v3254_v16, %v4566_v12  ;;  %v1438_v26 = vsub.f32 0.0, %v1255_v24  ;;  %vm5295_vm6 = vcmask 589312   ;;  %v1225_v42 = vpop.xlane.xlu1 %1224 }
 0x32c   :  { %3281 = vrcp.f32 %v1815_v14  ;;  %v3258_v25 = vpop.eup %3257  ;;  %v2492_v13 = vrot.slane %v3256_v9, %v4578_v41  ;;  %v1600_v34 = vmul.f32 1.442695, %v1419_v37  ;;  %vm5296_vm2 = vcmask 654912   ;;  %v1259_v53 = vpop.xlane.xlu0 %1258 }
 0x32d   :  { %3283 = vrcp.f32 %v1814_v50  ;;  %v3260_v38 = vpop.eup %3259  ;;  %v1817_v47 = vadd.f32 1.0, %v3258_v25  ;;  %v1638_v11 = vmul.f32 1.442695, %v1438_v26  ;;  %v1421_v22 = vsub.f32 0.0, %v1221_v28 }
 0x32e   :  { %3285 = vpow2.f32 %v1596_v5  ;;  %v3262_v33 = vpop.eup %3261  ;;  %v2493_v52 = vsel %vm5295_vm6, %v2492_v13, %v2488_v21  ;;  %v1816_v23 = vadd.f32 1.0, %v3260_v38  ;;  %v1439_v6 = vsub.f32 0.0, %v1257_v59 }
 0x32f   :  { %3287 = vpow2.f32 %v1636_v31  ;;  %v3264_v44 = vpop.eup %3263  ;;  %v2507_v1 = vrot.slane %v3262_v33, %v4583_v10  ;;  %v2498_v58 = vsel %vm5296_vm2, %v2497_v63, %v2493_v52  ;;  %v1604_v30 = vmul.f32 1.442695, %v1421_v22  ;;  %v1229_v16 = vpop.xlane.xlu1 %1228 }
 0x330   :  { %3289 = vrcp.f32 %v1817_v47  ;;  %v2502_v15 = vrot.slane %v3264_v44, %v4587_v17  ;;  %vm5297_vm4 = vcmask 720512   ;;  %v1640_v29 = vmul.f32 1.442695, %v1439_v6  ;;  %v1261_v37 = vpop.xlane.xlu0 %1260 }
 0x331   :  { %v3266_v57 = vpop.eup %3265  ;;  %3291 = vrcp.f32 %v1816_v23  ;;  %v1423_v4 = vsub.f32 0.0, %v1225_v42  ;;  %vm5298_vm5 = vcmask 786112   ;;  %v1440_v48 = vsub.f32 0.0, %v1259_v53 }
 0x332   :  { %v3268_v60 = vpop.eup %3267  ;;  %v1818_v18 = vadd.f32 1.0, %v3266_v57  ;;  %3293 = vpow2.f32 %v1600_v34  ;;  %v2503_v20 = vsel %vm5297_vm4, %v2502_v15, %v2498_v58  ;;  %vm5299_vm10 = vcmask 851712  }
 0x333   :  { %v3270_v19 = vpop.eup %3269  ;;  %v1819_v39 = vadd.f32 1.0, %v3268_v60  ;;  %3295 = vpow2.f32 %v1638_v11  ;;  %v2508_v35 = vsel %vm5298_vm5, %v2507_v1, %v2503_v20  ;;  %v1642_v5 = vmul.f32 1.442695, %v1440_v48  ;;  %v1233_v11 = vpop.xlane.xlu1 %1232 }
 0x334   :  { %v3272_v49 = vpop.eup %3271  ;;  %v2517_v7 = vrot.slane %v3270_v19, %v4609_v36  ;;  %3297 = vrcp.f32 %v1818_v18  ;;  %v1608_v9 = vmul.f32 1.442695, %v1423_v4  ;;  %v1425_v63 = vsub.f32 0.0, %v1229_v16  ;;  %v1263_v58 = vpop.xlane.xlu0 %1262 }
 0x335   :  { %v3274_v61 = vpop.eup %3273  ;;  %v2512_v3 = vrot.slane %v3272_v49, %v4614_v62  ;;  %3299 = vrcp.f32 %v1819_v39  ;;  %vm5300_vm7 = vcmask 917312   ;;  %v1441_v26 = vsub.f32 0.0, %v1261_v37 }
 0x336   :  { %v3276_v51 = vpop.eup %3275  ;;  %3301 = vpow2.f32 %v1604_v30  ;;  %v1799_v34 = vadd.f32 1.0, %v3274_v61  ;;  %vm2926_vm9 = vcmask 1042434   ;;  %v1612_v1 = vmul.f32 1.442695, %v1425_v63 }
 0x337   :  { %v3278_v21 = vpop.eup %3277  ;;  %v1820_v14 = vadd.f32 1.0, %v3276_v51  ;;  %3303 = vpow2.f32 %v1640_v29  ;;  %v2513_v50 = vsel %vm5299_vm10, %v2512_v3, %v2508_v35  ;;  %v1644_v23 = vmul.f32 1.442695, %v1441_v26  ;;  %v1237_v42 = vpop.xlane.xlu1 %1236 }
 0x338   :  { %v3280_v31 = vpop.eup %3279  ;;  %v2527_v46 = vrot.slane %v3278_v21, %v4618_v32  ;;  %v2518_v24 = vsel %vm5300_vm7, %v2517_v7, %v2513_v50  ;;  %v1442_v6 = vsub.f32 0.0, %v1263_v58  ;;  %v1427_v30 = vsub.f32 0.0, %v1233_v11  ;;  %v1265_v4 = vpop.xlane.xlu0 %1264 }
 0x339   :  { %v3282_v25 = vpop.eup %3281  ;;  %v2522_v13 = vrot.slane %v3280_v31, %v4621_v27  ;;  %3305 = vrcp.f32 %v1820_v14  ;;  %v1443_v3 = vsub.f32 0.0, %v1265_v4  ;;  %v1429_v14 = vsub.f32 0.0, %v1237_v42 }
 0x33a   :  { %v3284_v38 = vpop.eup %3283  ;;  %v2615_v47 = vrot.slane %v3282_v25, %v4535_v0  ;;  %3307 = vpow2.f32 %v1642_v5  ;;  %v1646_v29 = vmul.f32 1.442695, %v1442_v6  ;;  %v1616_v21 = vmul.f32 1.442695, %v1427_v30 }
 0x33b   :  { %v3286_v33 = vpop.eup %3285  ;;  %v2611_v52 = vrot.slane %v3284_v38, %v4353_v45  ;;  %v2523_v28 = vsel %vm2362_vm3, %v2522_v13, %v2518_v24  ;;  %3309 = vpow2.f32 %v1608_v9  ;;  %v1648_v50 = vmul.f32 1.442695, %v1443_v3  ;;  %v1271_v31 = vpop.xlane.xlu1 %1270 }
 0x33c   :  { %v3288_v44 = vpop.eup %3287  ;;  %v2528_v22 = vsel %vm2369_vm0, %v2527_v46, %v2523_v28  ;;  %3311 = vpow2.f32 %v1644_v23  ;;  %v1801_v7 = vadd.f32 1.0, %v3286_v33  ;;  %v1267_v37 = vpop.xlane.xlu0 %1266  ;;  %v1620_v38 = vmul.f32 1.442695, %v1429_v14 }
 0x33d   :  { %v3290_v59 = vpop.eup %3289  ;;  %v2616_v57 = vsel %vm5293_vm1, %v2615_v47, %v2611_v52  ;;  %v1821_v15 = vadd.f32 1.0, %v3288_v44  ;;  %3313 = vrcp.f32 %v1799_v34  ;;  %v4858_v19 = vsel %vm2926_vm9, %v2528_v22, %v4799_v43  ;;  %vm5301_vm9 = vmmov %vm5293_vm1 }
 0x33e   :  { %v3292_v60 = vpop.eup %3291  ;;  %v2625_v18 = vrot.slane %v3290_v59, %v4539_v2  ;;  %v1444_v13 = vsub.f32 0.0, %v1267_v37  ;;  %v1446_v47 = vsub.f32 0.0, %v1271_v31  ;;  %vm5302_vm1 = vmmov %vm5295_vm6 }
 0x33f   :  { %v3294_v20 = vpop.eup %3293  ;;  %v2620_v39 = vrot.slane %v3292_v60, %v4549_v8  ;;  %3315 = vrcp.f32 %v1821_v15  ;;  %v1303_v52 = vpop.xlane.xlu1 %1302 }
 0x340   :  { %v3296_v49 = vpop.eup %3295  ;;  %3317 = vpow2.f32 %v1612_v1  ;;  %v1803_v63 = vadd.f32 1.0, %v3294_v20  ;;  %v1650_v33 = vmul.f32 1.442695, %v1444_v13  ;;  %v1269_v28 = vpop.xlane.xlu0 %1268  ;;  %v1462_v15 = vsub.f32 0.0, %v1303_v52 }
 0x341   :  { %v3298_v53 = vpop.eup %3297  ;;  %v2621_v35 = vsel %vm2278_vm8, %v2620_v39, %v2616_v57  ;;  %v1822_v61 = vadd.f32 1.0, %v3296_v49  ;;  %3319 = vpow2.f32 %v1646_v29  ;;  %v1445_v22 = vsub.f32 0.0, %v1269_v28 }
 0x342   :  { %v3300_v48 = vpop.eup %3299  ;;  %v2626_v43 = vsel %vm2285_vm13, %v2625_v18, %v2621_v35  ;;  %v2630_v51 = vrot.slane %v3298_v53, %v4557_v55  ;;  %v1654_v57 = vmul.f32 1.442695, %v1446_v47  ;;  %v1686_v35 = vmul.f32 1.442695, %v1462_v15 }
 0x343   :  { %v3302_v5 = vpop.eup %3301  ;;  %v2635_v16 = vrot.slane %v3300_v48, %v4553_v40  ;;  %3321 = vrcp.f32 %v1822_v61  ;;  %v1652_v18 = vmul.f32 1.442695, %v1445_v22  ;;  %v1307_v30 = vpop.xlane.xlu1 %1306 }
 0x344   :  { %v3304_v46 = vpop.eup %3303  ;;  %v2631_v9 = vsel %vm2292_vm15, %v2630_v51, %v2626_v43  ;;  %3323 = vrcp.f32 %v1801_v7  ;;  %v1805_v11 = vadd.f32 1.0, %v3302_v5  ;;  %v1464_v29 = vsub.f32 0.0, %v1307_v30  ;;  %v1207_v42 = vpop.xlane.xlu0 %1206 }
 0x345   :  { %v2636_v24 = vsel %vm2299_vm11, %v2635_v16, %v2631_v9  ;;  %v1823_v25 = vadd.f32 1.0, %v3304_v46  ;;  %3325 = vpow2.f32 %v1648_v50  ;;  %v1414_v4 = vsub.f32 0.0, %v1207_v42 }
 0x346   :  { %v3306_v26 = vpop.eup %3305  ;;  %3327 = vpow2.f32 %v1616_v21  ;;  %v1690_v21 = vmul.f32 1.442695, %v1464_v29 }
 0x347   :  { %v2640_v34 = vrot.slane %v3306_v26, %v4563_v54  ;;  %3329 = vrcp.f32 %v1823_v25  ;;  %v3308_v23 = vpop.eup %3307  ;;  %v1590_v48 = vmul.f32 1.442695, %v1414_v4  ;;  %v1279_v43 = vpop.xlane.xlu1 %1278 }
 0x348   :  { %3331 = vrcp.f32 %v1803_v63  ;;  %v3310_v44 = vpop.eup %3309  ;;  %v1824_v58 = vadd.f32 1.0, %v3308_v23  ;;  %v1450_v14 = vsub.f32 0.0, %v1279_v43  ;;  %v1211_v5 = vpop.xlane.xlu0 %1210 }
 0x349   :  { %v2641_v1 = vsel %vm2306_vm12, %v2640_v34, %v2636_v24  ;;  %3333 = vpow2.f32 %v1650_v33  ;;  %v3312_v59 = vpop.eup %3311  ;;  %v1807_v39 = vadd.f32 1.0, %v3310_v44  ;;  %v1416_v31 = vsub.f32 0.0, %v1211_v5 }
 0x34a   :  { %3335 = vpow2.f32 %v1620_v38  ;;  %v4869_v6 = vpop.eup %3313  ;;  %v1825_v60 = vadd.f32 1.0, %v3312_v59  ;;  %v1662_v38 = vmul.f32 1.442695, %v1450_v14 }
 0x34b   :  { %3337 = vrcp.f32 %v1824_v58  ;;  %v1594_v25 = vmul.f32 1.442695, %v1416_v31  ;;  %v1281_v13 = vpop.xlane.xlu1 %1280 }
 0x34c   :  { %v3316_v20 = vpop.eup %3315  ;;  %3339 = vrcp.f32 %v1805_v11  ;;  %v1451_v47 = vsub.f32 0.0, %v1281_v13  ;;  %v1215_v34 = vpop.xlane.xlu0 %1214 }
 0x34d   :  { %v3318_v49 = vpop.eup %3317  ;;  %v2645_v7 = vrot.slane %v3316_v20, %v4560_v56  ;;  %3341 = vrcp.f32 %v1825_v60  ;;  %v1418_v23 = vsub.f32 0.0, %v1215_v34 }
 0x34e   :  { %v3320_v53 = vpop.eup %3319  ;;  %3343 = vpow2.f32 %v1654_v57  ;;  %v1809_v9 = vadd.f32 1.0, %v3318_v49  ;;  %v1664_v15 = vmul.f32 1.442695, %v1451_v47 }
 0x34f   :  { %v2646_v61 = vsel %vm2313_vm14, %v2645_v7, %v2641_v1  ;;  %v1826_v3 = vadd.f32 1.0, %v3320_v53  ;;  %3345 = vpow2.f32 %v1652_v18  ;;  %v1598_v22 = vmul.f32 1.442695, %v1418_v23  ;;  %v1283_v59 = vpop.xlane.xlu1 %1282 }
 0x350   :  { %v3322_v51 = vpop.eup %3321  ;;  %3347 = vrcp.f32 %v1807_v39  ;;  %v1452_v60 = vsub.f32 0.0, %v1283_v59  ;;  %v1219_v18 = vpop.xlane.xlu0 %1218 }
 0x351   :  { %v4873_v16 = vpop.eup %3323  ;;  %v2650_v50 = vrot.slane %v3322_v51, %v4578_v41  ;;  %3349 = vrcp.f32 %v1826_v3  ;;  %v1420_v39 = vsub.f32 0.0, %v1219_v18 }
 0x352   :  { %v3326_v46 = vpop.eup %3325  ;;  %3351 = vpow2.f32 %v1686_v35  ;;  %v1666_v42 = vmul.f32 1.442695, %v1452_v60 }
 0x353   :  { %v3328_v63 = vpop.eup %3327  ;;  %v2651_v37 = vsel %vm5295_vm6, %v2650_v50, %v2646_v61  ;;  %v1827_v24 = vadd.f32 1.0, %v3326_v46  ;;  %3353 = vpow2.f32 %v1590_v48  ;;  %v1602_v4 = vmul.f32 1.442695, %v1420_v39  ;;  %v1285_v53 = vpop.xlane.xlu1 %1284  ;;  %vm5303_vm6 = vmmov %vm5296_vm2 }
 0x354   :  { %v3330_v26 = vpop.eup %3329  ;;  %3355 = vpow2.f32 %v1690_v21  ;;  %v1811_v28 = vadd.f32 1.0, %v3328_v63  ;;  %v1453_v48 = vsub.f32 0.0, %v1285_v53  ;;  %v1223_v43 = vpop.xlane.xlu0 %1222 }
 0x355   :  { %v4877_v33 = vpop.eup %3331  ;;  %v2655_v52 = vrot.slane %v3330_v26, %v4566_v12  ;;  %3357 = vrcp.f32 %v1827_v24  ;;  %v1422_v14 = vsub.f32 0.0, %v1223_v43 }
 0x356   :  { %v3334_v11 = vpop.eup %3333  ;;  %3359 = vrcp.f32 %v1809_v9  ;;  %v1668_v31 = vmul.f32 1.442695, %v1453_v48 }
 0x357   :  { %v3336_v44 = vpop.eup %3335  ;;  %v2656_v1 = vsel %vm5296_vm2, %v2655_v52, %v2651_v37  ;;  %v1828_v58 = vadd.f32 1.0, %v3334_v11  ;;  %3361 = vpow2.f32 %v1594_v25  ;;  %v1606_v63 = vmul.f32 1.442695, %v1422_v14  ;;  %v1287_v37 = vpop.xlane.xlu1 %1286  ;;  %vm5304_vm2 = vmmov %vm5297_vm4 }
 0x358   :  { %v3338_v57 = vpop.eup %3337  ;;  %3363 = vpow2.f32 %v1662_v38  ;;  %v1813_v3 = vadd.f32 1.0, %v3336_v44  ;;  %v1227_v13 = vpop.xlane.xlu0 %1226  ;;  %v1454_v11 = vsub.f32 0.0, %v1287_v37 }
 0x359   :  { %v4881_v30 = vpop.eup %3339  ;;  %v2660_v20 = vrot.slane %v3338_v57, %v4587_v17  ;;  %3365 = vrcp.f32 %v1828_v58  ;;  %v1424_v47 = vsub.f32 0.0, %v1227_v13 }
 0x35a   :  { %v3342_v29 = vpop.eup %3341  ;;  %3367 = vrcp.f32 %v1811_v28 }
 0x35b   :  { %v3344_v49 = vpop.eup %3343  ;;  %v2665_v7 = vrot.slane %v3342_v29, %v4583_v10  ;;  %3369 = vpow2.f32 %v1598_v22  ;;  %v2661_v35 = vsel %vm5297_vm4, %v2660_v20, %v2656_v1  ;;  %v1610_v1 = vmul.f32 1.442695, %v1424_v47  ;;  %v1289_v58 = vpop.xlane.xlu1 %1288  ;;  %vm5305_vm4 = vmmov %vm5298_vm5 }
 0x35c   :  { %v3346_v61 = vpop.eup %3345  ;;  %3371 = vpow2.f32 %v1664_v15  ;;  %v1830_v25 = vadd.f32 1.0, %v3344_v49  ;;  %v1231_v57 = vpop.xlane.xlu0 %1230  ;;  %v1670_v29 = vmul.f32 1.442695, %v1454_v11 }
 0x35d   :  { %v4886_v51 = vpop.eup %3347  ;;  %v1829_v21 = vadd.f32 1.0, %v3346_v61  ;;  %3373 = vpow2.f32 %v1602_v4  ;;  %v2666_v5 = vsel %vm5298_vm5, %v2665_v7, %v2661_v35  ;;  %v1426_v18 = vsub.f32 0.0, %v1231_v57  ;;  %vm5306_vm5 = vmmov %vm5299_vm10 }
 0x35e   :  { %v3350_v50 = vpop.eup %3349  ;;  %3375 = vpow2.f32 %v1666_v42  ;;  %v1455_v42 = vsub.f32 0.0, %v1289_v58 }
 0x35f   :  { %v3352_v46 = vpop.eup %3351  ;;  %v2670_v9 = vrot.slane %v3350_v50, %v4614_v62  ;;  %3377 = vrcp.f32 %v1829_v21  ;;  %v1614_v7 = vmul.f32 1.442695, %v1426_v18  ;;  %v1291_v4 = vpop.xlane.xlu1 %1290 }
 0x360   :  { %v3354_v24 = vpop.eup %3353  ;;  %3379 = vrcp.f32 %v1813_v3  ;;  %v1846_v23 = vadd.f32 1.0, %v3352_v46  ;;  %v1235_v3 = vpop.xlane.xlu0 %1234  ;;  %v1672_v50 = vmul.f32 1.442695, %v1455_v42 }
 0x361   :  { %v3356_v26 = vpop.eup %3355  ;;  %v1798_v38 = vadd.f32 1.0, %v3354_v24  ;;  %3381 = vpow2.f32 %v1606_v63  ;;  %v2671_v34 = vsel %vm5299_vm10, %v2670_v9, %v2666_v5  ;;  %v1428_v21 = vsub.f32 0.0, %v1235_v3  ;;  %vm5307_vm10 = vmmov %vm5300_vm7 }
 0x362   :  { %v3358_v52 = vpop.eup %3357  ;;  %3383 = vpow2.f32 %v1668_v31  ;;  %v1848_v59 = vadd.f32 1.0, %v3356_v26 }
 0x363   :  { %v4891_v28 = vpop.eup %3359  ;;  %v2675_v44 = vrot.slane %v3358_v52, %v4609_v36  ;;  %3385 = vrcp.f32 %v1798_v38  ;;  %v1618_v9 = vmul.f32 1.442695, %v1428_v21  ;;  %v1293_v63 = vpop.xlane.xlu1 %1292 }
 0x364   :  { %v3362_v22 = vpop.eup %3361  ;;  %3387 = vrcp.f32 %v1830_v25  ;;  %v1456_v25 = vsub.f32 0.0, %v1291_v4  ;;  %v1273_v13 = vpop.xlane.xlu0 %1272  ;;  %v1457_v42 = vsub.f32 0.0, %v1293_v63 }
 0x365   :  { %v3364_v15 = vpop.eup %3363  ;;  %v1800_v60 = vadd.f32 1.0, %v3362_v22  ;;  %3389 = vpow2.f32 %v1610_v1  ;;  %v2676_v20 = vsel %vm5300_vm7, %v2675_v44, %v2671_v34  ;;  %v1447_v38 = vsub.f32 0.0, %v1273_v13 }
 0x366   :  { %v3366_v39 = vpop.eup %3365  ;;  %3391 = vrcp.f32 %v1846_v23  ;;  %v1834_v61 = vadd.f32 1.0, %v3364_v15  ;;  %vm2928_vm7 = vcmask 1043459  }
 0x367   :  { %v4895_v49 = vpop.eup %3367  ;;  %3393 = vrcp.f32 %v1800_v60  ;;  %v2680_v53 = vrot.slane %v3366_v39, %v4621_v27  ;;  %v1656_v44 = vmul.f32 1.442695, %v1447_v38  ;;  %v1295_v1 = vpop.xlane.xlu1 %1294  ;;  %v2536_v60 = vrot.slane %v4869_v6, %v4535_v0 }
 0x368   :  { %v3370_v35 = vpop.eup %3369  ;;  %3395 = vrcp.f32 %v1848_v59  ;;  %v1674_v59 = vmul.f32 1.442695, %v1456_v25  ;;  %v1275_v57 = vpop.xlane.xlu0 %1274 }
 0x369   :  { %v3372_v48 = vpop.eup %3371  ;;  %v1802_v43 = vadd.f32 1.0, %v3370_v35  ;;  %3397 = vpow2.f32 %v1614_v7  ;;  %v2681_v14 = vsel %vm2362_vm3, %v2680_v53, %v2676_v20  ;;  %v1448_v20 = vsub.f32 0.0, %v1275_v57 }
 0x36a   :  { %v3374_v5 = vpop.eup %3373  ;;  %3399 = vpow2.f32 %v1670_v29  ;;  %v1835_v24 = vadd.f32 1.0, %v3372_v48  ;;  %v1458_v48 = vsub.f32 0.0, %v1295_v1  ;;  %v2556_v1 = vrot.slane %v4877_v33, %v4553_v40 }
 0x36b   :  { %v3376_v31 = vpop.eup %3375  ;;  %3401 = vrcp.f32 %v1802_v43  ;;  %v1804_v46 = vadd.f32 1.0, %v3374_v5  ;;  %v1658_v35 = vmul.f32 1.442695, %v1448_v20 }
 0x36c   :  { %v3378_v37 = vpop.eup %3377  ;;  %3403 = vrcp.f32 %v1834_v61  ;;  %v1836_v52 = vadd.f32 1.0, %v3376_v31  ;;  %v1297_v61 = vpop.xlane.xlu1 %1296  ;;  %v1676_v31 = vmul.f32 1.442695, %v1457_v42  ;;  %v1678_v38 = vmul.f32 1.442695, %v1458_v48 }
 0x36d   :  { %v4899_v26 = vpop.eup %3379  ;;  %3405 = vrcp.f32 %v1804_v46  ;;  %v2685_v47 = vrot.slane %v3378_v37, %v4618_v32  ;;  %v1305_v6 = vpop.xlane.xlu0 %1304 }
 0x36e   :  { %v3382_v34 = vpop.eup %3381  ;;  %3407 = vpow2.f32 %v1672_v50  ;;  %v2546_v50 = vrot.slane %v4873_v16, %v4539_v2 }
 0x36f   :  { %v3384_v23 = vpop.eup %3383  ;;  %v1806_v11 = vadd.f32 1.0, %v3382_v34  ;;  %3409 = vpow2.f32 %v1618_v9  ;;  %v4903_v58 = vsel %vm2369_vm0, %v2685_v47, %v2681_v14  ;;  %v1463_v14 = vsub.f32 0.0, %v1305_v6 }
 0x370   :  { %v3386_v22 = vpop.eup %3385  ;;  %3411 = vrcp.f32 %v1835_v24  ;;  %v1837_v29 = vadd.f32 1.0, %v3384_v23  ;;  %v1299_v24 = vpop.xlane.xlu1 %1298  ;;  %v1459_v47 = vsub.f32 0.0, %v1297_v61 }
 0x371   :  { %v4905_v15 = vpop.eup %3387  ;;  %v2532_v18 = vrot.slane %v3386_v22, %v4353_v45  ;;  %3413 = vrcp.f32 %v1806_v11  ;;  %v1688_v37 = vmul.f32 1.442695, %v1463_v14  ;;  %v1460_v34 = vsub.f32 0.0, %v1299_v24 }
 0x372   :  { %v3390_v39 = vpop.eup %3389  ;;  %3415 = vrcp.f32 %v1836_v52  ;;  %v1277_v52 = vpop.xlane.xlu0 %1276  ;;  %v2566_v22 = vrot.slane %v4881_v30, %v4560_v56 }
 0x373   :  { %v4910_v7 = vpop.eup %3391  ;;  %v2537_v4 = vsel %vm5301_vm9, %v2536_v60, %v2532_v18  ;;  %v1808_v53 = vadd.f32 1.0, %v3390_v39  ;;  %3417 = vpow2.f32 %v1656_v44  ;;  %v1449_v11 = vsub.f32 0.0, %v1277_v52 }
 0x374   :  { %v3394_v3 = vpop.eup %3393  ;;  %3419 = vpow2.f32 %v1674_v59  ;;  %v4929_v39 = vpop.xlane.xlu1 %1330  ;;  %v1682_v33 = vmul.f32 1.442695, %v1460_v34  ;;  %vm2930_vm9 = vcmask 1044484  }
 0x375   :  { %v4913_v43 = vpop.eup %3395  ;;  %v2541_v21 = vrot.slane %v3394_v3, %v4549_v8  ;;  %3421 = vrcp.f32 %v1808_v53  ;;  %v1660_v20 = vmul.f32 1.442695, %v1449_v11  ;;  %v2586_v11 = vrot.slane %v4891_v28, %v4583_v10 }
 0x376   :  { %v3398_v5 = vpop.eup %3397  ;;  %3423 = vrcp.f32 %v1837_v29  ;;  %v1309_v53 = vpop.xlane.xlu0 %1308 }
 0x377   :  { %v3400_v46 = vpop.eup %3399  ;;  %v2542_v9 = vsel %vm2278_vm8, %v2541_v21, %v2537_v4  ;;  %v1810_v63 = vadd.f32 1.0, %v3398_v5  ;;  %3425 = vpow2.f32 %v1658_v35  ;;  %v1680_v4 = vmul.f32 1.442695, %v1459_v47 }
 0x378   :  { %v3402_v25 = vpop.eup %3401  ;;  %v2547_v13 = vsel %vm2285_vm13, %v2546_v50, %v2542_v9  ;;  %v1838_v59 = vadd.f32 1.0, %v3400_v46  ;;  %v1465_v3 = vsub.f32 0.0, %v1309_v53  ;;  %v2576_v9 = vrot.slane %v4886_v51, %v4566_v12 }
 0x379   :  { %v4920_v23 = vpop.eup %3403  ;;  %v2551_v16 = vrot.slane %v3402_v25, %v4557_v55  ;;  %3427 = vrcp.f32 %v1810_v63 }
 0x37a   :  { %v3406_v44 = vpop.eup %3405  ;;  %3429 = vpow2.f32 %v1676_v31  ;;  %v1692_v50 = vmul.f32 1.442695, %v1465_v3  ;;  %v1337_v31 = vpop.xlane.xlu1 %1336 }
 0x37b   :  { %v3408_v57 = vpop.eup %3407  ;;  %v2552_v60 = vsel %vm2292_vm15, %v2551_v16, %v2547_v13  ;;  %v2561_v18 = vrot.slane %v3406_v44, %v4563_v54  ;;  %3431 = vpow2.f32 %v1688_v37  ;;  %v1479_v63 = vsub.f32 0.0, %v1337_v31  ;;  %v1311_v37 = vpop.xlane.xlu0 %1310 }
 0x37c   :  { %v3410_v29 = vpop.eup %3409  ;;  %v2557_v42 = vsel %vm2299_vm11, %v2556_v1, %v2552_v60  ;;  %3433 = vpow2.f32 %v1678_v38  ;;  %v1839_v5 = vadd.f32 1.0, %v3408_v57  ;;  %v1466_v38 = vsub.f32 0.0, %v1311_v37 }
 0x37d   :  { %v4932_v35 = vpop.eup %3411  ;;  %v2562_v30 = vsel %vm2306_vm12, %v2561_v18, %v2557_v42  ;;  %v1812_v61 = vadd.f32 1.0, %v3410_v29  ;;  %3435 = vpow2.f32 %v1660_v20  ;;  %v1720_v52 = vmul.f32 1.442695, %v1479_v63 }
 0x37e   :  { %v3414_v48 = vpop.eup %3413  ;;  %v2567_v6 = vsel %vm2313_vm14, %v2566_v22, %v2562_v30  ;;  %3437 = vrcp.f32 %v1838_v59  ;;  %v1694_v44 = vmul.f32 1.442695, %v1466_v38  ;;  %v1339_v1 = vpop.xlane.xlu1 %1338  ;;  %v1476_v57 = vsub.f32 0.0, %v4929_v39 }
 0x37f   :  { %v4936_v21 = vpop.eup %3415  ;;  %v2571_v14 = vrot.slane %v3414_v48, %v4578_v41  ;;  %3439 = vrcp.f32 %v1812_v61  ;;  %v1480_v60 = vsub.f32 0.0, %v1339_v1  ;;  %v1313_v18 = vpop.xlane.xlu0 %1312  ;;  %v2596_v48 = vrot.slane %v4895_v49, %v4609_v36 }
 0x380   :  { %v3418_v46 = vpop.eup %3417  ;;  %3441 = vpow2.f32 %v1680_v4  ;;  %v1467_v42 = vsub.f32 0.0, %v1313_v18 }
 0x381   :  { %v3420_v24 = vpop.eup %3419  ;;  %v2572_v25 = vsel %vm5302_vm1, %v2571_v14, %v2567_v6  ;;  %v1831_v13 = vadd.f32 1.0, %v3418_v46  ;;  %3443 = vpow2.f32 %v1682_v33  ;;  %v1722_v28 = vmul.f32 1.442695, %v1480_v60 }
 0x382   :  { %v3422_v47 = vpop.eup %3421  ;;  %v2577_v34 = vsel %vm5303_vm6, %v2576_v9, %v2572_v25  ;;  %3445 = vpow2.f32 %v1692_v50  ;;  %v1840_v59 = vadd.f32 1.0, %v3420_v24  ;;  %v1696_v61 = vmul.f32 1.442695, %v1467_v42  ;;  %v1341_v3 = vpop.xlane.xlu1 %1340 }
 0x383   :  { %v4943_v16 = vpop.eup %3423  ;;  %v2581_v51 = vrot.slane %v3422_v47, %v4587_v17  ;;  %3447 = vrcp.f32 %v1839_v5  ;;  %v1714_v6 = vmul.f32 1.442695, %v1476_v57  ;;  %v1481_v14 = vsub.f32 0.0, %v1341_v3  ;;  %v1315_v5 = vpop.xlane.xlu0 %1314 }
 0x384   :  { %v3426_v22 = vpop.eup %3425  ;;  %3449 = vpow2.f32 %v1720_v52  ;;  %v1468_v46 = vsub.f32 0.0, %v1315_v5  ;;  %v2606_v60 = vrot.slane %v4899_v26, %v4618_v32  ;;  %vm5308_vm1 = vcmask 130112  }
 0x385   :  { %v2582_v20 = vsel %vm5304_vm2, %v2581_v51, %v2577_v34  ;;  %3451 = vrcp.f32 %v1831_v13  ;;  %v1832_v29 = vadd.f32 1.0, %v3426_v22  ;;  %v1724_v37 = vmul.f32 1.442695, %v1481_v14  ;;  %vm5309_vm6 = vmmov %vm5308_vm1 }
 0x386   :  { %v3428_v4 = vpop.eup %3427  ;;  %3453 = vpow2.f32 %v1694_v44  ;;  %v2587_v33 = vsel %vm5305_vm4, %v2586_v11, %v2582_v20  ;;  %v1698_v49 = vmul.f32 1.442695, %v1468_v46  ;;  %v1343_v38 = vpop.xlane.xlu1 %1342  ;;  %vm5310_vm2 = vcmask 589312  }
 0x387   :  { %v3430_v53 = vpop.eup %3429  ;;  %v2591_v30 = vrot.slane %v3428_v4, %v4614_v62  ;;  %3455 = vrcp.f32 %v1832_v29  ;;  %v1482_v52 = vsub.f32 0.0, %v1343_v38  ;;  %v1317_v11 = vpop.xlane.xlu0 %1316  ;;  %v2690_v38 = vrot.slane %v4905_v15, %v4353_v45 }
 0x388   :  { %v3432_v39 = vpop.eup %3431  ;;  %3457 = vrcp.f32 %v1840_v59  ;;  %v1841_v34 = vadd.f32 1.0, %v3430_v53  ;;  %v1469_v22 = vsub.f32 0.0, %v1317_v11  ;;  %v2778_v11 = vrot.slane %v4913_v43, %v4549_v8 }
 0x389   :  { %v3434_v50 = vpop.eup %3433  ;;  %v1847_v31 = vadd.f32 1.0, %v3432_v39  ;;  %3459 = vpow2.f32 %v1722_v28  ;;  %v2592_v9 = vsel %vm5306_vm5, %v2591_v30, %v2587_v33  ;;  %v1726_v57 = vmul.f32 1.442695, %v1482_v52 }
 0x38a   :  { %v3436_v63 = vpop.eup %3435  ;;  %3461 = vpow2.f32 %v1696_v61  ;;  %v2597_v24 = vsel %vm5307_vm10, %v2596_v48, %v2592_v9  ;;  %v1842_v1 = vadd.f32 1.0, %v3434_v50  ;;  %v1700_v20 = vmul.f32 1.442695, %v1469_v22  ;;  %v1345_v29 = vpop.xlane.xlu1 %1344 }
 0x38b   :  { %v4956_v25 = vpop.eup %3437  ;;  %3463 = vrcp.f32 %v1847_v31  ;;  %v1833_v13 = vadd.f32 1.0, %v3436_v63  ;;  %v1483_v33 = vsub.f32 0.0, %v1345_v29  ;;  %v1319_v53 = vpop.xlane.xlu0 %1318  ;;  %v2769_v52 = vrot.slane %v4910_v7, %v4353_v45 }
 0x38c   :  { %v3440_v47 = vpop.eup %3439  ;;  %3465 = vpow2.f32 %v1714_v6  ;;  %v1470_v26 = vsub.f32 0.0, %v1319_v53  ;;  %v2709_v22 = vrot.slane %v4920_v23, %v4557_v55  ;;  %v2714_v29 = vrot.slane %v4932_v35, %v4553_v40 }
 0x38d   :  { %v3442_v51 = vpop.eup %3441  ;;  %v2601_v44 = vrot.slane %v3440_v47, %v4621_v27  ;;  %3467 = vrcp.f32 %v1833_v13  ;;  %v1728_v50 = vmul.f32 1.442695, %v1483_v33  ;;  %vm5311_vm4 = vcmask 654912  }
 0x38e   :  { %v3444_v59 = vpop.eup %3443  ;;  %3469 = vpow2.f32 %v1724_v37  ;;  %v1843_v28 = vadd.f32 1.0, %v3442_v51  ;;  %v1347_v31 = vpop.xlane.xlu1 %1346  ;;  %v1702_v13 = vmul.f32 1.442695, %v1470_v26  ;;  %vm5312_vm5 = vcmask 720512  }
 0x38f   :  { %v3446_v18 = vpop.eup %3445  ;;  %3471 = vpow2.f32 %v1698_v49  ;;  %v2602_v42 = vsel %vm2362_vm3, %v2601_v44, %v2597_v24  ;;  %v1844_v3 = vadd.f32 1.0, %v3444_v59  ;;  %v1484_v63 = vsub.f32 0.0, %v1347_v31  ;;  %v1321_v37 = vpop.xlane.xlu0 %1320 }
 0x390   :  { %v4962_v4 = vpop.eup %3447  ;;  %3473 = vrcp.f32 %v1841_v34  ;;  %v2607_v30 = vsel %vm2369_vm0, %v2606_v60, %v2602_v42  ;;  %v1849_v6 = vadd.f32 1.0, %v3446_v18  ;;  %vm5313_vm10 = vcmask 786112  }
 0x391   :  { %v3450_v61 = vpop.eup %3449  ;;  %3475 = vrcp.f32 %v1842_v1  ;;  %v2929_v39 = vsel %vm2928_vm7, %v2607_v30, %v4858_v19  ;;  %v1471_v19 = vsub.f32 0.0, %v1321_v37  ;;  %v1730_v15 = vmul.f32 1.442695, %v1484_v63 }
 0x392   :  { %v3452_v48 = vpop.eup %3451  ;;  %3477 = vpow2.f32 %v1726_v57  ;;  %v4968_v14 = vsel %vm2930_vm9, %v4903_v58, %v2929_v39  ;;  %v1863_v9 = vadd.f32 1.0, %v3450_v61  ;;  %v1349_v44 = vpop.xlane.xlu1 %1348  ;;  %v2719_v63 = vrot.slane %v4936_v21, %v4563_v54  ;;  %vm5315_vm9 = vmmov %vm5308_vm1 }
 0x393   :  { %v3454_v5 = vpop.eup %3453  ;;  %3479 = vpow2.f32 %v1700_v20  ;;  %v2694_v58 = vrot.slane %v3452_v48, %v4535_v0  ;;  %v1485_v59 = vsub.f32 0.0, %v1349_v44  ;;  %v1323_v57 = vpop.xlane.xlu0 %1322  ;;  %v1704_v7 = vmul.f32 1.442695, %v1471_v19 }
 0x394   :  { %v3456_v46 = vpop.eup %3455  ;;  %3481 = vrcp.f32 %v1843_v28  ;;  %v1850_v47 = vadd.f32 1.0, %v3454_v5  ;;  %v1472_v20 = vsub.f32 0.0, %v1323_v57  ;;  %vm5314_vm7 = vcmask 851712  }
 0x395   :  { %v4970_v24 = vpop.eup %3457  ;;  %3483 = vrcp.f32 %v1844_v3  ;;  %v2699_v51 = vrot.slane %v3456_v46, %v4549_v8  ;;  %v2695_v42 = vsel %vm5308_vm1, %v2694_v58, %v2690_v38  ;;  %v1732_v48 = vmul.f32 1.442695, %v1485_v59  ;;  %vm5319_vm1 = vmmov %vm5312_vm5 }
 0x396   :  { %v3460_v49 = vpop.eup %3459  ;;  %3485 = vrcp.f32 %v1849_v6  ;;  %v1351_v3 = vpop.xlane.xlu1 %1350  ;;  %v1706_v31 = vmul.f32 1.442695, %v1472_v20 }
 0x397   :  { %v3462_v34 = vpop.eup %3461  ;;  %3487 = vpow2.f32 %v1728_v50  ;;  %v1864_v28 = vadd.f32 1.0, %v3460_v49  ;;  %v2700_v33 = vsel %vm2278_vm8, %v2699_v51, %v2695_v42  ;;  %v1486_v35 = vsub.f32 0.0, %v1351_v3  ;;  %v1325_v6 = vpop.xlane.xlu0 %1324 }
 0x398   :  { %v3464_v1 = vpop.eup %3463  ;;  %3489 = vrcp.f32 %v1863_v9  ;;  %v1851_v61 = vadd.f32 1.0, %v3462_v34  ;;  %v1473_v46 = vsub.f32 0.0, %v1325_v6  ;;  %v2724_v49 = vrot.slane %v4943_v16, %v4560_v56 }
 0x399   :  { %v4982_v60 = vpop.eup %3465  ;;  %v2773_v18 = vrot.slane %v3464_v1, %v4535_v0  ;;  %3491 = vpow2.f32 %v1702_v13  ;;  %v2734_v1 = vrot.slane %v4962_v4, %v4566_v12 }
 0x39a   :  { %v3468_v43 = vpop.eup %3467  ;;  %3493 = vrcp.f32 %v1850_v47  ;;  %v1353_v47 = vpop.xlane.xlu1 %1352  ;;  %v1708_v16 = vmul.f32 1.442695, %v1473_v46 }
 0x39b   :  { %v3470_v23 = vpop.eup %3469  ;;  %v2774_v53 = vsel %vm5309_vm6, %v2773_v18, %v2769_v52  ;;  %v2704_v30 = vrot.slane %v3468_v43, %v4539_v2  ;;  %3495 = vpow2.f32 %v1730_v15  ;;  %v2729_v52 = vrot.slane %v4956_v25, %v4578_v41  ;;  %v1327_v21 = vpop.xlane.xlu0 %1326  ;;  %vm5321_vm6 = vmmov %vm5310_vm2 }
 0x39c   :  { %v3472_v26 = vpop.eup %3471  ;;  %v4992_v39 = vsel %vm2278_vm8, %v2778_v11, %v2774_v53  ;;  %3497 = vpow2.f32 %v1704_v7  ;;  %v1865_v13 = vadd.f32 1.0, %v3470_v23  ;;  %v1734_v11 = vmul.f32 1.442695, %v1486_v35 }
 0x39d   :  { %v3474_v5 = vpop.eup %3473  ;;  %v2705_v50 = vsel %vm2285_vm13, %v2704_v30, %v2700_v33  ;;  %3499 = vrcp.f32 %v1864_v28  ;;  %v1852_v58 = vadd.f32 1.0, %v3472_v26  ;;  %v1487_v57 = vsub.f32 0.0, %v1353_v47 }
 0x39e   :  { %v4995_v9 = vpop.eup %3475  ;;  %v2710_v37 = vsel %vm2292_vm15, %v2709_v22, %v2705_v50  ;;  %3501 = vrcp.f32 %v1851_v61  ;;  %v1474_v22 = vsub.f32 0.0, %v1327_v21  ;;  %v2739_v7 = vrot.slane %v4970_v24, %v4587_v17  ;;  %v1355_v43 = vpop.xlane.xlu1 %1354 }
 0x39f   :  { %v3478_v19 = vpop.eup %3477  ;;  %v2715_v38 = vsel %vm2299_vm11, %v2714_v29, %v2710_v37  ;;  %3503 = vpow2.f32 %v1732_v48  ;;  %v1488_v28 = vsub.f32 0.0, %v1355_v43  ;;  %v1335_v23 = vpop.xlane.xlu0 %1334  ;;  %v2744_v30 = vrot.slane %v3474_v5, %v4583_v10 }
 0x3a0   :  { %v3480_v34 = vpop.eup %3479  ;;  %v2720_v51 = vsel %vm2306_vm12, %v2719_v63, %v2715_v38  ;;  %3505 = vpow2.f32 %v1706_v31  ;;  %v1866_v59 = vadd.f32 1.0, %v3478_v19  ;;  %v1710_v42 = vmul.f32 1.442695, %v1474_v22 }
 0x3a1   :  { %v5006_v44 = vpop.eup %3481  ;;  %3507 = vrcp.f32 %v1865_v13  ;;  %v2725_v25 = vsel %vm2313_vm14, %v2724_v49, %v2720_v51  ;;  %v1853_v20 = vadd.f32 1.0, %v3480_v34  ;;  %v1478_v61 = vsub.f32 0.0, %v1335_v23 }
 0x3a2   :  { %v5010_v15 = vpop.eup %3483  ;;  %3509 = vrcp.f32 %v1852_v58  ;;  %v2730_v4 = vsel %vm5310_vm2, %v2729_v52, %v2725_v25  ;;  %v1736_v24 = vmul.f32 1.442695, %v1487_v57  ;;  %v1357_v50 = vpop.xlane.xlu1 %1356  ;;  %v1738_v46 = vmul.f32 1.442695, %v1488_v28 }
 0x3a3   :  { %v5013_v18 = vpop.eup %3485  ;;  %3511 = vpow2.f32 %v1734_v11  ;;  %v2735_v33 = vsel %vm5311_vm4, %v2734_v1, %v2730_v4  ;;  %v1718_v6 = vmul.f32 1.442695, %v1478_v61  ;;  %v1489_v63 = vsub.f32 0.0, %v1357_v50  ;;  %v1329_v5 = vpop.xlane.xlu0 %1328 }
 0x3a4   :  { %v3488_v29 = vpop.eup %3487  ;;  %3513 = vpow2.f32 %v1708_v16  ;;  %v2740_v26 = vsel %vm5312_vm5, %v2739_v7, %v2735_v33  ;;  %v1475_v19 = vsub.f32 0.0, %v1329_v5  ;;  %vm5325_vm5 = vmmov %vm5319_vm1 }
 0x3a5   :  { %v5019_v53 = vpop.eup %3489  ;;  %3515 = vrcp.f32 %v1866_v59  ;;  %v1867_v35 = vadd.f32 1.0, %v3488_v29  ;;  %v5026_v31 = vsel %vm5313_vm10, %v2744_v30, %v2740_v26  ;;  %v1740_v38 = vmul.f32 1.442695, %v1489_v63 }
 0x3a6   :  { %v3492_v3 = vpop.eup %3491  ;;  %3517 = vrcp.f32 %v1853_v20  ;;  %v1712_v47 = vmul.f32 1.442695, %v1475_v19 }
 0x3a7   :  { %v5023_v48 = vpop.eup %3493  ;;  %3519 = vpow2.f32 %v1710_v42  ;;  %v1854_v13 = vadd.f32 1.0, %v3492_v3 }
 0x3a8   :  { %v3496_v37 = vpop.eup %3495  ;;  %3521 = vpow2.f32 %v1718_v6 }
 0x3a9   :  { %v3498_v49 = vpop.eup %3497  ;;  %3523 = vpow2.f32 %v1736_v24  ;;  %v1359_v34 = vpop.xlane.xlu1 %1358  ;;  %v1868_v11 = vadd.f32 1.0, %v3496_v37 }
 0x3aa   :  { %v5028_v58 = vpop.eup %3499  ;;  %3525 = vrcp.f32 %v1867_v35  ;;  %v1490_v21 = vsub.f32 0.0, %v1359_v34  ;;  %v1301_v51 = vpop.xlane.xlu0 %1300  ;;  %v1855_v16 = vadd.f32 1.0, %v3498_v49 }
 0x3ab   :  { %v5030_v52 = vpop.eup %3501  ;;  %3527 = vpow2.f32 %v1738_v46  ;;  %v1461_v22 = vsub.f32 0.0, %v1301_v51 }
 0x3ac   :  { %v3504_v1 = vpop.eup %3503  ;;  %3529 = vrcp.f32 %v1854_v13  ;;  %v1742_v57 = vmul.f32 1.442695, %v1490_v21 }
 0x3ad   :  { %v3506_v59 = vpop.eup %3505  ;;  %3531 = vpow2.f32 %v1740_v38  ;;  %v1684_v7 = vmul.f32 1.442695, %v1461_v22  ;;  %v1333_v20 = vpop.xlane.xlu1 %1332  ;;  %v1869_v4 = vadd.f32 1.0, %v3504_v1 }
 0x3ae   :  { %v5032_v25 = vpop.eup %3507  ;;  %3533 = vpow2.f32 %v1712_v47  ;;  %v1477_v29 = vsub.f32 0.0, %v1333_v20  ;;  %v1361_v42 = vpop.xlane.xlu0 %1360  ;;  %v1856_v23 = vadd.f32 1.0, %v3506_v59 }
 0x3af   :  { %v5034_v43 = vpop.eup %3509  ;;  %3535 = vrcp.f32 %v1868_v11  ;;  %v1491_v33 = vsub.f32 0.0, %v1361_v42 }
 0x3b0   :  { %v3512_v28 = vpop.eup %3511  ;;  %3537 = vrcp.f32 %v1855_v16  ;;  %v1716_v61 = vmul.f32 1.442695, %v1477_v29 }
 0x3b1   :  { %v3514_v30 = vpop.eup %3513  ;;  %3539 = vpow2.f32 %v1742_v57  ;;  %v1744_v24 = vmul.f32 1.442695, %v1491_v33  ;;  %v1365_v26 = vpop.xlane.xlu1 %1364  ;;  %v1870_v6 = vadd.f32 1.0, %v3512_v28  ;;  %v2783_v33 = vrot.slane %v5013_v18, %v4539_v2 }
 0x3b2   :  { %v5036_v3 = vpop.eup %3515  ;;  %3541 = vpow2.f32 %v1684_v7  ;;  %v1493_v50 = vsub.f32 0.0, %v1365_v26  ;;  %v1363_v46 = vpop.xlane.xlu0 %1362  ;;  %v1857_v34 = vadd.f32 1.0, %v3514_v30  ;;  %v1860_v7 = vadd.f32 1.0, %v4982_v60 }
 0x3b3   :  { %v5038_v35 = vpop.eup %3517  ;;  %3543 = vrcp.f32 %v1869_v4  ;;  %v1492_v5 = vsub.f32 0.0, %v1363_v46  ;;  %v2788_v60 = vrot.slane %v5023_v48, %v4557_v55  ;;  %v2793_v46 = vrot.slane %v5030_v52, %v4553_v40 }
 0x3b4   :  { %v3520_v63 = vpop.eup %3519  ;;  %3545 = vrcp.f32 %v1856_v23  ;;  %v1748_v13 = vmul.f32 1.442695, %v1493_v50  ;;  %v2749_v50 = vrot.slane %v4995_v9, %v4614_v62  ;;  %v2784_v18 = vsel %vm2285_vm13, %v2783_v33, %v4992_v39 }
 0x3b5   :  { %v3522_v37 = vpop.eup %3521  ;;  %3547 = vpow2.f32 %v1716_v61  ;;  %v1746_v38 = vmul.f32 1.442695, %v1492_v5  ;;  %v1858_v21 = vadd.f32 1.0, %v3520_v63  ;;  %v2754_v9 = vrot.slane %v5006_v44, %v4609_v36 }
 0x3b6   :  { %v3524_v19 = vpop.eup %3523  ;;  %v1862_v49 = vadd.f32 1.0, %v3522_v37  ;;  %3549 = vpow2.f32 %v1744_v24  ;;  %v2798_v37 = vrot.slane %v5034_v43, %v4563_v54  ;;  %v2750_v43 = vsel %vm5314_vm7, %v2749_v50, %v5026_v31 }
 0x3b7   :  { %v5040_v47 = vpop.eup %3525  ;;  %3551 = vrcp.f32 %v1870_v6  ;;  %v1871_v1 = vadd.f32 1.0, %v3524_v19  ;;  %v2852_v19 = vrot.slane %v5019_v53, %v4535_v0  ;;  %v2862_v0 = vrot.slane %v5032_v25, %v4539_v2 }
 0x3b8   :  { %v3528_v11 = vpop.eup %3527  ;;  %3553 = vrcp.f32 %v1862_v49  ;;  %v2789_v49 = vsel %vm2292_vm15, %v2788_v60, %v2784_v18  ;;  %v2803_v53 = vrot.slane %v5038_v35, %v4560_v56 }
 0x3b9   :  { %v5042_v51 = vpop.eup %3529  ;;  %3555 = vpow2.f32 %v1748_v13  ;;  %v1872_v59 = vadd.f32 1.0, %v3528_v11  ;;  %v2794_v11 = vsel %vm2299_vm11, %v2793_v46, %v2789_v49 }
 0x3ba   :  { %v3532_v16 = vpop.eup %3531  ;;  %3557 = vpow2.f32 %v1746_v38  ;;  %v2857_v38 = vrot.slane %v5028_v58, %v4549_v8 }
 0x3bb   :  { %v3534_v22 = vpop.eup %3533  ;;  %3559 = vrcp.f32 %v1857_v34  ;;  %v1873_v29 = vadd.f32 1.0, %v3532_v16  ;;  %v2867_v16 = vrot.slane %v5036_v3, %v4557_v55 }
 0x3bc   :  { %v5044_v57 = vpop.eup %3535  ;;  %3561 = vrcp.f32 %v1858_v21  ;;  %v1859_v20 = vadd.f32 1.0, %v3534_v22  ;;  %v2872_v22 = vrot.slane %v5040_v47, %v4553_v40 }
 0x3bd   :  { %v5047_v4 = vpop.eup %3537  ;;  %3563 = vrcp.f32 %v1871_v1  ;;  %v2799_v1 = vsel %vm2306_vm12, %v2798_v37, %v2794_v11  ;;  %v2877_v55 = vrot.slane %v5044_v57, %v4563_v54 }
 0x3be   :  { %v3540_v42 = vpop.eup %3539  ;;  %3565 = vrcp.f32 %v1859_v20  ;;  %v2813_v2 = vrot.slane %v5047_v4, %v4566_v12  ;;  %v2804_v20 = vsel %vm2313_vm14, %v2803_v53, %v2799_v1 }
 0x3bf   :  { %v3542_v28 = vpop.eup %3541  ;;  %3567 = vrcp.f32 %v1872_v59  ;;  %v1874_v30 = vadd.f32 1.0, %v3540_v42 }
 0x3c0   :  { %v5049_v23 = vpop.eup %3543  ;;  %3569 = vrcp.f32 %v1860_v7  ;;  %v1845_v61 = vadd.f32 1.0, %v3542_v28 }
 0x3c1   :  { %v5053_v24 = vpop.eup %3545  ;;  %3571 = vrcp.f32 %v1873_v29  ;;  %v2882_v40 = vrot.slane %v5049_v23, %v4560_v56 }
 0x3c2   :  { %v3548_v26 = vpop.eup %3547  ;;  %3573 = vrcp.f32 %v1845_v61 }
 0x3c3   :  { %v3550_v6 = vpop.eup %3549  ;;  %v1861_v63 = vadd.f32 1.0, %v3548_v26  ;;  %3575 = vrcp.f32 %v1874_v30 }
 0x3c4   :  { %v3552_v5 = vpop.eup %3551  ;;  %v1875_v48 = vadd.f32 1.0, %v3550_v6 }
 0x3c5   :  { %v3554_v13 = vpop.eup %3553  ;;  %3577 = vrcp.f32 %v1861_v63  ;;  %v2887_v30 = vrot.slane %v3552_v5, %v4578_v41 }
 0x3c6   :  { %v3556_v52 = vpop.eup %3555  ;;  %v2848_v39 = vrot.slane %v3554_v13, %v4353_v45  ;;  %3579 = vrcp.f32 %v1875_v48  ;;  %v2808_v45 = vrot.slane %v5042_v51, %v4578_v41  ;;  %v2818_v51 = vrot.slane %v5053_v24, %v4587_v17 }
 0x3c7   :  { %v3558_v34 = vpop.eup %3557  ;;  %v1877_v44 = vadd.f32 1.0, %v3556_v52  ;;  %v2759_v41 = vrot.slane %v5010_v15, %v4621_v27 }
 0x3c8   :  { %v3560_v21 = vpop.eup %3559  ;;  %v2853_v8 = vsel %vm5315_vm9, %v2852_v19, %v2848_v39  ;;  %v1876_v58 = vadd.f32 1.0, %v3558_v34 }
 0x3c9   :  { %v3562_v31 = vpop.eup %3561  ;;  %v2858_v25 = vsel %vm2278_vm8, %v2857_v38, %v2853_v8  ;;  %3581 = vrcp.f32 %v1877_v44  ;;  %v2823_v3 = vrot.slane %v3560_v21, %v4583_v10  ;;  %vm5316_vm8 = vmmov %vm5310_vm2 }
 0x3ca   :  { %v3564_v35 = vpop.eup %3563  ;;  %v2863_v59 = vsel %vm2285_vm13, %v2862_v0, %v2858_v25  ;;  %3583 = vrcp.f32 %v1876_v58  ;;  %v2809_v47 = vsel %vm5316_vm8, %v2808_v45, %v2804_v20  ;;  %v2828_v42 = vrot.slane %v3562_v31, %v4614_v62  ;;  %vm5317_vm13 = vmmov %vm5311_vm4 }
 0x3cb   :  { %v3566_v7 = vpop.eup %3565  ;;  %v2868_v4 = vsel %vm2292_vm15, %v2867_v16, %v2863_v59  ;;  %v2814_v61 = vsel %vm5317_vm13, %v2813_v2, %v2809_v47  ;;  %v2892_v60 = vrot.slane %v3564_v35, %v4566_v12  ;;  %vm5318_vm15 = vcmask 917312   ;;  %vm5323_vm2 = vmmov %vm5311_vm4 }
 0x3cc   :  { %v3568_v29 = vpop.eup %3567  ;;  %v2873_v28 = vsel %vm2299_vm11, %v2872_v22, %v2868_v4  ;;  %v2833_v54 = vrot.slane %v3566_v7, %v4609_v36  ;;  %v2755_v56 = vsel %vm5318_vm15, %v2754_v9, %v2750_v43  ;;  %v2819_v23 = vsel %vm5319_vm1, %v2818_v51, %v2814_v61  ;;  %vm5320_vm11 = vmmov %vm5313_vm10 }
 0x3cd   :  { %v3570_v33 = vpop.eup %3569  ;;  %v2878_v57 = vsel %vm2306_vm12, %v2877_v55, %v2873_v28  ;;  %v2897_v50 = vrot.slane %v3568_v29, %v4587_v17  ;;  %v2824_v46 = vsel %vm5320_vm11, %v2823_v3, %v2819_v23  ;;  %vm5322_vm12 = vmmov %vm5314_vm7  ;;  %vm2932_vm4 = vcmask 1045509  }
 0x3ce   :  { %v3572_v24 = vpop.eup %3571  ;;  %v2883_v26 = vsel %vm2313_vm14, %v2882_v40, %v2878_v57  ;;  %v2829_v12 = vsel %vm5322_vm12, %v2828_v42, %v2824_v46  ;;  %v2760_v48 = vsel %vm2362_vm3, %v2759_v41, %v2755_v56  ;;  %vm5324_vm14 = vmmov %vm5318_vm15  ;;  %v2838_v9 = vrot.slane %v3570_v33, %v4621_v27 }
 0x3cf   :  { %v3574_v6 = vpop.eup %3573  ;;  %v2888_v63 = vsel %vm5321_vm6, %v2887_v30, %v2883_v26  ;;  %v2834_v13 = vsel %vm5324_vm14, %v2833_v54, %v2829_v12  ;;  %v2902_v15 = vrot.slane %v3572_v24, %v4583_v10  ;;  %vm2934_vm7 = vcmask 1046534   ;;  %vm5326_vm9 = vmmov %vm5322_vm12 }
 0x3d0   :  { %v2764_v5 = vrot.slane %v3574_v6, %v4618_v32  ;;  %v2893_v18 = vsel %vm5323_vm2, %v2892_v60, %v2888_v63  ;;  %v3576_v37 = vpop.eup %3575  ;;  %v2839_v34 = vsel %vm2362_vm3, %v2838_v9, %v2834_v13  ;;  %vm5327_vm8 = vmmov %vm5324_vm14  ;;  %vm2936_vm13 = vcmask 1047559  }
 0x3d1   :  { %v2898_v17 = vsel %vm5325_vm5, %v2897_v50, %v2893_v18  ;;  %v2907_v11 = vrot.slane %v3576_v37, %v4614_v62 }
 0x3d2   :  { %v3578_v19 = vpop.eup %3577  ;;  %v2765_v49 = vsel %vm2369_vm0, %v2764_v5, %v2760_v48  ;;  %v2903_v39 = vsel %vm5313_vm10, %v2902_v15, %v2898_v17 }
 0x3d3   :  { %v3580_v52 = vpop.eup %3579  ;;  %v2843_v38 = vrot.slane %v3578_v19, %v4618_v32  ;;  %v2933_v43 = vsel %vm2932_vm4, %v2765_v49, %v4968_v14  ;;  %v2908_v44 = vsel %vm5326_vm9, %v2907_v11, %v2903_v39 }
 0x3d4   :  { %v2912_v10 = vrot.slane %v3580_v52, %v4609_v36 }
 0x3d5   :  { %v2844_v0 = vsel %vm2369_vm0, %v2843_v38, %v2839_v34 }
 0x3d6   :  { %v3582_v53 = vpop.eup %3581  ;;  %v2935_v21 = vsel %vm2934_vm7, %v2844_v0, %v2933_v43  ;;  %v2913_v14 = vsel %vm5327_vm8, %v2912_v10, %v2908_v44 }
 0x3d7   :  { %v3584_v1 = vpop.eup %3583  ;;  %v2922_v45 = vrot.slane %v3582_v53, %v4618_v32 }
 0x3d8   :  { %v2917_v8 = vrot.slane %v3584_v1, %v4621_v27 }
 0x3da   :  { %v2918_v62 = vsel %vm2362_vm3, %v2917_v8, %v2913_v14 }
 0x3db   :  { %v2923_v58 = vsel %vm2369_vm0, %v2922_v45, %v2918_v62 }
 0x3dc   :  { %v2937_v36 = vsel %vm2936_vm13, %v2923_v58, %v2935_v21 }
 0x3dd   :  { %2939 = vst [vmem:[#allocation7] sm:$0xff] %v2937_v36 }
 0x3de   :  { %3636 = shalt.err (!%p3633_p0)
}
 0x3df   :  { %2949 = dma.vmem_to_hbm [thread:$0]  %s2947_s1, 128, %s5146_s4, [#allocation4]  }
 0x3e0   :  { %3649 = dma.done.wait [#allocation4], 128  }
 0x3e1   :  { %3650 = vsyncadd [#allocation4], 4294967168 }
 0x3e2   :  { %2953 = vsyncpa [#allocation3], 1 }
 0x3e3   :  { %2954 = vsyncpa [#allocation6], 1 }
 0x3e4   :  { %2955 = vsyncpa [#allocation4], 1 }

</bundles_post_ra>
